<compile_context>
chip_gen: v7x
topology: tpu7x:2x2x1
jax: 0.10.0
libtpu: 0.0.40
codegen_flags: <defaults>
</compile_context>

<pallas_src>
import functools

import jax
import jax.numpy as jnp
import numpy as np
from jax.experimental import pallas as pl
from jax.experimental.pallas import tpu as pltpu

POLY_N = 3
KH = 3
KW = 3


def onn_decoder_kernel(x_ref, w_ref, b_ref, s_ref, o_ref, *, img_w):
    """Per-batch ONNDecoder forward.

    x_ref : (C_in, H*W)                 f32  (batch dim squeezed by BlockSpec)
    w_ref : (KH*KW, C_out, P*C_in)      f32  (reordered PyTorch Conv3d weight)
    b_ref : (C_out, 1)                  f32
    s_ref : (H*W, 2Ho*2Wo)              f32  0/1 crop + 2x-upsample selector
    o_ref : (C_out, 2Ho*2Wo)            f32  (NCHW rows, flattened & lane-dense)
    """
    x = x_ref[...]                                   # (C_in, H*W)
    hw = x.shape[-1]

    # Polynomial expansion x, x^2, ..., x^POLY_N stacked along channels.
    powers = [x]
    for _ in range(POLY_N - 1):
        powers.append(powers[-1] * x)
    xe = jnp.concatenate(powers, axis=0)             # (P*C_in, H*W)

    c_out = w_ref.shape[1]
    acc = jnp.zeros((c_out, hw), jnp.float32)
    # Shift-and-matmul valid conv: 9 lane-dense MXU pushes total.
    for kh in range(KH):
        for kw in range(KW):
            s = kh * img_w + kw
            # xs[:, i] = xe[:, i + s]  (wrap only hits cropped positions)
            xs = xe if s == 0 else pltpu.roll(xe, shift=hw - s, axis=1)
            wmat = w_ref[kh * KW + kw]               # (C_out, P*C_in)
            acc = acc + jax.lax.dot_general(
                wmat, xs,
                dimension_numbers=(((1,), (0,)), ((), ())),
                preferred_element_type=jnp.float32)

    t = jnp.tanh(acc + b_ref[...])                   # (C_out, H*W)

    # Crop + 2x nearest upsample + NCHW flatten in one 0/1 selection matmul.
    # HIGHEST keeps this pure data movement bit-exact; cost is negligible.
    out = jax.lax.dot_general(
        t, s_ref[...],
        dimension_numbers=(((1,), (0,)), ((), ())),
        preferred_element_type=jnp.float32,
        precision=jax.lax.Precision.HIGHEST)
    o_ref[...] = out.astype(o_ref.dtype)


def _build_crop_upsample_selector(h, w, ho, wo):
    """0/1 matrix S with S[h_*W + w_, (2h_+dh)*(2Wo) + (2w_+dw)] = 1."""
    oh, ow = 2 * ho, 2 * wo
    sel = np.zeros((h * w, oh * ow), np.float32)
    for hh in range(ho):
        for ww in range(wo):
            src = hh * w + ww
            for dh in (0, 1):
                for dw in (0, 1):
                    sel[src, (2 * hh + dh) * ow + (2 * ww + dw)] = 1.0
    return jnp.asarray(sel)


def onn_decoder(x, weight, bias):
    """x: (N, C_in, H, W); weight: (C_out, C_in, POLY_N, KH, KW); bias: (C_out,)."""
    n, c_in, h, w = x.shape
    c_out = weight.shape[0]
    ho, wo = h - (KH - 1), w - (KW - 1)
    oh, ow = 2 * ho, 2 * wo
    hw = h * w

    x_flat = x.reshape(n, c_in, hw)                  # free: row-major metadata op

    # (O, I, P, KH, KW) -> (KH*KW, O, P*I) so the contraction axis matches the
    # in-kernel power-major channel concatenation (index = p*C_in + ci).
    w_flat = jnp.transpose(weight, (3, 4, 0, 2, 1)).reshape(
        KH * KW, c_out, POLY_N * c_in)
    b2 = bias.reshape(c_out, 1)
    sel = _build_crop_upsample_selector(h, w, ho, wo)    # (H*W, 2Ho*2Wo)
    # TODO(synk): for large H*W, tile Ho with a +2-row halo and replace the
    # dense selector (it grows O((H*W)^2)) with a per-row-tile variant so the
    # working set stays inside v7x's 64 MiB VMEM.

    kernel = functools.partial(onn_decoder_kernel, img_w=w)
    out_flat = pl.pallas_call(
        kernel,
        out_shape=jax.ShapeDtypeStruct((n, c_out, oh * ow), x.dtype),
        grid_spec=pltpu.PrefetchScalarGridSpec(
            num_scalar_prefetch=0,
            grid=(n,),
            in_specs=[
                pl.BlockSpec((pl.Squeezed(), c_in, hw), lambda b: (b, 0, 0)),
                pl.BlockSpec((KH * KW, c_out, POLY_N * c_in),
                             lambda b: (0, 0, 0)),
                pl.BlockSpec((c_out, 1), lambda b: (0, 0)),
                pl.BlockSpec((hw, oh * ow), lambda b: (0, 0)),
            ],
            out_specs=pl.BlockSpec((pl.Squeezed(), c_out, oh * ow),
                                   lambda b: (b, 0, 0)),
        ),
        compiler_params=pltpu.CompilerParams(
            dimension_semantics=("parallel",)),
    )(x_flat, w_flat, b2, sel)

    return out_flat.reshape(n, c_out, oh, ow)        # free: row-major split


def reference(x, weight, bias):
    """Pure-JAX reference mirroring the PyTorch ONNDecoder forward."""
    xp = jnp.stack([x ** (j + 1) for j in range(POLY_N)], axis=2)   # (N,C,P,H,W)
    out = jax.lax.conv_general_dilated(
        xp, weight,
        window_strides=(POLY_N, 1, 1),
        padding="VALID",
        dimension_numbers=("NCDHW", "OIDHW", "NCDHW"),
        precision=jax.lax.Precision.HIGHEST)
    out = out[:, :, 0] + bias[None, :, None, None]                  # squeeze depth
    out = jnp.tanh(out)
    out = jnp.repeat(jnp.repeat(out, 2, axis=2), 2, axis=3)         # nearest 2x
    return out


if __name__ == "__main__":
    N, C_IN, C_OUT, H, W = 2, 4, 8, 16, 16

    key = jax.random.PRNGKey(0)
    kx, kw_, kb = jax.random.split(key, 3)

    x = jax.random.uniform(kx, (N, C_IN, H, W), jnp.float32, -1.0, 1.0)

    # Deterministic init mimicking PyTorch Conv3d defaults: U(-1/sqrt(fan_in), ...).
    fan_in = C_IN * POLY_N * KH * KW
    bound = fan_in ** -0.5
    weight = jax.random.uniform(kw_, (C_OUT, C_IN, POLY_N, KH, KW),
                                jnp.float32, -bound, bound)
    bias = jax.random.uniform(kb, (C_OUT,), jnp.float32, -bound, bound)

    out = jax.block_until_ready(onn_decoder(x, weight, bias))
    ref = jax.block_until_ready(reference(x, weight, bias))

    assert out.shape == (N, C_OUT, 2 * (H - 2), 2 * (W - 2)), out.shape
    max_err = float(jnp.max(jnp.abs(out - ref)))
    # 2e-3 tolerance: the 9 conv matmuls now run at MXU default precision
    # (bf16-class passes) instead of Precision.HIGHEST.
    assert jnp.allclose(out, ref, atol=2e-3, rtol=2e-3), f"max abs err {max_err}"
    print("KERNEL_OK")
</pallas_src>

<mosaic_0001>
module attributes {stable_mosaic.version = 11 : i64} {
  func.func @onn_decoder_kernel(%arg0: i32, %arg1: memref<1x4x256xf32, #tpu.memory_space<vmem>>, %arg2: memref<9x8x12xf32, #tpu.memory_space<vmem>>, %arg3: memref<8x1xf32, #tpu.memory_space<vmem>>, %arg4: memref<256x784xf32, #tpu.memory_space<vmem>>, %arg5: memref<1x8x784xf32, #tpu.memory_space<vmem>>) attributes {dimension_semantics = [#tpu.dimension_semantics<parallel>], iteration_bounds = array<i64: 2>, scalar_prefetch = 0 : i64, scratch_operands = 0 : i64, tpu.core_type = #tpu.core_type<tc>, window_params = [{transform_indices = @transform_0, window_bounds = array<i64: 1, 4, 256>}, {pipeline_mode = #tpu.pipeline_mode<synchronous>, transform_indices = @transform_1, window_bounds = array<i64: 9, 8, 12>}, {pipeline_mode = #tpu.pipeline_mode<synchronous>, transform_indices = @transform_2, window_bounds = array<i64: 8, 1>}, {pipeline_mode = #tpu.pipeline_mode<synchronous>, transform_indices = @transform_3, window_bounds = array<i64: 256, 784>}, {transform_indices = @transform_4, window_bounds = array<i64: 1, 8, 784>}]} {
    %c0 = arith.constant 0 : index
    %c0_0 = arith.constant 0 : index
    %c0_1 = arith.constant 0 : index
    %0 = vector.load %arg1[%c0, %c0_0, %c0_1] : memref<1x4x256xf32, #tpu.memory_space<vmem>>, vector<1x4x256xf32>
    %1 = vector.shape_cast %0 : vector<1x4x256xf32> to vector<4x256xf32>
    %2 = arith.mulf %1, %1 : vector<4x256xf32>
    %3 = arith.mulf %2, %1 : vector<4x256xf32>
    %4 = tpu.concatenate %1, %2, %3 in 0 : vector<4x256xf32>, vector<4x256xf32>, vector<4x256xf32> -> vector<12x256xf32>
    %cst = arith.constant 0.000000e+00 : f32
    %5 = vector.broadcast %cst : f32 to vector<8x256xf32>
    %c0_2 = arith.constant 0 : index
    %c0_3 = arith.constant 0 : index
    %c0_4 = arith.constant 0 : index
    %6 = vector.load %arg2[%c0_2, %c0_3, %c0_4] : memref<9x8x12xf32, #tpu.memory_space<vmem>>, vector<1x8x12xf32>
    %7 = vector.shape_cast %6 : vector<1x8x12xf32> to vector<8x12xf32>
    %cst_5 = arith.constant dense<0.000000e+00> : vector<8x256xf32>
    %8 = tpu.matmul %7, %4, %cst_5 {dimension_numbers = #tpu.dot_dimension_numbers<[1], [0], [0], [1], [0, 0, 1, 1], [], []>} : vector<8x12xf32>, vector<12x256xf32>, vector<8x256xf32> -> vector<8x256xf32>
    %9 = arith.addf %5, %8 : vector<8x256xf32>
    %c255_i32 = arith.constant 255 : i32
    %10 = tpu.dynamic_rotate %4 by %c255_i32 dim 1 : vector<12x256xf32>, i32 -> vector<12x256xf32>
    %c1 = arith.constant 1 : index
    %c0_6 = arith.constant 0 : index
    %c0_7 = arith.constant 0 : index
    %11 = vector.load %arg2[%c1, %c0_6, %c0_7] : memref<9x8x12xf32, #tpu.memory_space<vmem>>, vector<1x8x12xf32>
    %12 = vector.shape_cast %11 : vector<1x8x12xf32> to vector<8x12xf32>
    %cst_8 = arith.constant dense<0.000000e+00> : vector<8x256xf32>
    %13 = tpu.matmul %12, %10, %cst_8 {dimension_numbers = #tpu.dot_dimension_numbers<[1], [0], [0], [1], [0, 0, 1, 1], [], []>} : vector<8x12xf32>, vector<12x256xf32>, vector<8x256xf32> -> vector<8x256xf32>
    %14 = arith.addf %9, %13 : vector<8x256xf32>
    %c254_i32 = arith.constant 254 : i32
    %15 = tpu.dynamic_rotate %4 by %c254_i32 dim 1 : vector<12x256xf32>, i32 -> vector<12x256xf32>
    %c2 = arith.constant 2 : index
    %c0_9 = arith.constant 0 : index
    %c0_10 = arith.constant 0 : index
    %16 = vector.load %arg2[%c2, %c0_9, %c0_10] : memref<9x8x12xf32, #tpu.memory_space<vmem>>, vector<1x8x12xf32>
    %17 = vector.shape_cast %16 : vector<1x8x12xf32> to vector<8x12xf32>
    %cst_11 = arith.constant dense<0.000000e+00> : vector<8x256xf32>
    %18 = tpu.matmul %17, %15, %cst_11 {dimension_numbers = #tpu.dot_dimension_numbers<[1], [0], [0], [1], [0, 0, 1, 1], [], []>} : vector<8x12xf32>, vector<12x256xf32>, vector<8x256xf32> -> vector<8x256xf32>
    %19 = arith.addf %14, %18 : vector<8x256xf32>
    %c240_i32 = arith.constant 240 : i32
    %20 = tpu.dynamic_rotate %4 by %c240_i32 dim 1 : vector<12x256xf32>, i32 -> vector<12x256xf32>
    %c3 = arith.constant 3 : index
    %c0_12 = arith.constant 0 : index
    %c0_13 = arith.constant 0 : index
    %21 = vector.load %arg2[%c3, %c0_12, %c0_13] : memref<9x8x12xf32, #tpu.memory_space<vmem>>, vector<1x8x12xf32>
    %22 = vector.shape_cast %21 : vector<1x8x12xf32> to vector<8x12xf32>
    %cst_14 = arith.constant dense<0.000000e+00> : vector<8x256xf32>
    %23 = tpu.matmul %22, %20, %cst_14 {dimension_numbers = #tpu.dot_dimension_numbers<[1], [0], [0], [1], [0, 0, 1, 1], [], []>} : vector<8x12xf32>, vector<12x256xf32>, vector<8x256xf32> -> vector<8x256xf32>
    %24 = arith.addf %19, %23 : vector<8x256xf32>
    %c239_i32 = arith.constant 239 : i32
    %25 = tpu.dynamic_rotate %4 by %c239_i32 dim 1 : vector<12x256xf32>, i32 -> vector<12x256xf32>
    %c4 = arith.constant 4 : index
    %c0_15 = arith.constant 0 : index
    %c0_16 = arith.constant 0 : index
    %26 = vector.load %arg2[%c4, %c0_15, %c0_16] : memref<9x8x12xf32, #tpu.memory_space<vmem>>, vector<1x8x12xf32>
    %27 = vector.shape_cast %26 : vector<1x8x12xf32> to vector<8x12xf32>
    %cst_17 = arith.constant dense<0.000000e+00> : vector<8x256xf32>
    %28 = tpu.matmul %27, %25, %cst_17 {dimension_numbers = #tpu.dot_dimension_numbers<[1], [0], [0], [1], [0, 0, 1, 1], [], []>} : vector<8x12xf32>, vector<12x256xf32>, vector<8x256xf32> -> vector<8x256xf32>
    %29 = arith.addf %24, %28 : vector<8x256xf32>
    %c238_i32 = arith.constant 238 : i32
    %30 = tpu.dynamic_rotate %4 by %c238_i32 dim 1 : vector<12x256xf32>, i32 -> vector<12x256xf32>
    %c5 = arith.constant 5 : index
    %c0_18 = arith.constant 0 : index
    %c0_19 = arith.constant 0 : index
    %31 = vector.load %arg2[%c5, %c0_18, %c0_19] : memref<9x8x12xf32, #tpu.memory_space<vmem>>, vector<1x8x12xf32>
    %32 = vector.shape_cast %31 : vector<1x8x12xf32> to vector<8x12xf32>
    %cst_20 = arith.constant dense<0.000000e+00> : vector<8x256xf32>
    %33 = tpu.matmul %32, %30, %cst_20 {dimension_numbers = #tpu.dot_dimension_numbers<[1], [0], [0], [1], [0, 0, 1, 1], [], []>} : vector<8x12xf32>, vector<12x256xf32>, vector<8x256xf32> -> vector<8x256xf32>
    %34 = arith.addf %29, %33 : vector<8x256xf32>
    %c224_i32 = arith.constant 224 : i32
    %35 = tpu.dynamic_rotate %4 by %c224_i32 dim 1 : vector<12x256xf32>, i32 -> vector<12x256xf32>
    %c6 = arith.constant 6 : index
    %c0_21 = arith.constant 0 : index
    %c0_22 = arith.constant 0 : index
    %36 = vector.load %arg2[%c6, %c0_21, %c0_22] : memref<9x8x12xf32, #tpu.memory_space<vmem>>, vector<1x8x12xf32>
    %37 = vector.shape_cast %36 : vector<1x8x12xf32> to vector<8x12xf32>
    %cst_23 = arith.constant dense<0.000000e+00> : vector<8x256xf32>
    %38 = tpu.matmul %37, %35, %cst_23 {dimension_numbers = #tpu.dot_dimension_numbers<[1], [0], [0], [1], [0, 0, 1, 1], [], []>} : vector<8x12xf32>, vector<12x256xf32>, vector<8x256xf32> -> vector<8x256xf32>
    %39 = arith.addf %34, %38 : vector<8x256xf32>
    %c223_i32 = arith.constant 223 : i32
    %40 = tpu.dynamic_rotate %4 by %c223_i32 dim 1 : vector<12x256xf32>, i32 -> vector<12x256xf32>
    %c7 = arith.constant 7 : index
    %c0_24 = arith.constant 0 : index
    %c0_25 = arith.constant 0 : index
    %41 = vector.load %arg2[%c7, %c0_24, %c0_25] : memref<9x8x12xf32, #tpu.memory_space<vmem>>, vector<1x8x12xf32>
    %42 = vector.shape_cast %41 : vector<1x8x12xf32> to vector<8x12xf32>
    %cst_26 = arith.constant dense<0.000000e+00> : vector<8x256xf32>
    %43 = tpu.matmul %42, %40, %cst_26 {dimension_numbers = #tpu.dot_dimension_numbers<[1], [0], [0], [1], [0, 0, 1, 1], [], []>} : vector<8x12xf32>, vector<12x256xf32>, vector<8x256xf32> -> vector<8x256xf32>
    %44 = arith.addf %39, %43 : vector<8x256xf32>
    %c222_i32 = arith.constant 222 : i32
    %45 = tpu.dynamic_rotate %4 by %c222_i32 dim 1 : vector<12x256xf32>, i32 -> vector<12x256xf32>
    %c8 = arith.constant 8 : index
    %c0_27 = arith.constant 0 : index
    %c0_28 = arith.constant 0 : index
    %46 = vector.load %arg2[%c8, %c0_27, %c0_28] : memref<9x8x12xf32, #tpu.memory_space<vmem>>, vector<1x8x12xf32>
    %47 = vector.shape_cast %46 : vector<1x8x12xf32> to vector<8x12xf32>
    %cst_29 = arith.constant dense<0.000000e+00> : vector<8x256xf32>
    %48 = tpu.matmul %47, %45, %cst_29 {dimension_numbers = #tpu.dot_dimension_numbers<[1], [0], [0], [1], [0, 0, 1, 1], [], []>} : vector<8x12xf32>, vector<12x256xf32>, vector<8x256xf32> -> vector<8x256xf32>
    %49 = arith.addf %44, %48 : vector<8x256xf32>
    %c0_30 = arith.constant 0 : index
    %c0_31 = arith.constant 0 : index
    %50 = vector.load %arg3[%c0_30, %c0_31] : memref<8x1xf32, #tpu.memory_space<vmem>>, vector<8x1xf32>
    %51 = vector.broadcast %50 : vector<8x1xf32> to vector<8x256xf32>
    %52 = arith.addf %49, %51 : vector<8x256xf32>
    %53 = math.tanh %52 : vector<8x256xf32>
    %c0_32 = arith.constant 0 : index
    %c0_33 = arith.constant 0 : index
    %54 = vector.load %arg4[%c0_32, %c0_33] : memref<256x784xf32, #tpu.memory_space<vmem>>, vector<256x784xf32>
    %cst_34 = arith.constant dense<0.000000e+00> : vector<8x784xf32>
    %55 = tpu.matmul %53, %54, %cst_34 {dimension_numbers = #tpu.dot_dimension_numbers<[1], [0], [0], [1], [0, 0, 1, 1], [], []>, precision = #tpu.contract_precision<fp32>} : vector<8x256xf32>, vector<256x784xf32>, vector<8x784xf32> -> vector<8x784xf32>
    %c0_35 = arith.constant 0 : index
    %c0_36 = arith.constant 0 : index
    %c0_37 = arith.constant 0 : index
    %56 = vector.load %arg5[%c0_35, %c0_36, %c0_37] : memref<1x8x784xf32, #tpu.memory_space<vmem>>, vector<1x8x784xf32>
    %57 = vector.shape_cast %56 : vector<1x8x784xf32> to vector<8x784xf32>
    %58 = vector.shape_cast %55 : vector<8x784xf32> to vector<1x8x784xf32>
    tpu.vector_store %arg5[%c0_35, %c0_36, %c0_37], %58 {strides = array<i32>} : memref<1x8x784xf32, #tpu.memory_space<vmem>>, vector<1x8x784xf32>,
    return
  }
  func.func @transform_0(%arg0: i32) -> (i32, i32, i32) {
    %c0_i32 = arith.constant 0 : i32
    %c0_i32_0 = arith.constant 0 : i32
    %c0_i32_1 = arith.constant 0 : i32
    return %arg0, %c0_i32, %c0_i32_0 : i32, i32, i32
  }
  func.func @transform_1(%arg0: i32) -> (i32, i32, i32) {
    %c0_i32 = arith.constant 0 : i32
    %c0_i32_0 = arith.constant 0 : i32
    %c0_i32_1 = arith.constant 0 : i32
    %c0_i32_2 = arith.constant 0 : i32
    return %c0_i32, %c0_i32_0, %c0_i32_1 : i32, i32, i32
  }
  func.func @transform_2(%arg0: i32) -> (i32, i32) {
    %c0_i32 = arith.constant 0 : i32
    %c0_i32_0 = arith.constant 0 : i32
    %c0_i32_1 = arith.constant 0 : i32
    return %c0_i32, %c0_i32_0 : i32, i32
  }
  func.func @transform_3(%arg0: i32) -> (i32, i32) {
    %c0_i32 = arith.constant 0 : i32
    %c0_i32_0 = arith.constant 0 : i32
    %c0_i32_1 = arith.constant 0 : i32
    return %c0_i32, %c0_i32_0 : i32, i32
  }
  func.func @transform_4(%arg0: i32) -> (i32, i32, i32) {
    %c0_i32 = arith.constant 0 : i32
    %c0_i32_0 = arith.constant 0 : i32
    %c0_i32_1 = arith.constant 0 : i32
    return %arg0, %c0_i32, %c0_i32_0 : i32, i32, i32
  }
}

</mosaic_0001>

<bundles_post_ra>
// kernel: tpu_custom_call.1
= control target key start
LH: loop header
LB: loop body
LE: loop exit
PB: predicated region body
PF: predicated region fallthrough
CT: control target
= control target key end

     0   :  { %9 = vsyncpa [#allocation3], 0  ;;  %s13067_s0 = inlined_call_operand.vmem [shape: f32[2,4,256], index: 0, kind: input, shape index: {}]   ;;  %s13068_s1 = inlined_call_operand.vmem [shape: f32[9,8,12], index: 1, kind: input, shape index: {}]   ;;  %s13069_s2 = inlined_call_operand.vmem [shape: f32[8,1], index: 2, kind: input, shape index: {}]   ;;  %s13070_s3 = inlined_call_operand.vmem [shape: f32[256,784], index: 3, kind: input, shape index: {}]   ;;  %s13071_s4 = inlined_call_operand.hbm [shape: f32[2,8,784], index: 4, kind: output, shape index: {}]  }
   0x1   :  { %11 = vsyncpa [#allocation3 + $0x1], 0  ;;  %s8035_s15 = smov 0   ;;  %s8037_s16 = smov 0  }
   0x2   :  { %s8039_s17 = smov 0   ;;  %s8041_s18 = smov 0  }
   0x3 LB: > { %s8056_s19 = sadd.s32 4294967295, %s7996_s18   ;;  %s6097_s20 = sadd.s32 4294967294, %s7996_s18   ;;  %s7996_s18 = sphi %s8041_s18, %s15328_s18   ;;  %s7992_s17 = sphi %s8039_s17, %s15327_s17   ;;  %s7988_s16 = sphi %s8037_s16, %s15326_s16   ;;  %s7984_s15 = sphi %s8035_s15, %s15325_s15  }
   0x4   : > { %s8060_s21 = sadd.s32 1, %s7996_s18   ;;  %s113_s22 = sadd.s32 1, %s7992_s17 }
   0x5   : > { %s110_s23 = ssub.s32 %s7996_s18, %s8060_s21  ;;  %p123_p0 = scmp.ne.s32.totalorder %s7992_s17, %s7988_s16 }
   0x6   : > { %p111_p1 = scmp.eq.s32.totalorder %s110_s23, 0  ;;  %p124_p2 = scmp.eq.s32.totalorder %s8056_s19, 1 }
   0x7   : > { %p129_p3 = scmp.ne.s32.totalorder %s7988_s16, %s7984_s15  ;;  %p130_p4 = scmp.eq.s32.totalorder %s6097_s20, 1 }
   0x8   : > { %s8071_s24 = scalar_select %p111_p1, %s7992_s17, %s113_s22  }
   0x9   : > { %p8073_p5 = por %p124_p2, %p123_p0  ;;  %p8077_p6 = por %p130_p4, %p129_p3 }
   0xa   : > { %p6100_p7 = scmp.ge.s32.totalorder %s7996_s18, 1  ;;  %p165_p8 = scmp.lt.s32.totalorder %s7996_s18, 3 }
   0xc   : > { %p166_p9 = pnand %p6100_p7, %p165_p8 }
   0xe   : > { %169 = sbr.rel (%p166_p9) target bundleno = 1370 (0x55a), region = 36 }
  0x15   : > { %p191_p10 = scmp.lt.s32.totalorder %s8056_s19, 1  ;;  %vm208_vm0 = vcmask 1043456   ;;  %v13093_v9 = vmov 0.0   ;;  %s7999_s6 = smov 127   ;;  %v220_v13 = vlaneseq  ;;  %v1067_v14 = vld [vmem:[%s13069_s2] sm:$0xff]  ;;  %v1078_v15 = vld [vmem:[%s13070_s3 + $0x8] sm:$0xff] }
  0x16   : > { %303 = vmatprep.mubr.f32.mxu0 %v13093_v9  ;;  %s8000_s7 = smov 126   ;;  %s8001_s8 = smov 112   ;;  %v1085_v16 = vld [vmem:[%s13070_s3 + $0x40] sm:$0xff]  ;;  %v8007_v18 = vmov 0   ;;  %v1301_v19 = vand.u32 4294901760, %v1078_v15  ;;  %v1084_v22 = vld [vmem:[%s13070_s3 + $0x38] sm:$0xff] }
  0x17   : > { %s192_s27 = scalar_select %p191_p10, %s8056_s19, 1  ;;  %v8118_v17 = vand.u32 127, %v220_v13  ;;  %7928 = vset.pattern.permute.xlu0 %v8007_v18  ;;  %v1305_v20 = vand.u32 4294901760, %v1085_v16  ;;  %v1077_v21 = vld [vmem:[%s13070_s3] sm:$0xff]  ;;  %v8129_v23 = vld [vmem:[%s13070_s3 + $0x78] sm:$0xff]  ;;  %v1307_v25 = vand.u32 4294901760, %v1084_v22 }
  0x18   : > { %s8002_s9 = smov 111   ;;  %s8003_s10 = smov 110   ;;  %v1303_v24 = vand.u32 4294901760, %v1077_v21  ;;  %v1099_v26 = vld [vmem:[%s13070_s3 + $0xb0] sm:$0xff]  ;;  %v1309_v27 = vand.u32 4294901760, %v8129_v23  ;;  %v8143_v29 = vld [vmem:[%s13070_s3 + $0xa8] sm:$0xff]  ;;  %v8145_v30 = vsub.f32 %v1078_v15, %v1301_v19 }
  0x19   : > { %s6141_s28 = sshll.u32 %s192_s27, 3  ;;  %s8004_s11 = smov 96   ;;  %v8138_v28 = vld [vmem:[%s13070_s3 + $0x70] sm:$0xff]  ;;  %v8147_v31 = vsub.f32 %v1085_v16, %v1305_v20  ;;  %v1313_v32 = vand.u32 4294901760, %v1099_v26  ;;  %v8152_v35 = vsub.f32 %v1084_v22, %v1307_v25  ;;  %v1315_v37 = vand.u32 4294901760, %v8143_v29  ;;  %v8198_v58 = vld [vmem:[%s13070_s3 + $0xe8] sm:$0xff] }
  0x1a   : > { %s195_s5 = scalar_lea.vmem %s13067_s0, %s6141_s28  ;;  %s8005_s12 = smov 95   ;;  %13782 = vst [vmem:[#allocation5_spill] sm:$0xff] %v8145_v30  ;;  %v1311_v33 = vand.u32 4294901760, %v8138_v28  ;;  %v8150_v34 = vsub.f32 %v1077_v21, %v1303_v24  ;;  %v8155_v36 = vsub.f32 %v8129_v23, %v1309_v27  ;;  %v13092_v38 = vand.u32 4294901760, %v8145_v30  ;;  %v8203_v59 = vld [vmem:[%s13070_s3 + $0x120] sm:$0xff]  ;;  %v8225_v18 = vld [vmem:[%s13070_s3 + $0x158] sm:$0xff] }
  0x1b   : > { %v196_v0 = vld [vmem:[%s195_s5] sm:$0xff]  ;;  %s8006_s13 = smov 94   ;;  %13783 = vst [vmem:[#allocation6_spill] sm:$0xff] %v8147_v31  ;;  %13785 = vst [vmem:[#allocation8_spill] sm:$0xff] %v8152_v35  ;;  %v13091_v39 = vand.u32 4294901760, %v8147_v31  ;;  %v8160_v40 = vsub.f32 %v1099_v26, %v1313_v32  ;;  %v13088_v43 = vand.u32 4294901760, %v8152_v35  ;;  %v8169_v45 = vsub.f32 %v8143_v29, %v1315_v37 }
  0x1c   : > { %v197_v1 = vmul.f32 %v196_v0, %v196_v0  ;;  %v200_v2 = vcombine.high %v196_v0, %v196_v0  ;;  %13784 = vst [vmem:[#allocation7_spill] sm:$0xff] %v8150_v34  ;;  %13786 = vst [vmem:[#allocation9_spill] sm:$0xff] %v8155_v36  ;;  %v8163_v41 = vsub.f32 %v8138_v28, %v1311_v33  ;;  %v13090_v42 = vand.u32 4294901760, %v8150_v34  ;;  %v8230_v21 = vld [vmem:[%s13070_s3 + $0x190] sm:$0xff] }
  0x1d   : > { %13787 = vst [vmem:[#allocation10_spill] sm:$0xff] %v8160_v40  ;;  %v13085_v44 = vand.u32 4294901760, %v8155_v36  ;;  %13789 = vst [vmem:[#allocation12_spill] sm:$0xff] %v8169_v45  ;;  %v1449_v46 = vsub.f32 %v8145_v30, %v13092_v38  ;;  %v1461_v47 = vsub.f32 %v8147_v31, %v13091_v39  ;;  %v13083_v48 = vand.u32 4294901760, %v8160_v40  ;;  %v8239_v26 = vld [vmem:[%s13070_s3 + $0x150] sm:$0xff] }
  0x1e   : > { %v8088_v3 = vmul.f32 %v197_v1, %v196_v0  ;;  %v203_v4 = vcombine.low %v197_v1, %v197_v1  ;;  %v8098_v7 = vsel %vm208_vm0, %v200_v2, %v197_v1  ;;  %13788 = vst [vmem:[#allocation11_spill] sm:$0xff] %v8163_v41  ;;  %v13081_v49 = vand.u32 4294901760, %v8163_v41  ;;  %v8216_v1 = vld [vmem:[%s13070_s3 + $0x118] sm:$0xff] }
  0x1f   : > { %v1455_v50 = vsub.f32 %v8150_v34, %v13090_v42  ;;  %v1467_v51 = vsub.f32 %v8152_v35, %v13088_v43  ;;  %v1473_v52 = vsub.f32 %v8155_v36, %v13085_v44  ;;  %v13080_v53 = vand.u32 4294901760, %v8169_v45 }
  0x20   : > { %v8091_v5 = vsel %vm208_vm0, %v196_v0, %v203_v4  ;;  %v8095_v6 = vcombine.high %v8088_v3, %v8088_v3  ;;  %v1450_v54 = vand.u32 4294901760, %v1449_v46  ;;  %v1462_v55 = vand.u32 4294901760, %v1461_v47  ;;  %v8211_v0 = vld [vmem:[%s13070_s3 + $0xe0] sm:$0xff] }
  0x21   : > { %v7848_v8 = vpack.i.bf16 %v8088_v3, %v8091_v5  ;;  %v1485_v56 = vsub.f32 %v8160_v40, %v13083_v48  ;;  %v1479_v57 = vsub.f32 %v8163_v41, %v13081_v49  ;;  %v1456_v60 = vand.u32 4294901760, %v1455_v50 }
  0x22   : > { %v7853_v10 = vpack.i.bf16 %v8095_v6, %v8098_v7  ;;  %v1468_v61 = vand.u32 4294901760, %v1467_v51  ;;  %v1474_v62 = vand.u32 4294901760, %v1473_v52  ;;  %v1491_v63 = vsub.f32 %v8169_v45, %v13080_v53  ;;  %v8260_v52 = vld [vmem:[%s13070_s3 + $0x188] sm:$0xff]  ;;  %v6118_v45 = vld [vmem:[%s13068_s1 + $0x20] sm:$0xff] }
  0x23   : > { %7849 = vrot.lane.b32.xlu0 %v7848_v8, %s7999_s6  ;;  %7859 = vrot.lane.b32.xlu1 %v7848_v8, %s8000_s7  ;;  %v6470_v2 = vpack.c.bf16 %v1462_v55, %v1450_v54  ;;  %v1486_v4 = vand.u32 4294901760, %v1485_v56  ;;  %v1317_v15 = vand.u32 4294901760, %v8198_v58  ;;  %v1321_v16 = vand.u32 4294901760, %v8203_v59 }
  0x24   : > { %v6472_v13 = vpack.c.bf16 %v1468_v61, %v1456_v60  ;;  %v1323_v23 = vand.u32 4294901760, %v8216_v1  ;;  %v8247_v47 = vpack.c.bf16 %v1313_v32, %v1309_v27  ;;  %v1325_v50 = vand.u32 4294901760, %v8225_v18 }
  0x25   : > { %6471 = vmatprep.subr.bf16.mxu1 %v6470_v2  ;;  %v6474_v22 = vpack.c.bf16 %v1486_v4, %v1474_v62  ;;  %v8242_v29 = vsub.f32 %v8198_v58, %v1317_v15  ;;  %v8245_v46 = vsub.f32 %v8203_v59, %v1321_v16  ;;  %v1329_v51 = vand.u32 4294901760, %v8230_v21 }
  0x26   : > { %6473 = vmatpush1.bf16.msra.mxu1 %v6472_v13  ;;  %13794 = vst [vmem:[#allocation17_spill] sm:$0xff] %v8247_v47  ;;  %v8264_v32 = vpack.c.bf16 %v1315_v37, %v1311_v33  ;;  %v1327_v55 = vand.u32 4294901760, %v8239_v26  ;;  %v8270_v58 = vsub.f32 %v8225_v18, %v1325_v50  ;;  %v1331_v37 = vand.u32 4294901760, %v8260_v52 }
  0x27   : > { %7854 = vrot.lane.b32.xlu0 %v7853_v10, %s7999_s6  ;;  %7864 = vrot.lane.b32.xlu1 %v7853_v10, %s8000_s7  ;;  %13792 = vst [vmem:[#allocation15_spill] sm:$0xff] %v8242_v29  ;;  %13793 = vst [vmem:[#allocation16_spill] sm:$0xff] %v8245_v46  ;;  %v13078_v54 = vand.u32 4294901760, %v8242_v29  ;;  %v13077_v27 = vand.u32 4294901760, %v8245_v46  ;;  %v8273_v59 = vsub.f32 %v8230_v21, %v1329_v51  ;;  %vm222_vm1 = vcmp.lt.s32.totalorder %v8118_v17, 127  ;;  %s188_s6 = sand.u32 1, %s7988_s16  }
  0x28   : > { %6475 = vmatprep.subr.bf16.mxu1 %v6474_v22  ;;  %13797 = vst [vmem:[#allocation20_spill] sm:$0xff] %v8264_v32  ;;  %13798 = vst [vmem:[#allocation21_spill] sm:$0xff] %v8270_v58  ;;  %v8283_v61 = vsub.f32 %v8239_v26, %v1327_v55  ;;  %v8295_v13 = vsub.f32 %v8260_v52, %v1331_v37  ;;  %vm396_vm2 = vcmp.lt.s32.totalorder %v8118_v17, 126  ;;  %vm8008_vm3 = vmmov 1   ;;  %s7796_s7 = smul.u32 56, %s188_s6  ;;  %s6024_s14 = scalar_lea.sflag [#allocation3], %s188_s6 }
  0x29   : > { %13799 = vst [vmem:[#allocation22_spill] sm:$0xff] %v8273_v59  ;;  %v1497_v60 = vsub.f32 %v8242_v29, %v13078_v54  ;;  %v1509_v33 = vsub.f32 %v8245_v46, %v13077_v27  ;;  %vm8595_vm4 = vmpackc.low %vm208_vm0, %vm8008_vm3  ;;  %vm229_vm5 = vcmask 97280   ;;  %vm493_vm6 = vcmp.lt.s32.totalorder %v8118_v17, 112 }
  0x2a   : > { %13800 = vst [vmem:[#allocation23_spill] sm:$0xff] %v8283_v61  ;;  %13801 = vst [vmem:[#allocation24_spill] sm:$0xff] %v8295_v13  ;;  %vm590_vm7 = vcmp.lt.s32.totalorder %v8118_v17, 111  ;;  %vm687_vm8 = vcmp.lt.s32.totalorder %v8118_v17, 110  ;;  %vm784_vm9 = vcmp.lt.s32.totalorder %v8118_v17, 96  ;;  %vm881_vm10 = vcmp.lt.s32.totalorder %v8118_v17, 95 }
  0x2b   : > { %7874 = vrot.lane.b32.xlu1 %v7853_v10, %s8001_s8  ;;  %7869 = vrot.lane.b32.xlu0 %v7848_v8, %s8001_s8  ;;  %v1498_v2 = vand.u32 4294901760, %v1497_v60  ;;  %v1510_v4 = vand.u32 4294901760, %v1509_v33  ;;  %v13079_v33 = vand.u32 4294901760, %v8295_v13  ;;  %vm978_vm11 = vcmp.lt.s32.totalorder %v8118_v17, 94  ;;  %s12707_s8 = scalar_lea.vmem [#allocation2], %s7796_s7 }
  0x2c   : > { %vm6021_vm12 = vcmask 130048  }
  0x2d   : > { %v6478_v52 = vpack.c.bf16 %v1510_v4, %v1498_v2 }
  0x2f   : > { %7884 = vrot.lane.b32.xlu1 %v7853_v10, %s8002_s9  ;;  %7879 = vrot.lane.b32.xlu0 %v7848_v8, %s8002_s9  ;;  %s7797_s9 = smul.u32 896, %s8056_s19  ;;  %s8009_s19 = smov [#allocation2]  }
  0x30   : > { %s7938_s22 = sshll.u32 %s8009_s19, 4  ;;  %s7939_s22 = int_to_ptr.vmem [resolvable:$false] %s7938_s22 }
  0x31   : > { %s7940_s23 = scalar_lea.vmem %s7939_s22, 1792 }
  0x33   : > { %7894 = vrot.lane.b32.xlu1 %v7853_v10, %s8003_s10  ;;  %7889 = vrot.lane.b32.xlu0 %v7848_v8, %s8003_s10  ;;  %s6038_s10 = sshll.u32 %s12707_s8, 4  ;;  %s13023_s10 = int_to_ptr.vmem [resolvable:$true] %s6038_s10 }
  0x34   : > { %s7934_s20 = scalar_lea.vmem %s13023_s10, 896  ;;  %p7941_p0 = scmp.lt.s32.totalorder %s13023_s10, %s7939_s22 }
  0x35   : > { %p7935_p11 = scmp.ne.s32.totalorder %s13023_s10, %s7934_s20  ;;  %p7942_p1 = scmp.lt.s32.totalorder %s7940_s23, %s7934_s20 }
  0x37   : > { %7904 = vrot.lane.b32.xlu1 %v7853_v10, %s8004_s11  ;;  %7899 = vrot.lane.b32.xlu0 %v7848_v8, %s8004_s11  ;;  %p7936_p12 = pnand %p7935_p11, %p8073_p5  ;;  %p7943_p2 = por %p7942_p1, %p7941_p0 }
  0x39   : > { %p7937_p13 = pneg %p7936_p12 }
  0x3b   : > { %7914 = vrot.lane.b32.xlu1 %v7853_v10, %s8005_s12  ;;  %7909 = vrot.lane.b32.xlu0 %v7848_v8, %s8005_s12  ;;  %p7944_p3 = pnand %p7943_p2, %p7937_p13 }
  0x3f   : > { %7924 = vrot.lane.b32.xlu1 %v7853_v10, %s8006_s13  ;;  %7919 = vrot.lane.b32.xlu0 %v7848_v8, %s8006_s13  ;;  %v1480_v8 = vand.u32 4294901760, %v1479_v57  ;;  %v8218_v10 = vpack.c.bf16 %v1305_v20, %v1301_v19  ;;  %v8232_v19 = vpack.c.bf16 %v1307_v25, %v1303_v24  ;;  %v1319_v20 = vand.u32 4294901760, %v8211_v0  ;;  %s13021_s13 = scalar_lea.hbm %s13071_s4, %s7797_s9 }
  0x40   : > { %v8253_v25 = vsub.f32 %v8216_v1, %v1323_v23  ;;  %v13072_v1 = vand.u32 4294901760, %v8273_v59 }
  0x41   : > { %13790 = vst [vmem:[#allocation13_spill] sm:$0xff] %v8218_v10  ;;  %13791 = vst [vmem:[#allocation14_spill] sm:$0xff] %v8232_v19  ;;  %v8250_v24 = vsub.f32 %v8211_v0, %v1319_v20  ;;  %v13073_v0 = vand.u32 4294901760, %v8270_v58  ;;  %v8336_v27 = vpack.c.bf16 %v1323_v23, %v1319_v20 }
  0x42   : > { %13796 = vst [vmem:[#allocation19_spill] sm:$0xff] %v8253_v25  ;;  %v13074_v57 = vand.u32 4294901760, %v8253_v25  ;;  %v1533_v26 = vsub.f32 %v8273_v59, %v13072_v1  ;;  %v8325_v1 = vld [vmem:[%s13070_s3 + $0x1f8] sm:$0xff] }
  0x43   : > { %1070 = vperm.xlu0 %7928, %v1067_v14   ;;  %v1492_v14 = vand.u32 4294901760, %v1491_v63  ;;  %13795 = vst [vmem:[#allocation18_spill] sm:$0xff] %v8250_v24  ;;  %v13076_v56 = vand.u32 4294901760, %v8250_v24  ;;  %v1521_v22 = vsub.f32 %v8270_v58, %v13073_v0  ;;  %13803 = vst [vmem:[#allocation26_spill] sm:$0xff] %v8336_v27 }
  0x44   : > { %v1515_v63 = vsub.f32 %v8253_v25, %v13074_v57  ;;  %v1534_v4 = vand.u32 4294901760, %v1533_v26 }
  0x45   : > { %v6476_v28 = vpack.c.bf16 %v1492_v14, %v1480_v8  ;;  %v1503_v62 = vsub.f32 %v8250_v24, %v13076_v56  ;;  %v13075_v8 = vand.u32 4294901760, %v8283_v61  ;;  %v8300_v14 = vld [vmem:[%s13070_s3 + $0x1c8] sm:$0xff]  ;;  %v1522_v2 = vand.u32 4294901760, %v1521_v22 }
  0x46   : > { %v1516_v21 = vand.u32 4294901760, %v1515_v63  ;;  %v8320_v63 = vld [vmem:[%s13070_s3 + $0x1c0] sm:$0xff]  ;;  %v1333_v57 = vand.u32 4294901760, %v8300_v14 }
  0x47   : > { %6477 = vmatpush1.bf16.msra.mxu1 %v6476_v28  ;;  %v1504_v18 = vand.u32 4294901760, %v1503_v62  ;;  %v1141_v28 = vld [vmem:[%s13070_s3 + $0x200] sm:$0xff]  ;;  %v1527_v60 = vsub.f32 %v8283_v61, %v13075_v8  ;;  %v8315_v62 = vpack.c.bf16 %v1321_v16, %v1317_v15  ;;  %v8331_v15 = vld [vmem:[%s13070_s3 + $0x238] sm:$0xff]  ;;  %v1539_v8 = vsub.f32 %v8295_v13, %v13079_v33 }
  0x48   : > { %6479 = vmatprep.subr.bf16.mxu1 %v6478_v52  ;;  %v1337_v56 = vand.u32 4294901760, %v1141_v28  ;;  %v8344_v22 = vsub.f32 %v8300_v14, %v1333_v57  ;;  %v1335_v26 = vand.u32 4294901760, %v8320_v63  ;;  %v1339_v52 = vand.u32 4294901760, %v8325_v1 }
  0x49   : > { %13802 = vst [vmem:[#allocation25_spill] sm:$0xff] %v8315_v62  ;;  %v6480_v0 = vpack.c.bf16 %v1516_v21, %v1504_v18  ;;  %v1528_v16 = vand.u32 4294901760, %v1527_v60  ;;  %v8341_v18 = vld [vmem:[%s13070_s3 + $0x270] sm:$0xff]  ;;  %v6482_v21 = vpack.c.bf16 %v1534_v4, %v1522_v2  ;;  %v1540_v60 = vand.u32 4294901760, %v1539_v8 }
  0x4a   : > { %13804 = vst [vmem:[#allocation27_spill] sm:$0xff] %v8344_v22  ;;  %v8348_v54 = vsub.f32 %v1141_v28, %v1337_v56  ;;  %v8350_v33 = vpack.c.bf16 %v1329_v51, %v1325_v50  ;;  %v1341_v20 = vand.u32 4294901760, %v8331_v15  ;;  %v13082_v23 = vand.u32 4294901760, %v8344_v22  ;;  %v8364_v8 = vld [vmem:[%s13070_s3 + $0x230] sm:$0xff]  ;;  %v8369_v50 = vld [vmem:[%s13070_s3 + $0x268] sm:$0xff] }
  0x4b   : > { %6481 = vmatpush1.bf16.msra.mxu1 %v6480_v0  ;;  %v8355_v0 = vsub.f32 %v8320_v63, %v1335_v26  ;;  %v8358_v14 = vsub.f32 %v8325_v1, %v1339_v52  ;;  %v1345_v2 = vand.u32 4294901760, %v8341_v18  ;;  %v6484_v51 = vpack.c.bf16 %v1540_v60, %v1528_v16 }
  0x4c   : > { %13805 = vst [vmem:[#allocation28_spill] sm:$0xff] %v8348_v54  ;;  %13806 = vst [vmem:[#allocation29_spill] sm:$0xff] %v8350_v33  ;;  %6483 = vmatprep.subr.bf16.mxu1 %v6482_v21  ;;  %v13084_v28 = vand.u32 4294901760, %v8348_v54  ;;  %v8373_v63 = vsub.f32 %v8331_v15, %v1341_v20  ;;  %v8375_v1 = vpack.c.bf16 %v1331_v37, %v1327_v55  ;;  %v1343_v55 = vand.u32 4294901760, %v8364_v8 }
  0x4d   : > { %13807 = vst [vmem:[#allocation30_spill] sm:$0xff] %v8355_v0  ;;  %13808 = vst [vmem:[#allocation31_spill] sm:$0xff] %v8358_v14  ;;  %v1545_v4 = vsub.f32 %v8344_v22, %v13082_v23  ;;  %v13086_v21 = vand.u32 4294901760, %v8355_v0  ;;  %v13087_v53 = vand.u32 4294901760, %v8358_v14  ;;  %v8383_v49 = vsub.f32 %v8341_v18, %v1345_v2 }
  0x4e   : > { %13809 = vst [vmem:[#allocation32_spill] sm:$0xff] %v8373_v63  ;;  %13810 = vst [vmem:[#allocation33_spill] sm:$0xff] %v8375_v1  ;;  %v1557_v16 = vsub.f32 %v8348_v54, %v13084_v28  ;;  %v13089_v15 = vand.u32 4294901760, %v8373_v63  ;;  %v1347_v37 = vand.u32 4294901760, %v8369_v50  ;;  %v8402_v44 = vsub.f32 %v8364_v8, %v1343_v55 }
  0x4f   : > { %13811 = vst [vmem:[#allocation34_spill] sm:$0xff] %v8383_v49  ;;  %6485 = vmatpush1.bf16.msra.mxu1 %v6484_v51  ;;  %v1546_v60 = vand.u32 4294901760, %v1545_v4  ;;  %v1551_v23 = vsub.f32 %v8355_v0, %v13086_v21  ;;  %v1563_v18 = vsub.f32 %v8358_v14, %v13087_v53  ;;  %v13095_v51 = vand.u32 4294901760, %v8383_v49  ;;  %v8410_v21 = vld [vmem:[%s13070_s3 + $0x2a8] sm:$0xff]  ;;  %v8415_v53 = vld [vmem:[%s13070_s3 + $0x2e0] sm:$0xff] }
  0x50   : > { %v1558_v48 = vand.u32 4294901760, %v1557_v16  ;;  %v1569_v28 = vsub.f32 %v8373_v63, %v13089_v15  ;;  %13812 = vst [vmem:[#allocation35_spill] sm:$0xff] %v8402_v44  ;;  %v8405_v4 = vsub.f32 %v8369_v50, %v1347_v37  ;;  %v8420_v15 = vpack.c.bf16 %v1337_v56, %v1333_v57  ;;  %v8425_v50 = vld [vmem:[%s13070_s3 + $0x2a0] sm:$0xff] }
  0x51   : > { %v1552_v16 = vand.u32 4294901760, %v1551_v23  ;;  %v1564_v43 = vand.u32 4294901760, %v1563_v18  ;;  %v1581_v8 = vsub.f32 %v8383_v49, %v13095_v51  ;;  %v13096_v38 = vand.u32 4294901760, %v8402_v44  ;;  %v8432_v23 = vld [vmem:[%s13070_s3 + $0x2d8] sm:$0xff] }
  0x52   : > { %13813 = vst [vmem:[#allocation36_spill] sm:$0xff] %v8405_v4  ;;  %13814 = vst [vmem:[#allocation37_spill] sm:$0xff] %v8420_v15  ;;  %v6486_v42 = vpack.c.bf16 %v1558_v48, %v1546_v60  ;;  %v1570_v39 = vand.u32 4294901760, %v1569_v28  ;;  %v13097_v9 = vand.u32 4294901760, %v8405_v4  ;;  %v1349_v56 = vand.u32 4294901760, %v8410_v21 }
  0x53   : > { %v6488_v18 = vpack.c.bf16 %v1564_v43, %v1552_v16  ;;  %v1582_v51 = vand.u32 4294901760, %v1581_v8  ;;  %v1353_v57 = vand.u32 4294901760, %v8415_v53  ;;  %v1575_v48 = vsub.f32 %v8402_v44, %v13096_v38  ;;  %v8448_v43 = vld [vmem:[%s13070_s3 + $0x318] sm:$0xff] }
  0x54   : > { %6487 = vmatprep.subr.bf16.mxu1 %v6486_v42  ;;  %v1587_v28 = vsub.f32 %v8405_v4, %v13097_v9  ;;  %v8442_v60 = vpack.c.bf16 %v1339_v52, %v1335_v26  ;;  %v1351_v12 = vand.u32 4294901760, %v8425_v50  ;;  %v8451_v42 = vsub.f32 %v8410_v21, %v1349_v56  ;;  %v1183_v26 = vld [vmem:[%s13070_s3 + $0x350] sm:$0xff] }
  0x55   : > { %6489 = vmatpush1.bf16.msra.mxu1 %v6488_v18  ;;  %v6490_v16 = vpack.c.bf16 %v1582_v51, %v1570_v39  ;;  %v8454_v8 = vsub.f32 %v8415_v53, %v1353_v57  ;;  %v1355_v38 = vand.u32 4294901760, %v8432_v23  ;;  %v1576_v52 = vand.u32 4294901760, %v1575_v48  ;;  %v8474_v18 = vld [vmem:[%s13070_s3 + $0x310] sm:$0xff] }
  0x56   : > { %13815 = vst [vmem:[#allocation38_spill] sm:$0xff] %v8442_v60  ;;  %13816 = vst [vmem:[#allocation39_spill] sm:$0xff] %v8451_v42  ;;  %v1588_v9 = vand.u32 4294901760, %v1587_v28  ;;  %v8461_v11 = vsub.f32 %v8425_v50, %v1351_v12  ;;  %v8463_v4 = vpack.c.bf16 %v1345_v2, %v1341_v20  ;;  %v13104_v39 = vand.u32 4294901760, %v8451_v42  ;;  %v8479_v20 = vld [vmem:[%s13070_s3 + $0x348] sm:$0xff] }
  0x57   : > { %13817 = vst [vmem:[#allocation40_spill] sm:$0xff] %v8454_v8  ;;  %6491 = vmatprep.subr.bf16.mxu1 %v6490_v16  ;;  %v13107_v21 = vand.u32 4294901760, %v8454_v8  ;;  %v8468_v53 = vsub.f32 %v8432_v23, %v1355_v38  ;;  %v1357_v51 = vand.u32 4294901760, %v8448_v43  ;;  %v1361_v48 = vand.u32 4294901760, %v1183_v26 }
  0x58   : > { %13818 = vst [vmem:[#allocation41_spill] sm:$0xff] %v8461_v11  ;;  %13819 = vst [vmem:[#allocation42_spill] sm:$0xff] %v8463_v4  ;;  %v6492_v2 = vpack.c.bf16 %v1588_v9, %v1576_v52  ;;  %v13108_v50 = vand.u32 4294901760, %v8461_v11  ;;  %v8482_v28 = vpack.c.bf16 %v1347_v37, %v1343_v55  ;;  %v1593_v23 = vsub.f32 %v8451_v42, %v13104_v39 }
  0x59   : > { %13820 = vst [vmem:[#allocation43_spill] sm:$0xff] %v8468_v53  ;;  %v1605_v16 = vsub.f32 %v8454_v8, %v13107_v21  ;;  %v13111_v44 = vand.u32 4294901760, %v8468_v53  ;;  %v8492_v49 = vsub.f32 %v8448_v43, %v1357_v51  ;;  %v8497_v55 = vsub.f32 %v1183_v26, %v1361_v48 }
  0x5a   : > { %13821 = vst [vmem:[#allocation44_spill] sm:$0xff] %v8482_v28  ;;  %6493 = vmatpush1.bf16.msra.mxu1 %v6492_v2  ;;  %v1599_v9 = vsub.f32 %v8461_v11, %v13108_v50  ;;  %v1359_v37 = vand.u32 4294901760, %v8474_v18  ;;  %v1363_v52 = vand.u32 4294901760, %v8479_v20  ;;  %v1594_v39 = vand.u32 4294901760, %v1593_v23  ;;  %v8508_v2 = vld [vmem:[%s13070_s3 + $0x388] sm:$0xff] }
  0x5b   : > { %13822 = vst [vmem:[#allocation45_spill] sm:$0xff] %v8492_v49  ;;  %13823 = vst [vmem:[#allocation46_spill] sm:$0xff] %v8497_v55  ;;  %v1606_v42 = vand.u32 4294901760, %v1605_v16  ;;  %v1611_v21 = vsub.f32 %v8468_v53, %v13111_v44  ;;  %v13120_v26 = vand.u32 4294901760, %v8497_v55  ;;  %v8520_v16 = vld [vmem:[%s13070_s3 + $0x3c0] sm:$0xff]  ;;  %v13826_v53 = vand.u32 4294901760, %v8492_v49 }
  0x5c   : > { %v1600_v50 = vand.u32 4294901760, %v1599_v9  ;;  %v8512_v11 = vsub.f32 %v8474_v18, %v1359_v37  ;;  %v8515_v23 = vsub.f32 %v8479_v20, %v1363_v52  ;;  %v8525_v9 = vpack.c.bf16 %v1353_v57, %v1349_v56  ;;  %v8541_v56 = vld [vmem:[%s13070_s3 + $0x3b8] sm:$0xff] }
  0x5d   : > { %v6494_v44 = vpack.c.bf16 %v1606_v42, %v1594_v39  ;;  %v1612_v43 = vand.u32 4294901760, %v1611_v21  ;;  %v1617_v8 = vsub.f32 %v8492_v49, %v13826_v53  ;;  %v1629_v18 = vsub.f32 %v8497_v55, %v13120_v26  ;;  %v8536_v42 = vld [vmem:[%s13070_s3 + $0x380] sm:$0xff] }
  0x5e   : > { %13824 = vst [vmem:[#allocation47_spill] sm:$0xff] %v8512_v11  ;;  %13825 = vst [vmem:[#allocation48_spill] sm:$0xff] %v8515_v23  ;;  %v13128_v20 = vand.u32 4294901760, %v8512_v11  ;;  %v13127_v63 = vand.u32 4294901760, %v8515_v23  ;;  %v13129_v21 = vand.u32 4294901760, %v8520_v16  ;;  %v8544_v53 = vpack.c.bf16 %v1355_v38, %v1351_v12 }
  0x5f   : > { %13827 = vst [vmem:[#allocation49_spill] sm:$0xff] %v8525_v9  ;;  %6495 = vmatprep.subr.bf16.mxu1 %v6494_v44  ;;  %v6496_v57 = vpack.c.bf16 %v1612_v43, %v1600_v50  ;;  %v1618_v39 = vand.u32 4294901760, %v1617_v8  ;;  %v1630_v26 = vand.u32 4294901760, %v1629_v18  ;;  %v13829_v49 = vand.u32 4294901760, %v8508_v2 }
  0x60   : > { %13828 = vst [vmem:[#allocation50_spill] sm:$0xff] %v8544_v53  ;;  %v1623_v14 = vsub.f32 %v8512_v11, %v13128_v20  ;;  %v1635_v55 = vsub.f32 %v8515_v23, %v13127_v63  ;;  %v8560_v12 = vsub.f32 %v8520_v16, %v13129_v21  ;;  %v13131_v38 = vand.u32 4294901760, %v8536_v42 }
  0x61   : > { %v8555_v0 = vsub.f32 %v8508_v2, %v13829_v49  ;;  %6497 = vmatpush1.bf16.msra.mxu1 %v6496_v57  ;;  %v8564_v8 = vpack.c.bf16 %v1361_v48, %v1357_v51  ;;  %v6498_v18 = vpack.c.bf16 %v1630_v26, %v1618_v39  ;;  %v13841_v61 = vpack.c.bf16 %v8095_v6, %v8098_v7 }
  0x62   : > { %13831 = vst [vmem:[#allocation52_spill] sm:$0xff] %v8560_v12  ;;  %v1624_v63 = vand.u32 4294901760, %v1623_v14  ;;  %v1636_v20 = vand.u32 4294901760, %v1635_v55  ;;  %v13142_v44 = vand.u32 4294901760, %v8560_v12  ;;  %v8577_v51 = vsub.f32 %v8536_v42, %v13131_v38 }
  0x63   : > { %13830 = vst [vmem:[#allocation51_spill] sm:$0xff] %v8555_v0  ;;  %13832 = vst [vmem:[#allocation53_spill] sm:$0xff] %v8564_v8  ;;  %v13130_v49 = vand.u32 4294901760, %v8555_v0  ;;  %6499 = vmatprep.subr.bf16.mxu1 %v6498_v18  ;;  %v13834_v14 = vand.u32 4294901760, %v8541_v56 }
  0x64   : > { %v6500_v57 = vpack.c.bf16 %v1636_v20, %v1624_v63  ;;  %13833 = vst [vmem:[#allocation54_spill] sm:$0xff] %v8577_v51  ;;  %v8585_v63 = vpack.c.bf16 %v1363_v52, %v1359_v37  ;;  %v1653_v38 = vsub.f32 %v8560_v12, %v13142_v44  ;;  %v8617_v37 = vld [vmem:[%s13070_s3 + $0x430] sm:$0xff] }
  0x65   : > { %v1641_v21 = vsub.f32 %v8555_v0, %v13130_v49  ;;  %v8583_v55 = vsub.f32 %v8541_v56, %v13834_v14 }
  0x66   : > { %13836 = vst [vmem:[#allocation56_spill] sm:$0xff] %v8585_v63  ;;  %6501 = vmatpush1.bf16.msra.mxu1 %v6500_v57  ;;  %v1654_v22 = vand.u32 4294901760, %v1653_v38 }
  0x67   : > { %13835 = vst [vmem:[#allocation55_spill] sm:$0xff] %v8583_v55  ;;  %v1642_v14 = vand.u32 4294901760, %v1641_v21  ;;  %v13840_v13 = vand.u32 4294901760, %v8583_v55 }
  0x69   : > { %v6502_v12 = vpack.c.bf16 %v1654_v22, %v1642_v14  ;;  %v8653_v22 = vld [vmem:[%s13070_s3 + $0x428] sm:$0xff] }
  0x6b   : > { %6503 = vmatprep.subr.bf16.mxu1 %v6502_v12  ;;  %v13844_v12 = vpack.c.bf16 %v8088_v3, %v8091_v5 }
  0x95   : > { %v7850_v50 = vpop.permute.xlu0 %7849  ;;  %v8566_v43 = vpop.permute.xlu1 %7859 }
  0x96   : > { %v7852_v48 = vunpack.i.h.bf16 %v7850_v50  ;;  %v7851_v26 = vunpack.i.l.bf16 %v7850_v50  ;;  %v7862_v39 = vunpack.i.h.bf16 %v8566_v43  ;;  %v7861_v18 = vunpack.i.l.bf16 %v8566_v43  ;;  %v9028_v50 = vld [vmem:[%s13070_s3 + $0x548] sm:$0xff] }
  0x99   : > { %v7855_v20 = vpop.permute.xlu0 %7854  ;;  %v7865_v49 = vpop.permute.xlu1 %7864 }
  0x9a   : > { %v7857_v0 = vunpack.i.h.bf16 %v7855_v20  ;;  %v7856_v23 = vunpack.i.l.bf16 %v7855_v20  ;;  %v7867_v11 = vunpack.i.h.bf16 %v7865_v49  ;;  %v7866_v54 = vunpack.i.l.bf16 %v7865_v49  ;;  %v8610_v49 = vld [vmem:[%s13070_s3 + $0x3f8] sm:$0xff] }
  0x9b   : > { %v13842_v14 = vand.u32 4294901760, %v8610_v49 }
  0x9c   : > { %v225_v43 = vsel %vm222_vm1, %v7856_v23, %v7851_v26  ;;  %v226_v57 = vsel %vm222_vm1, %v7857_v0, %v7852_v48  ;;  %v223_v21 = vsel %vm222_vm1, %v7851_v26, %v7856_v23  ;;  %v224_v38 = vsel %vm222_vm1, %v7852_v48, %v7857_v0 }
  0x9d   : > { %v6352_v20 = vpack.c.bf16 %v226_v57, %v225_v43  ;;  %v6355_v44 = vpack.c.bf16 %v224_v38, %v223_v21  ;;  %v8612_v52 = vpop.permute.xlu1 %7874  ;;  %v400_v23 = vsel %vm396_vm2, %v7867_v11, %v7862_v39  ;;  %v399_v0 = vsel %vm396_vm2, %v7866_v54, %v7861_v18  ;;  %v7870_v48 = vpop.permute.xlu0 %7869  ;;  %v8632_v21 = vld [vmem:[%s13070_s3 + $0x3f0] sm:$0xff]  ;;  %v6103_v38 = vld [vmem:[%s13068_s1 + $0x8] sm:$0xff] }
  0x9e   : > { %v13839_v26 = vand.u32 4294901760, %v8577_v51  ;;  %v13155_v57 = vand.u32 4294901760, %v8617_v37  ;;  %v7872_v59 = vunpack.i.h.bf16 %v7870_v48  ;;  %v7871_v58 = vunpack.i.l.bf16 %v7870_v48 }
  0x9f   : > { %6354 = vmatprep.subr.msk.bf16.mxu0 %vm8595_vm4, %v6352_v20  ;;  %v7877_v20 = vunpack.i.h.bf16 %v8612_v52  ;;  %v398_v6 = vsel %vm396_vm2, %v7862_v39, %v7867_v11  ;;  %v13161_v39 = vand.u32 4294901760, %v8653_v22  ;;  %v13847_v48 = vand.u32 4294901760, %v8508_v2 }
  0xa0   : > { %v1647_v43 = vsub.f32 %v8577_v51, %v13839_v26  ;;  %6357 = vmatpush1.bf16.msk.msra.mxu0 %vm8595_vm4, %v6355_v44  ;;  %v1659_v26 = vsub.f32 %v8583_v55, %v13840_v13  ;;  %v6364_v51 = vpack.c.bf16 %v400_v23, %v399_v0  ;;  %v7876_v44 = vunpack.i.l.bf16 %v8612_v52 }
  0xa1   : > { %6360 = vmatprep.subr.msk.bf16.mxu0 %vm8595_vm4, %v13841_v61  ;;  %v13158_v13 = vand.u32 4294901760, %v8632_v21  ;;  %v8663_v52 = vsub.f32 %v8610_v49, %v13842_v14  ;;  %v397_v23 = vsel %vm396_vm2, %v7861_v18, %v7866_v54  ;;  %v13845_v0 = vmov 0.0   ;;  %v8694_v18 = vld [vmem:[%s13070_s3 + $0x468] sm:$0xff]  ;;  %v7880_v2 = vpop.permute.xlu0 %7879 }
  0xa2   : > { %v1648_v7 = vand.u32 4294901760, %v1647_v43  ;;  %v1660_v61 = vand.u32 4294901760, %v1659_v26  ;;  %v8676_v11 = vsub.f32 %v8617_v37, %v13155_v57  ;;  %v13848_v43 = vand.u32 4294901760, %v8520_v16 }
  0xa3   : > { %6106 = vmatmul.mubr.msk.f32.vlgmr.msra.gmra.mrb[0].mxu0 %vm229_vm5, %v6103_v38  ;;  %13843 = vst [vmem:[#allocation57_spill] sm:$0xff] %v8663_v52  ;;  %v497_v3 = vsel %vm493_vm6, %v7877_v20, %v7872_v59  ;;  %v496_v5 = vsel %vm493_vm6, %v7876_v44, %v7871_v58  ;;  %v7885_v38 = vpop.permute.xlu1 %7884  ;;  %v8699_v16 = vsub.f32 %v8632_v21, %v13158_v13  ;;  %v13162_v14 = vand.u32 4294901760, %v8663_v52 }
  0xa4   : > { %6363 = vmatpush1.bf16.msk.msra.mxu0 %vm8595_vm4, %v13844_v12  ;;  %381 = vmatprep.mubr.f32.mxu0 %v13845_v0  ;;  %13846 = vst [vmem:[#allocation58_spill] sm:$0xff] %v8676_v11  ;;  %v8683_v54 = vpack.c.bf16 %v13848_v43, %v13847_v48  ;;  %v6367_v26 = vpack.c.bf16 %v398_v6, %v397_v23  ;;  %v211_v12 = vld [vmem:[%s13068_s1] sm:$0xff]  ;;  %v13163_v43 = vand.u32 4294901760, %v8676_v11  ;;  %v13164_v55 = vand.u32 4294901760, %v8694_v18 }
  0xa5   : > { %6366 = vmatprep.subr.msk.bf16.mxu0 %vm8595_vm4, %v6364_v51  ;;  %13850 = vst [vmem:[#allocation60_spill] sm:$0xff] %v8699_v16  ;;  %v6504_v51 = vpack.c.bf16 %v1660_v61, %v1648_v7  ;;  %v6370_v48 = vpack.c.bf16 %v497_v3, %v496_v5  ;;  %v8709_v57 = vsub.f32 %v8653_v22, %v13161_v39  ;;  %v7887_v13 = vunpack.i.h.bf16 %v7885_v38  ;;  %v8715_v61 = vld [vmem:[%s13070_s3 + $0x4a0] sm:$0xff] }
  0xa6   : > { %13849 = vst [vmem:[#allocation59_spill] sm:$0xff] %v8683_v54  ;;  %v7886_v25 = vunpack.i.l.bf16 %v7885_v38  ;;  %v7882_v6 = vunpack.i.h.bf16 %v7880_v2  ;;  %v7881_v7 = vunpack.i.l.bf16 %v7880_v2  ;;  %v13171_v3 = vand.u32 4294901760, %v8699_v16  ;;  %v8726_v2 = vpop.permute.xlu0 %7889 }
  0xa7   : > { %13851 = vst [vmem:[#allocation61_spill] sm:$0xff] %v8709_v57  ;;  %6505 = vmatpush1.bf16.msra.mxu1 %v6504_v51  ;;  %v8718_v23 = vpop.permute.xlu1 %7894  ;;  %v495_v5 = vsel %vm493_vm6, %v7872_v59, %v7877_v20  ;;  %v494_v38 = vsel %vm493_vm6, %v7871_v58, %v7876_v44  ;;  %v1665_v51 = vsub.f32 %v8663_v52, %v13162_v14  ;;  %v13853_v44 = vand.u32 4294901760, %v8536_v42 }
  0xa8   : > { %v1677_v39 = vsub.f32 %v8676_v11, %v13163_v43  ;;  %v8742_v58 = vsub.f32 %v8694_v18, %v13164_v55  ;;  %v593_v43 = vsel %vm590_vm7, %v7886_v25, %v7881_v7  ;;  %v8760_v55 = vld [vmem:[%s13070_s3 + $0x460] sm:$0xff]  ;;  %v6110_v11 = vld [vmem:[%s13068_s1 + $0x10] sm:$0xff]  ;;  %v13856_v52 = vand.u32 4294901760, %v8709_v57 }
  0xa9   : > { %v1666_v59 = vand.u32 4294901760, %v1665_v51  ;;  %v8787_v51 = vld [vmem:[%s13070_s3 + $0x498] sm:$0xff] }
  0xaa   : > { %13852 = vst [vmem:[#allocation62_spill] sm:$0xff] %v8742_v58  ;;  %v1678_v20 = vand.u32 4294901760, %v1677_v39  ;;  %v1683_v42 = vsub.f32 %v8709_v57, %v13856_v52  ;;  %v592_v39 = vsel %vm590_vm7, %v7882_v6, %v7887_v13  ;;  %v591_v52 = vsel %vm590_vm7, %v7881_v7, %v7886_v25  ;;  %v8806_v25 = vpop.permute.xlu0 %7899 }
  0xab   : > { %6109 = vmatmul.mubr.msk.f32.vlgmr.msra.gmra.mrb[0].mxu0 %vm229_vm5, %v211_v12  ;;  %v13854_v12 = vand.u32 4294901760, %v8541_v56  ;;  %v13860_v56 = vunpack.i.h.bf16 %v8718_v23 }
  0xac   : > { %6369 = vmatpush1.bf16.msk.msra.mxu0 %vm8595_vm4, %v6367_v26  ;;  %476 = vmatprep.mubr.f32.mxu0 %v13845_v0  ;;  %v594_v26 = vsel %vm590_vm7, %v7887_v13, %v7882_v6  ;;  %v13862_v13 = vunpack.i.l.bf16 %v8718_v23  ;;  %v8803_v6 = vpop.permute.xlu1 %7904  ;;  %v6506_v7 = vpack.c.bf16 %v1678_v20, %v1666_v59  ;;  %v1684_v57 = vand.u32 4294901760, %v1683_v42 }
  0xad   : > { %v8748_v14 = vpack.c.bf16 %v13854_v12, %v13853_v44  ;;  %6372 = vmatprep.subr.msk.bf16.mxu0 %vm8595_vm4, %v6370_v48  ;;  %v1671_v48 = vsub.f32 %v8699_v16, %v13171_v3  ;;  %v6373_v12 = vpack.c.bf16 %v495_v5, %v494_v38  ;;  %v13857_v44 = vand.u32 4294901760, %v8715_v61 }
  0xae   : > { %v6376_v38 = vpack.c.bf16 %v594_v26, %v593_v43  ;;  %v13859_v3 = vunpack.i.h.bf16 %v8726_v2  ;;  %v13861_v5 = vunpack.i.l.bf16 %v8726_v2  ;;  %v6379_v59 = vpack.c.bf16 %v592_v39, %v591_v52  ;;  %v8838_v39 = vld [vmem:[%s13070_s3 + $0x4d0] sm:$0xff]  ;;  %6507 = vmatprep.subr.bf16.mxu1 %v6506_v7 }
  0xaf   : > { %13855 = vst [vmem:[#allocation63_spill] sm:$0xff] %v8748_v14  ;;  %v8779_v24 = vsub.f32 %v8715_v61, %v13857_v44  ;;  %v1672_v26 = vand.u32 4294901760, %v1671_v48  ;;  %v13864_v48 = vand.u32 4294901760, %v8760_v55  ;;  %v13868_v7 = vand.u32 4294901760, %v8610_v49 }
  0xb0   : > { %v691_v44 = vsel %vm687_vm8, %v13860_v56, %v13859_v3  ;;  %v690_v43 = vsel %vm687_vm8, %v13862_v13, %v13861_v5  ;;  %v13863_v3 = vand.u32 4294901760, %v8742_v58  ;;  %v13871_v13 = vand.u32 4294901760, %v8632_v21 }
  0xb1   : > { %13858 = vst [vmem:[#allocation64_spill] sm:$0xff] %v8779_v24  ;;  %v13176_v5 = vand.u32 4294901760, %v8779_v24  ;;  %v6382_v20 = vpack.c.bf16 %v691_v44, %v690_v43  ;;  %v6508_v44 = vpack.c.bf16 %v1684_v57, %v1672_v26  ;;  %v13869_v57 = vand.u32 4294901760, %v8617_v37 }
  0xb2   : > { %v1689_v56 = vsub.f32 %v8742_v58, %v13863_v3  ;;  %v8833_v3 = vld [vmem:[%s13070_s3 + $0x510] sm:$0xff]  ;;  %v13866_v58 = vand.u32 4294901760, %v8787_v51  ;;  %v13183_v49 = vand.u32 4294901760, %v8838_v39 }
  0xb3   : > { %6113 = vmatmul.mubr.msk.f32.vlgmr.msra.gmra.mrb[0].mxu0 %vm229_vm5, %v6110_v11  ;;  %v8819_v11 = vsub.f32 %v8760_v55, %v13864_v48  ;;  %v8845_v48 = vld [vmem:[%s13070_s3 + $0x508] sm:$0xff]  ;;  %v1701_v42 = vsub.f32 %v8779_v24, %v13176_v5  ;;  %v8860_v26 = vpack.c.bf16 %v13869_v57, %v13868_v7  ;;  %6509 = vmatpush1.bf16.msra.mxu1 %v6508_v44  ;;  %v7901_v5 = vunpack.i.l.bf16 %v8806_v25 }
  0xb4   : > { %6375 = vmatpush1.bf16.msk.msra.mxu0 %vm8595_vm4, %v6373_v12  ;;  %573 = vmatprep.mubr.f32.mxu0 %v13845_v0  ;;  %v8828_v12 = vld [vmem:[%s13070_s3 + $0x4d8] sm:$0xff]  ;;  %v1690_v43 = vand.u32 4294901760, %v1689_v56 }
  0xb5   : > { %13865 = vst [vmem:[#allocation65_spill] sm:$0xff] %v8819_v11  ;;  %6378 = vmatprep.subr.msk.bf16.mxu0 %vm8595_vm4, %v6376_v38  ;;  %v8854_v38 = vsub.f32 %v8787_v51, %v13866_v58  ;;  %13870 = vst [vmem:[#allocation67_spill] sm:$0xff] %v8860_v26  ;;  %v6114_v56 = vld [vmem:[%s13068_s1 + $0x18] sm:$0xff]  ;;  %v13872_v58 = vand.u32 4294901760, %v8653_v22  ;;  %v1702_v37 = vand.u32 4294901760, %v1701_v42  ;;  %v13874_v7 = vand.u32 4294901760, %v8819_v11 }
  0xb6   : > { %v13875_v52 = vand.u32 4294901760, %v8828_v12  ;;  %v13877_v22 = vand.u32 4294901760, %v8833_v3  ;;  %v8893_v42 = vsub.f32 %v8838_v39, %v13183_v49  ;;  %v13883_v49 = vunpack.i.h.bf16 %v8726_v2 }
  0xb7   : > { %13867 = vst [vmem:[#allocation66_spill] sm:$0xff] %v8854_v38  ;;  %v8871_v24 = vpack.c.bf16 %v13872_v58, %v13871_v13  ;;  %v1695_v57 = vsub.f32 %v8819_v11, %v13874_v7  ;;  %v13184_v16 = vand.u32 4294901760, %v8854_v38  ;;  %v6510_v58 = vpack.c.bf16 %v1702_v37, %v1690_v43 }
  0xb8   : > { %v8883_v21 = vsub.f32 %v8828_v12, %v13875_v52  ;;  %v8888_v13 = vsub.f32 %v8833_v3, %v13877_v22  ;;  %13879 = vst [vmem:[#allocation71_spill] sm:$0xff] %v8893_v42  ;;  %v13880_v52 = vand.u32 4294901760, %v8845_v48  ;;  %v13882_v22 = vunpack.i.h.bf16 %v8718_v23 }
  0xb9   : > { %13873 = vst [vmem:[#allocation68_spill] sm:$0xff] %v8871_v24  ;;  %v1696_v7 = vand.u32 4294901760, %v1695_v57  ;;  %v1707_v44 = vsub.f32 %v8854_v38, %v13184_v16  ;;  %v13885_v16 = vunpack.i.l.bf16 %v8726_v2  ;;  %6511 = vmatprep.subr.bf16.mxu1 %v6510_v58  ;;  %v7910_v58 = vpop.permute.xlu0 %7909 }
  0xba   : > { %13876 = vst [vmem:[#allocation69_spill] sm:$0xff] %v8883_v21  ;;  %13878 = vst [vmem:[#allocation70_spill] sm:$0xff] %v8888_v13  ;;  %v8902_v11 = vsub.f32 %v8845_v48, %v13880_v52  ;;  %v689_v43 = vsel %vm687_vm8, %v13883_v49, %v13882_v22  ;;  %v13884_v52 = vunpack.i.l.bf16 %v8718_v23  ;;  %v13886_v49 = vunpack.i.h.bf16 %v8806_v25 }
  0xbb   : > { %6117 = vmatmul.mubr.msk.f32.vlgmr.msra.gmra.mrb[0].mxu0 %vm229_vm5, %v6114_v56  ;;  %v13887_v22 = vunpack.i.h.bf16 %v8803_v6  ;;  %v1708_v37 = vand.u32 4294901760, %v1707_v44  ;;  %v13888_v23 = vunpack.i.l.bf16 %v8803_v6  ;;  %v13890_v38 = vand.u32 4294901760, %v8888_v13 }
  0xbc   : > { %13881 = vst [vmem:[#allocation72_spill] sm:$0xff] %v8902_v11  ;;  %6381 = vmatpush1.bf16.msk.msra.mxu0 %vm8595_vm4, %v6379_v59  ;;  %670 = vmatprep.mubr.f32.mxu0 %v13845_v0  ;;  %v688_v59 = vsel %vm687_vm8, %v13885_v16, %v13884_v52  ;;  %v13207_v57 = vand.u32 4294901760, %v8902_v11  ;;  %v7915_v16 = vpop.permute.xlu1 %7914  ;;  %v13889_v52 = vand.u32 4294901760, %v8883_v21 }
  0xbd   : > { %6384 = vmatprep.subr.msk.bf16.mxu0 %vm8595_vm4, %v6382_v20  ;;  %v788_v56 = vsel %vm784_vm9, %v13887_v22, %v13886_v49  ;;  %v787_v2 = vsel %vm784_vm9, %v13888_v23, %v7901_v5  ;;  %v1725_v46 = vsub.f32 %v8888_v13, %v13890_v38  ;;  %v13891_v49 = vand.u32 4294901760, %v8893_v42 }
  0xbe   : > { %v1713_v20 = vsub.f32 %v8883_v21, %v13889_v52  ;;  %v6512_v22 = vpack.c.bf16 %v1708_v37, %v1696_v7  ;;  %v1731_v29 = vsub.f32 %v8902_v11, %v13207_v57  ;;  %v6385_v23 = vpack.c.bf16 %v689_v43, %v688_v59 }
  0xbf   : > { %v1719_v44 = vsub.f32 %v8893_v42, %v13891_v49  ;;  %v1726_v21 = vand.u32 4294901760, %v1725_v46  ;;  %v6388_v40 = vpack.c.bf16 %v788_v56, %v787_v2  ;;  %v7917_v38 = vunpack.i.h.bf16 %v7915_v16 }
  0xc0   : > { %v1714_v52 = vand.u32 4294901760, %v1713_v20  ;;  %6513 = vmatpush1.bf16.msra.mxu1 %v6512_v22  ;;  %v1732_v13 = vand.u32 4294901760, %v1731_v29  ;;  %v7916_v36 = vunpack.i.l.bf16 %v7915_v16  ;;  %v7912_v49 = vunpack.i.h.bf16 %v7910_v58 }
  0xc1   : > { %v1720_v41 = vand.u32 4294901760, %v1719_v44  ;;  %v7911_v42 = vunpack.i.l.bf16 %v7910_v58  ;;  %v13892_v46 = vunpack.i.h.bf16 %v8803_v6  ;;  %v13893_v56 = vunpack.i.h.bf16 %v8806_v25  ;;  %v7925_v25 = vpop.permute.xlu1 %7924 }
  0xc2   : > { %v6514_v7 = vpack.c.bf16 %v1726_v21, %v1714_v52  ;;  %v13894_v37 = vunpack.i.l.bf16 %v8803_v6  ;;  %v6122_v6 = vld [vmem:[%s13068_s1 + $0x28] sm:$0xff]  ;;  %v7926_v16 = vunpack.i.l.bf16 %v7925_v25  ;;  %v883_v44 = vsel %vm881_vm10, %v7912_v49, %v7917_v38 }
  0xc3   : > { %6121 = vmatmul.mubr.msk.f32.vlgmr.msra.gmra.mrb[0].mxu0 %vm229_vm5, %v6118_v45  ;;  %v6516_v43 = vpack.c.bf16 %v1732_v13, %v1720_v41  ;;  %v786_v29 = vsel %vm784_vm9, %v13893_v56, %v13892_v46  ;;  %v885_v41 = vsel %vm881_vm10, %v7917_v38, %v7912_v49  ;;  %v884_v21 = vsel %vm881_vm10, %v7916_v36, %v7911_v42  ;;  %v7920_v13 = vpop.permute.xlu0 %7919  ;;  %v6130_v38 = vld [vmem:[%s13068_s1 + $0x38] sm:$0xff]  ;;  %v6134_v49 = vld [vmem:[%s13068_s1 + $0x40] sm:$0xff] }
  0xc4   : > { %6387 = vmatpush1.bf16.msk.msra.mxu0 %vm8595_vm4, %v6385_v23  ;;  %767 = vmatprep.mubr.f32.mxu0 %v13845_v0  ;;  %v785_v45 = vsel %vm784_vm9, %v7901_v5, %v13894_v37  ;;  %v6394_v2 = vpack.c.bf16 %v885_v41, %v884_v21  ;;  %v7927_v5 = vunpack.i.h.bf16 %v7925_v25  ;;  %v7922_v20 = vunpack.i.h.bf16 %v7920_v13  ;;  %v9045_v37 = vld [vmem:[%s13070_s3 + $0x578] sm:$0xff] }
  0xc5   : > { %6390 = vmatprep.subr.msk.bf16.mxu0 %vm8595_vm4, %v6388_v40  ;;  %6515 = vmatprep.subr.bf16.mxu1 %v6514_v7  ;;  %v6391_v59 = vpack.c.bf16 %v786_v29, %v785_v45  ;;  %v7921_v40 = vunpack.i.l.bf16 %v7920_v13  ;;  %v882_v58 = vsel %vm881_vm10, %v7911_v42, %v7916_v36  ;;  %v6126_v7 = vld [vmem:[%s13068_s1 + $0x30] sm:$0xff]  ;;  %v13217_v46 = vand.u32 4294901760, %v9028_v50  ;;  %v9040_v29 = vld [vmem:[%s13070_s3 + $0x540] sm:$0xff] }
  0xc6   : > { %6517 = vmatpush1.bf16.msra.mxu1 %v6516_v43  ;;  %v982_v22 = vsel %vm978_vm11, %v7927_v5, %v7922_v20  ;;  %v6397_v52 = vpack.c.bf16 %v883_v44, %v882_v58  ;;  %v980_v17 = vsel %vm978_vm11, %v7922_v20, %v7927_v5  ;;  %v13212_v45 = vand.u32 4294901760, %v9040_v29  ;;  %v9086_v44 = vld [vmem:[%s13070_s3 + $0x5b0] sm:$0xff]  ;;  %v9091_v58 = vld [vmem:[%s13070_s3 + $0x5e8] sm:$0xff] }
  0xc7   : > { %v981_v23 = vsel %vm978_vm11, %v7926_v16, %v7921_v40  ;;  %v979_v36 = vsel %vm978_vm11, %v7921_v40, %v7926_v16  ;;  %v13211_v41 = vand.u32 4294901760, %v9045_v37  ;;  %v9052_v21 = vsub.f32 %v9028_v50, %v13217_v46 }
  0xc8   : > { %v6400_v43 = vpack.c.bf16 %v982_v22, %v981_v23  ;;  %v6403_v42 = vpack.c.bf16 %v980_v17, %v979_v36  ;;  %v9062_v13 = vsub.f32 %v9040_v29, %v13212_v45 }
  0xc9   : > { %13895 = vst [vmem:[#allocation73_spill] sm:$0xff] %v9052_v21  ;;  %v13206_v5 = vand.u32 4294901760, %v9052_v21 }
  0xca   : > { %13897 = vst [vmem:[#allocation75_spill] sm:$0xff] %v9062_v13  ;;  %v13210_v22 = vand.u32 4294901760, %v9062_v13 }
  0xcb   : > { %6125 = vmatmul.mubr.msk.f32.vlgmr.msra.gmra.mrb[0].mxu0 %vm229_vm5, %v6122_v6  ;;  %v9072_v6 = vld [vmem:[%s13070_s3 + $0x5b8] sm:$0xff] }
  0xcc   : > { %6393 = vmatpush1.bf16.msk.msra.mxu0 %vm8595_vm4, %v6391_v59  ;;  %864 = vmatprep.mubr.f32.mxu0 %v13845_v0  ;;  %v9067_v59 = vsub.f32 %v9045_v37, %v13211_v41  ;;  %v13209_v20 = vand.u32 4294901760, %v9072_v6 }
  0xcd   : > { %6396 = vmatprep.subr.msk.bf16.mxu0 %vm8595_vm4, %v6394_v2  ;;  %v9077_v2 = vld [vmem:[%s13070_s3 + $0x5f0] sm:$0xff] }
  0xce   : > { %13898 = vst [vmem:[#allocation76_spill] sm:$0xff] %v9067_v59  ;;  %v13208_v40 = vand.u32 4294901760, %v9077_v2  ;;  %v13213_v23 = vand.u32 4294901760, %v9067_v59  ;;  %v9106_v36 = vsub.f32 %v9072_v6, %v13209_v20 }
  0xd0   : > { %13899 = vst [vmem:[#allocation77_spill] sm:$0xff] %v9106_v36  ;;  %v13219_v20 = vand.u32 4294901760, %v9106_v36 }
  0xd2   : > { %v1761_v46 = vsub.f32 %v9106_v36, %v13219_v20 }
  0xd3   : > { %6129 = vmatmul.mubr.msk.f32.vlgmr.msra.gmra.mrb[0].mxu0 %vm229_vm5, %v6126_v7  ;;  %v13216_v7 = vand.u32 4294901760, %v9091_v58 }
  0xd4   : > { %6399 = vmatpush1.bf16.msk.msra.mxu0 %vm8595_vm4, %v6397_v52  ;;  %961 = vmatprep.mubr.f32.mxu0 %v13845_v0  ;;  %v13215_v52 = vand.u32 4294901760, %v9086_v44 }
  0xd5   : > { %6402 = vmatprep.subr.msk.bf16.mxu0 %vm8595_vm4, %v6400_v43  ;;  %v1737_v43 = vsub.f32 %v9052_v21, %v13206_v5  ;;  %v9127_v5 = vsub.f32 %v9091_v58, %v13216_v7  ;;  %v13904_v7 = vand.u32 4294901760, %v8715_v61  ;;  %v13906_v61 = vand.u32 4294901760, %v8760_v55 }
  0xd7   : > { %13902 = vst [vmem:[#allocation80_spill] sm:$0xff] %v9127_v5  ;;  %v1738_v57 = vand.u32 4294901760, %v1737_v43  ;;  %v9141_v43 = vld [vmem:[%s13070_s3 + $0x660] sm:$0xff]  ;;  %v13910_v20 = vand.u32 4294901760, %v9127_v5 }
  0xdb   : > { %6133 = vmatmul.mubr.msk.f32.vlgmr.msra.gmra.mrb[0].mxu0 %vm229_vm5, %v6130_v38  ;;  %v1743_v38 = vsub.f32 %v9062_v13, %v13210_v22 }
  0xdc   : > { %6405 = vmatpush1.bf16.msk.msra.mxu0 %vm8595_vm4, %v6403_v42  ;;  %1058 = vmatprep.mubr.f32.mxu0 %v13845_v0  ;;  %v9033_v0 = vld [vmem:[%s13070_s3 + $0x580] sm:$0xff]  ;;  %v9111_v42 = vsub.f32 %v9077_v2, %v13208_v40 }
  0xdd   : > { %6407 = vmatprep.subr.bf16.mxu0 %v8218_v10  ;;  %v13214_v56 = vand.u32 4294901760, %v9033_v0  ;;  %v1744_v41 = vand.u32 4294901760, %v1743_v38  ;;  %v14030_v10 = vld [vmem:[#allocation57_spill] sm:$0xff] }
  0xde   : > { %13900 = vst [vmem:[#allocation78_spill] sm:$0xff] %v9111_v42  ;;  %v13218_v22 = vand.u32 4294901760, %v9111_v42 }
  0xdf   : > { %v9057_v25 = vsub.f32 %v9033_v0, %v13214_v56 }
  0xe0   : > { %v1773_v56 = vsub.f32 %v9111_v42, %v13218_v22 }
  0xe1   : > { %13896 = vst [vmem:[#allocation74_spill] sm:$0xff] %v9057_v25  ;;  %v13205_v16 = vand.u32 4294901760, %v9057_v25 }
  0xe3   : > { %6137 = vmatmul.mubr.msk.f32.vlgmr.msra.gmra.mrb[0].mxu0 %vm229_vm5, %v6134_v49  ;;  %v1749_v17 = vsub.f32 %v9057_v25, %v13205_v16  ;;  %v1755_v49 = vsub.f32 %v9067_v59, %v13213_v23  ;;  %v9122_v16 = vsub.f32 %v9086_v44, %v13215_v52  ;;  %v9136_v52 = vld [vmem:[%s13070_s3 + $0x628] sm:$0xff]  ;;  %v9158_v23 = vld [vmem:[%s13070_s3 + $0x620] sm:$0xff] }
  0xe4   : > { %6409 = vmatpush1.bf16.msra.mxu0 %v8232_v19  ;;  %v13227_v55 = vand.u32 4294901760, %v9136_v52 }
  0xe5   : > { %6411 = vmatprep.subr.bf16.mxu0 %v8247_v47  ;;  %13901 = vst [vmem:[#allocation79_spill] sm:$0xff] %v9122_v16  ;;  %v1750_v40 = vand.u32 4294901760, %v1749_v17  ;;  %v1756_v45 = vand.u32 4294901760, %v1755_v49  ;;  %v13903_v17 = vand.u32 4294901760, %v8694_v18  ;;  %v9163_v18 = vld [vmem:[%s13070_s3 + $0x658] sm:$0xff]  ;;  %v14018_v47 = vld [vmem:[#allocation51_spill] sm:$0xff] }
  0xe7   : > { %v9147_v38 = vpack.c.bf16 %v13904_v7, %v13903_v17  ;;  %v6518_v49 = vpack.c.bf16 %v1750_v40, %v1738_v57  ;;  %v13907_v57 = vand.u32 4294901760, %v8787_v51  ;;  %v6520_v7 = vpack.c.bf16 %v1756_v45, %v1744_v41 }
  0xe8   : > { %6413 = vmatpush1.bf16.msra.mxu0 %v8264_v32  ;;  %v13909_v17 = vand.u32 4294901760, %v9122_v16  ;;  %v13226_v51 = vand.u32 4294901760, %v9141_v43  ;;  %v9675_v32 = vld [vmem:[%s13070_s3 + $0x398] sm:$0xff] }
  0xe9   : > { %6415 = vmatprep.subr.bf16.mxu0 %v8315_v62  ;;  %13905 = vst [vmem:[#allocation81_spill] sm:$0xff] %v9147_v38  ;;  %v9169_v40 = vpack.c.bf16 %v13907_v57, %v13906_v61  ;;  %6519 = vmatprep.subr.bf16.mxu1 %v6518_v49  ;;  %v13228_v61 = vand.u32 4294901760, %v9158_v23  ;;  %v13912_v49 = vand.u32 4294901760, %v8833_v3  ;;  %v9212_v57 = vld [vmem:[%s13070_s3 + $0x690] sm:$0xff]  ;;  %v13917_v3 = vand.u32 4294901760, %v8845_v48  ;;  %14024 = vst [vmem:[#allocation125_spill] sm:$0xff] %v9675_v32 }
  0xea   : > { %v1767_v22 = vsub.f32 %v9122_v16, %v13909_v17  ;;  %6521 = vmatpush1.bf16.msra.mxu1 %v6520_v7  ;;  %v9202_v7 = vsub.f32 %v9136_v52, %v13227_v55  ;;  %v9207_v17 = vsub.f32 %v9141_v43, %v13226_v51  ;;  %v13920_v51 = vand.u32 4294901760, %v9163_v18 }
  0xeb   : > { %13908 = vst [vmem:[#allocation82_spill] sm:$0xff] %v9169_v40 }
  0xec   : > { %6417 = vmatpush1.bf16.msra.mxu0 %v8336_v27  ;;  %v1768_v45 = vand.u32 4294901760, %v1767_v22  ;;  %13914 = vst [vmem:[#allocation84_spill] sm:$0xff] %v9202_v7  ;;  %13915 = vst [vmem:[#allocation85_spill] sm:$0xff] %v9207_v17  ;;  %v9233_v55 = vsub.f32 %v9163_v18, %v13920_v51  ;;  %v1423_v51 = vand.u32 4294901760, %v9212_v57  ;;  %v14009_v27 = vld [vmem:[#allocation45_spill] sm:$0xff] }
  0xed   : > { %6419 = vmatprep.subr.bf16.mxu0 %v8350_v33 }
  0xee   : > { %13921 = vst [vmem:[#allocation88_spill] sm:$0xff] %v9233_v55 }
  0xf0   : > { %6421 = vmatpush1.bf16.msra.mxu0 %v8375_v1 }
  0xf1   : > { %6423 = vmatprep.subr.bf16.mxu0 %v8420_v15  ;;  %v14000_v15 = vld [vmem:[#allocation39_spill] sm:$0xff] }
  0xf4   : > { %6425 = vmatpush1.bf16.msra.mxu0 %v8442_v60  ;;  %v9591_v60 = vld [vmem:[%s13070_s3 + $0x2b8] sm:$0xff] }
  0xf5   : > { %6427 = vmatprep.subr.bf16.mxu0 %v8463_v4 }
  0xf8   : > { %6429 = vmatpush1.bf16.msra.mxu0 %v8482_v28 }
  0xf9   : > { %6431 = vmatprep.subr.bf16.mxu0 %v8525_v9  ;;  %v13991_v9 = vld [vmem:[#allocation32_spill] sm:$0xff] }
  0xfc   : > { %6433 = vmatpush1.bf16.msra.mxu0 %v8544_v53  ;;  %v13988_v53 = vld [vmem:[#allocation31_spill] sm:$0xff] }
  0xfd   : > { %6435 = vmatprep.subr.bf16.mxu0 %v8564_v8 }
 0x100   : > { %6437 = vmatpush1.bf16.msra.mxu0 %v8585_v63  ;;  %v13936_v63 = vand.u32 4294901760, %v9072_v6 }
 0x101   : > { %6439 = vmatprep.subr.bf16.mxu0 %v8683_v54 }
 0x104   : > { %6441 = vmatpush1.bf16.msra.mxu0 %v8748_v14  ;;  %v1774_v14 = vand.u32 4294901760, %v1773_v56  ;;  %v13911_v56 = vand.u32 4294901760, %v8828_v12  ;;  %v9217_v12 = vld [vmem:[%s13070_s3 + $0x6c8] sm:$0xff] }
 0x105   : > { %6443 = vmatprep.subr.bf16.mxu0 %v8860_v26  ;;  %v1762_v26 = vand.u32 4294901760, %v1761_v46  ;;  %v9191_v46 = vld [vmem:[%s13070_s3 + $0x6d0] sm:$0xff] }
 0x106   : > { %v9197_v22 = vpack.c.bf16 %v13912_v49, %v13911_v56  ;;  %v9228_v49 = vsub.f32 %v9158_v23, %v13228_v61  ;;  %v1427_v61 = vand.u32 4294901760, %v9217_v12 }
 0x108   : > { %6445 = vmatpush1.bf16.msra.mxu0 %v8871_v24  ;;  %v1779_v24 = vsub.f32 %v9127_v5, %v13910_v20  ;;  %v9186_v20 = vld [vmem:[%s13070_s3 + $0x698] sm:$0xff]  ;;  %13913 = vst [vmem:[#allocation83_spill] sm:$0xff] %v9197_v22  ;;  %13919 = vst [vmem:[#allocation87_spill] sm:$0xff] %v9228_v49 }
 0x109   : > { %6447 = vmatprep.subr.bf16.mxu0 %v9147_v38  ;;  %v13929_v38 = vand.u32 4294901760, %v9045_v37  ;;  %v9278_v37 = vsub.f32 %v9212_v57, %v1423_v51 }
 0x10a   : > { %v1780_v41 = vand.u32 4294901760, %v1779_v24  ;;  %v6522_v24 = vpack.c.bf16 %v1774_v14, %v1762_v26  ;;  %v13916_v14 = vand.u32 4294901760, %v8838_v39  ;;  %v13923_v39 = vand.u32 4294901760, %v9033_v0 }
 0x10b   : > { %v13931_v0 = vand.u32 4294901760, %v9228_v49  ;;  %13934 = vst [vmem:[#allocation93_spill] sm:$0xff] %v9278_v37 }
 0x10c   : > { %6449 = vmatpush1.bf16.msra.mxu0 %v9169_v40  ;;  %v9223_v26 = vpack.c.bf16 %v13917_v3, %v13916_v14  ;;  %v6524_v56 = vpack.c.bf16 %v1780_v41, %v1768_v45  ;;  %6523 = vmatprep.subr.bf16.mxu1 %v6522_v24  ;;  %v1421_v14 = vand.u32 4294901760, %v9186_v20  ;;  %v1425_v45 = vand.u32 4294901760, %v9191_v46 }
 0x10d   : > { %6451 = vmatprep.subr.bf16.mxu0 %v9197_v22  ;;  %v13922_v24 = vand.u32 4294901760, %v9028_v50  ;;  %v13925_v22 = vand.u32 4294901760, %v9202_v7 }
 0x10e   : > { %13918 = vst [vmem:[#allocation86_spill] sm:$0xff] %v9223_v26  ;;  %6525 = vmatpush1.bf16.msra.mxu1 %v6524_v56  ;;  %v13926_v56 = vand.u32 4294901760, %v9207_v17  ;;  %v9258_v3 = vsub.f32 %v9186_v20, %v1421_v14  ;;  %v9273_v54 = vsub.f32 %v9191_v46, %v1425_v45 }
 0x10f   : > { %v9249_v48 = vpack.c.bf16 %v13923_v39, %v13922_v24  ;;  %v1785_v40 = vsub.f32 %v9202_v7, %v13925_v22  ;;  %v1791_v39 = vsub.f32 %v9228_v49, %v13931_v0  ;;  %v13932_v24 = vand.u32 4294901760, %v9233_v55 }
 0x110   : > { %6453 = vmatpush1.bf16.msra.mxu0 %v9223_v26  ;;  %v1797_v41 = vsub.f32 %v9207_v17, %v13926_v56  ;;  %13927 = vst [vmem:[#allocation90_spill] sm:$0xff] %v9258_v3  ;;  %v13928_v26 = vand.u32 4294901760, %v9040_v29  ;;  %13933 = vst [vmem:[#allocation92_spill] sm:$0xff] %v9273_v54  ;;  %v13246_v29 = vand.u32 4294901760, %v9258_v3  ;;  %v13245_v0 = vand.u32 4294901760, %v9273_v54 }
 0x111   : > { %13924 = vst [vmem:[#allocation89_spill] sm:$0xff] %v9249_v48  ;;  %v1803_v22 = vsub.f32 %v9233_v55, %v13932_v24  ;;  %6455 = vmatprep.subr.bf16.mxu0 %v9249_v48  ;;  %v1786_v20 = vand.u32 4294901760, %v1785_v40  ;;  %v9283_v24 = vsub.f32 %v9217_v12, %v1427_v61  ;;  %v13937_v40 = vand.u32 4294901760, %v9077_v2  ;;  %v13982_v48 = vld [vmem:[#allocation27_spill] sm:$0xff] }
 0x112   : > { %v9264_v50 = vpack.c.bf16 %v13929_v38, %v13928_v26  ;;  %v1798_v56 = vand.u32 4294901760, %v1797_v41  ;;  %v1792_v38 = vand.u32 4294901760, %v1791_v39  ;;  %v1809_v57 = vsub.f32 %v9258_v3, %v13246_v29  ;;  %v14041_v3 = vld [vmem:[#allocation62_spill] sm:$0xff] }
 0x113   : > { %v1804_v26 = vand.u32 4294901760, %v1803_v22  ;;  %13935 = vst [vmem:[#allocation94_spill] sm:$0xff] %v9283_v24  ;;  %v9289_v41 = vpack.c.bf16 %v13937_v40, %v13936_v63  ;;  %v1821_v22 = vsub.f32 %v9273_v54, %v13245_v0  ;;  %v13939_v12 = vand.u32 4294901760, %v9086_v44  ;;  %v9759_v54 = vld [vmem:[%s13070_s3 + $0x478] sm:$0xff] }
 0x114   : > { %13930 = vst [vmem:[#allocation91_spill] sm:$0xff] %v9264_v50  ;;  %6457 = vmatpush1.bf16.msra.mxu0 %v9264_v50  ;;  %v6526_v46 = vpack.c.bf16 %v1798_v56, %v1786_v20  ;;  %v13244_v50 = vand.u32 4294901760, %v9278_v37  ;;  %v13940_v20 = vand.u32 4294901760, %v9091_v58  ;;  %v13243_v63 = vand.u32 4294901760, %v9283_v24 }
 0x115   : > { %13938 = vst [vmem:[#allocation95_spill] sm:$0xff] %v9289_v41  ;;  %v6528_v39 = vpack.c.bf16 %v1804_v26, %v1792_v38  ;;  %6459 = vmatprep.subr.bf16.mxu0 %v9289_v41  ;;  %v1810_v2 = vand.u32 4294901760, %v1809_v57  ;;  %v1822_v38 = vand.u32 4294901760, %v1821_v22  ;;  %v13942_v26 = vand.u32 4294901760, %v9136_v52 }
 0x116   : > { %v9302_v6 = vpack.c.bf16 %v13940_v20, %v13939_v12  ;;  %6527 = vmatprep.subr.bf16.mxu1 %v6526_v46  ;;  %v1815_v56 = vsub.f32 %v9278_v37, %v13244_v50  ;;  %v1827_v44 = vsub.f32 %v9283_v24, %v13243_v63  ;;  %v13943_v46 = vand.u32 4294901760, %v9141_v43  ;;  %v13961_v50 = vld [vmem:[#allocation12_spill] sm:$0xff] }
 0x117   : > { %6529 = vmatpush1.bf16.msra.mxu1 %v6528_v39  ;;  %v6530_v57 = vpack.c.bf16 %v1822_v38, %v1810_v2  ;;  %v13945_v20 = vand.u32 4294901760, %v9158_v23  ;;  %v13946_v39 = vand.u32 4294901760, %v9163_v18  ;;  %v6534_v63 = vpack.c.bf16 %v8147_v31, %v8145_v30  ;;  %v1080_v23 = vld [vmem:[%s13070_s3 + $0x18] sm:$0xff]  ;;  %v1087_v18 = vld [vmem:[%s13070_s3 + $0x50] sm:$0xff]  ;;  %v13977_v31 = vld [vmem:[#allocation23_spill] sm:$0xff] }
 0x118   : > { %13941 = vst [vmem:[#allocation96_spill] sm:$0xff] %v9302_v6  ;;  %6461 = vmatpush1.bf16.msra.mxu0 %v9302_v6  ;;  %v1816_v58 = vand.u32 4294901760, %v1815_v56  ;;  %v9317_v40 = vpack.c.bf16 %v13943_v46, %v13942_v26  ;;  %v1828_v12 = vand.u32 4294901760, %v1827_v44  ;;  %v9329_v52 = vpack.c.bf16 %v1425_v45, %v1421_v14  ;;  %v1071_v44 = vpop.permute.xlu0 %1070 }
 0x119   : > { %v9323_v22 = vpack.c.bf16 %v13946_v39, %v13945_v20  ;;  %6531 = vmatprep.subr.bf16.mxu1 %v6530_v57  ;;  %v9331_v43 = vpack.c.bf16 %v1427_v61, %v1423_v51  ;;  %v2585_v2 = vand.u32 4294901760, %v1080_v23  ;;  %v2589_v38 = vand.u32 4294901760, %v1087_v18 }
 0x11a   : > { %13944 = vst [vmem:[#allocation97_spill] sm:$0xff] %v9317_v40  ;;  %6463 = vmatprep.subr.bf16.mxu0 %v9317_v40  ;;  %v6532_v56 = vpack.c.bf16 %v1828_v12, %v1816_v58  ;;  %13948 = vst [vmem:[#allocation99_spill] sm:$0xff] %v9329_v52  ;;  %v13973_v40 = vld [vmem:[#allocation22_spill] sm:$0xff] }
 0x11b   : > { %13947 = vst [vmem:[#allocation98_spill] sm:$0xff] %v9323_v22  ;;  %13949 = vst [vmem:[#allocation100_spill] sm:$0xff] %v9331_v43  ;;  %v9341_v14 = vpack.c.bf16 %v2589_v38, %v2585_v2  ;;  %v9343_v61 = vsub.f32 %v1080_v23, %v2585_v2  ;;  %v9345_v45 = vsub.f32 %v1087_v18, %v2589_v38  ;;  %v13956_v18 = vld [vmem:[#allocation9_spill] sm:$0xff]  ;;  %v13957_v2 = vld [vmem:[#allocation10_spill] sm:$0xff] }
 0x11c   : > { %6465 = vmatpush1.bf16.msra.mxu0 %v9323_v22  ;;  %6533 = vmatpush1.bf16.msra.mxu1 %v6532_v56  ;;  %v6536_v56 = vpack.c.bf16 %v8152_v35, %v8150_v34  ;;  %v6538_v38 = vpack.c.bf16 %v13957_v2, %v13956_v18  ;;  %v13964_v2 = vld [vmem:[#allocation16_spill] sm:$0xff]  ;;  %v13972_v22 = vld [vmem:[#allocation21_spill] sm:$0xff] }
 0x11d   : > { %6467 = vmatprep.subr.bf16.mxu0 %v9329_v52  ;;  %6535 = vmatprep.subr.bf16.mxu1 %v6534_v63  ;;  %13950 = vst [vmem:[#allocation101_spill] sm:$0xff] %v9341_v14  ;;  %13951 = vst [vmem:[#allocation102_spill] sm:$0xff] %v9343_v61  ;;  %v6546_v6 = vpack.c.bf16 %v13973_v40, %v13972_v22  ;;  %v13978_v52 = vld [vmem:[#allocation24_spill] sm:$0xff] }
 0x11e   : > { %13952 = vst [vmem:[#allocation103_spill] sm:$0xff] %v9345_v45  ;;  %v6548_v40 = vpack.c.bf16 %v13978_v52, %v13977_v31 }
 0x120   : > { %6469 = vmatpush1.bf16.msra.mxu0 %v9331_v43 }
 0x121   : > { %6791 = vmatprep.subr.bf16.mxu0 %v9341_v14 }
 0x1b6   : > { %v1060_v58 = vpop.f32.mrb[0].mxu0 }
 0x1b7   : > { %v1073_v26 = vadd.f32 %v1071_v44, %v1060_v58  ;;  %v1062_v46 = vpop.f32.mrb[1].mxu0  ;;  %v9369_v58 = vld [vmem:[%s13070_s3 + $0x48] sm:$0xff] }
 0x1b8   : > { %v1074_v63 = vadd.f32 %v1071_v44, %v1062_v46  ;;  %v9364_v44 = vld [vmem:[%s13070_s3 + $0x10] sm:$0xff]  ;;  %v13969_v51 = vand.u32 4294901760, %v9369_v58 }
 0x1b9   : > { %7930 = vtanh.f32 %v1073_v26 }
 0x1ba   : > { %7932 = vtanh.f32 %v1074_v63  ;;  %v9382_v63 = vld [vmem:[%s13070_s3 + $0x88] sm:$0xff] }
 0x1c3   : > { %v7931_v57 = vpop.eup %7930 }
 0x1c4   : > { %v7933_v12 = vpop.eup %7932  ;;  %v9350_v20 = vand.u32 4294901760, %v7931_v57 }
 0x1c5   : > { %v9352_v39 = vand.u32 4294901760, %v7933_v12 }
 0x1c6   : > { %13953 = vst [vmem:[#allocation104_spill] sm:$0xff] %v9350_v20  ;;  %v9357_v23 = vsub.f32 %v7931_v57, %v9350_v20  ;;  %v9387_v57 = vld [vmem:[%s13070_s3 + $0xc0] sm:$0xff] }
 0x1c7   : > { %13954 = vst [vmem:[#allocation105_spill] sm:$0xff] %v9352_v39  ;;  %v9372_v26 = vsub.f32 %v7933_v12, %v9352_v39  ;;  %1831 = vmatprep.mubr.f32.mxu1 %v9352_v39  ;;  %v13960_v12 = vld [vmem:[#allocation11_spill] sm:$0xff]  ;;  %v9633_v39 = vld [vmem:[%s13070_s3 + $0x328] sm:$0xff] }
 0x1c8   : > { %13955 = vst [vmem:[#allocation106_spill] sm:$0xff] %v9357_v23  ;;  %1833 = vmatmul.mubr.f32.vlgmr.msra.gmra.mrb[0].mxu1 %v9350_v20  ;;  %v9377_v46 = vand.u32 4294901760, %v9357_v23  ;;  %v6540_v0 = vpack.c.bf16 %v13961_v50, %v13960_v12  ;;  %v13963_v20 = vld [vmem:[#allocation15_spill] sm:$0xff]  ;;  %v9409_v50 = vld [vmem:[%s13070_s3 + $0xb8] sm:$0xff] }
 0x1c9   : > { %13958 = vst [vmem:[#allocation107_spill] sm:$0xff] %v9372_v26  ;;  %6537 = vmatpush1.bf16.msra.mxu1 %v6536_v56  ;;  %2033 = vmatprep.mubr.f32.mxu1 %v9372_v26  ;;  %v9393_v29 = vand.u32 4294901760, %v9372_v26  ;;  %v6542_v18 = vpack.c.bf16 %v13964_v2, %v13963_v20  ;;  %v9404_v56 = vld [vmem:[%s13070_s3 + $0x80] sm:$0xff]  ;;  %v9418_v2 = vld [vmem:[%s13070_s3 + $0xf8] sm:$0xff]  ;;  %v9423_v20 = vld [vmem:[%s13070_s3 + $0x130] sm:$0xff] }
 0x1ca   : > { %13959 = vst [vmem:[#allocation108_spill] sm:$0xff] %v9377_v46  ;;  %6539 = vmatprep.subr.bf16.mxu1 %v6538_v38  ;;  %v1438_v35 = vsub.f32 %v9357_v23, %v9377_v46  ;;  %v13965_v12 = vld [vmem:[#allocation18_spill] sm:$0xff]  ;;  %v13966_v46 = vld [vmem:[#allocation19_spill] sm:$0xff]  ;;  %v13968_v38 = vand.u32 4294901760, %v9364_v44  ;;  %v13985_v52 = vand.u32 4294901760, %v9423_v20  ;;  %v9717_v23 = vld [vmem:[%s13070_s3 + $0x408] sm:$0xff] }
 0x1cb   : > { %13962 = vst [vmem:[#allocation109_spill] sm:$0xff] %v9393_v29  ;;  %v1432_v14 = vsub.f32 %v9372_v26, %v9393_v29  ;;  %v6544_v34 = vpack.c.bf16 %v13966_v46, %v13965_v12  ;;  %v9446_v46 = vld [vmem:[%s13070_s3 + $0xf0] sm:$0xff] }
 0x1cc   : > { %v9433_v26 = vpack.c.bf16 %v13969_v51, %v13968_v38  ;;  %v9437_v30 = vand.u32 4294901760, %v1438_v35  ;;  %v9451_v51 = vld [vmem:[%s13070_s3 + $0x128] sm:$0xff]  ;;  %v13974_v35 = vand.u32 4294901760, %v9382_v63  ;;  %v13291_v12 = vand.u32 4294901760, %v9446_v46 }
 0x1cd   : > { %6541 = vmatpush1.bf16.msra.mxu1 %v6540_v0  ;;  %v9427_v43 = vand.u32 4294901760, %v1432_v14  ;;  %v9463_v14 = vld [vmem:[%s13070_s3 + $0x168] sm:$0xff]  ;;  %v9468_v0 = vld [vmem:[%s13070_s3 + $0x1a0] sm:$0xff] }
 0x1ce   : > { %13970 = vst [vmem:[#allocation111_spill] sm:$0xff] %v9433_v26  ;;  %6543 = vmatprep.subr.bf16.mxu1 %v6542_v18  ;;  %13971 = vst [vmem:[#allocation112_spill] sm:$0xff] %v9437_v30  ;;  %v13975_v18 = vand.u32 4294901760, %v9387_v57 }
 0x1cf   : > { %13967 = vst [vmem:[#allocation110_spill] sm:$0xff] %v9427_v43  ;;  %1434 = vmatprep.mubr.f32.mxu0 %v9427_v43 }
 0x1d0   : > { %v9458_v38 = vpack.c.bf16 %v13975_v18, %v13974_v35  ;;  %1440 = vmatmul.mubr.f32.vlgmr.msra.gmra.mrb[2].mxu0 %v9437_v30  ;;  %v13979_v35 = vand.u32 4294901760, %v9404_v56  ;;  %v13980_v18 = vand.u32 4294901760, %v9409_v50 }
 0x1d1   : > { %6545 = vmatpush1.bf16.msra.mxu1 %v6544_v34  ;;  %6793 = vmatpush1.bf16.msra.mxu0 %v9433_v26  ;;  %v13983_v34 = vld [vmem:[#allocation28_spill] sm:$0xff]  ;;  %v13984_v26 = vand.u32 4294901760, %v9418_v2 }
 0x1d2   : > { %13976 = vst [vmem:[#allocation113_spill] sm:$0xff] %v9458_v38  ;;  %v9478_v22 = vpack.c.bf16 %v13980_v18, %v13979_v35  ;;  %2718 = vmatprep.mubr.f32.mxu0 %v9427_v43  ;;  %6547 = vmatprep.subr.bf16.mxu1 %v6546_v6  ;;  %v6550_v8 = vpack.c.bf16 %v13983_v34, %v13982_v48  ;;  %v9496_v18 = vld [vmem:[%s13070_s3 + $0x160] sm:$0xff]  ;;  %v9501_v6 = vld [vmem:[%s13070_s3 + $0x198] sm:$0xff]  ;;  %v13989_v43 = vand.u32 4294901760, %v9451_v51  ;;  %v9549_v48 = vld [vmem:[%s13070_s3 + $0x248] sm:$0xff] }
 0x1d3   : > { %v9489_v31 = vpack.c.bf16 %v13985_v52, %v13984_v26  ;;  %6795 = vmatprep.subr.bf16.mxu0 %v9458_v38  ;;  %v9507_v52 = vld [vmem:[%s13070_s3 + $0x1d8] sm:$0xff]  ;;  %v9512_v26 = vld [vmem:[%s13070_s3 + $0x210] sm:$0xff]  ;;  %v13304_v34 = vand.u32 4294901760, %v9496_v18 }
 0x1d4   : > { %13981 = vst [vmem:[#allocation114_spill] sm:$0xff] %v9478_v22  ;;  %v13987_v35 = vld [vmem:[#allocation30_spill] sm:$0xff]  ;;  %v9521_v38 = vpack.c.bf16 %v13989_v43, %v13291_v12  ;;  %v9539_v12 = vld [vmem:[%s13070_s3 + $0x1d0] sm:$0xff]  ;;  %v13997_v43 = vld [vmem:[#allocation36_spill] sm:$0xff] }
 0x1d5   : > { %13986 = vst [vmem:[#allocation115_spill] sm:$0xff] %v9489_v31  ;;  %6549 = vmatpush1.bf16.msra.mxu1 %v6548_v40  ;;  %6797 = vmatpush1.bf16.msra.mxu0 %v9478_v22  ;;  %v6552_v41 = vpack.c.bf16 %v13988_v53, %v13987_v35  ;;  %v13992_v40 = vld [vmem:[#allocation34_spill] sm:$0xff]  ;;  %v13993_v22 = vand.u32 4294901760, %v9463_v14  ;;  %v13994_v53 = vand.u32 4294901760, %v9468_v0 }
 0x1d6   : > { %13990 = vst [vmem:[#allocation116_spill] sm:$0xff] %v9521_v38  ;;  %6551 = vmatprep.subr.bf16.mxu1 %v6550_v8  ;;  %6799 = vmatprep.subr.bf16.mxu0 %v9489_v31  ;;  %v6554_v28 = vpack.c.bf16 %v13992_v40, %v13991_v9  ;;  %v9544_v8 = vld [vmem:[%s13070_s3 + $0x208] sm:$0xff]  ;;  %v13998_v31 = vand.u32 4294901760, %v9501_v6  ;;  %v13317_v9 = vand.u32 4294901760, %v9539_v12 }
 0x1d7   : > { %v9532_v35 = vpack.c.bf16 %v13994_v53, %v13993_v22  ;;  %v9554_v53 = vld [vmem:[%s13070_s3 + $0x280] sm:$0xff] }
 0x1d8   : > { %v13996_v22 = vld [vmem:[#allocation35_spill] sm:$0xff]  ;;  %v9563_v40 = vpack.c.bf16 %v13998_v31, %v13304_v34 }
 0x1d9   : > { %13995 = vst [vmem:[#allocation117_spill] sm:$0xff] %v9532_v35  ;;  %6553 = vmatpush1.bf16.msra.mxu1 %v6552_v41  ;;  %6801 = vmatpush1.bf16.msra.mxu0 %v9521_v38  ;;  %v6556_v4 = vpack.c.bf16 %v13997_v43, %v13996_v22  ;;  %v14001_v41 = vld [vmem:[#allocation40_spill] sm:$0xff]  ;;  %v14002_v38 = vand.u32 4294901760, %v9507_v52  ;;  %v14003_v43 = vand.u32 4294901760, %v9512_v26  ;;  %v9581_v34 = vld [vmem:[%s13070_s3 + $0x240] sm:$0xff] }
 0x1da   : > { %13999 = vst [vmem:[#allocation118_spill] sm:$0xff] %v9563_v40  ;;  %6555 = vmatprep.subr.bf16.mxu1 %v6554_v28  ;;  %6803 = vmatprep.subr.bf16.mxu0 %v9532_v35  ;;  %v6558_v1 = vpack.c.bf16 %v14001_v41, %v14000_v15  ;;  %v9586_v28 = vld [vmem:[%s13070_s3 + $0x278] sm:$0xff]  ;;  %v14006_v31 = vld [vmem:[#allocation43_spill] sm:$0xff]  ;;  %v14007_v35 = vand.u32 4294901760, %v9544_v8  ;;  %v13330_v15 = vand.u32 4294901760, %v9581_v34 }
 0x1db   : > { %v9574_v22 = vpack.c.bf16 %v14003_v43, %v14002_v38  ;;  %v9596_v38 = vld [vmem:[%s13070_s3 + $0x2f0] sm:$0xff] }
 0x1dc   : > { %v14005_v43 = vld [vmem:[#allocation41_spill] sm:$0xff]  ;;  %v9605_v41 = vpack.c.bf16 %v14007_v35, %v13317_v9  ;;  %v14015_v35 = vld [vmem:[#allocation48_spill] sm:$0xff] }
 0x1dd   : > { %14004 = vst [vmem:[#allocation119_spill] sm:$0xff] %v9574_v22  ;;  %6557 = vmatpush1.bf16.msra.mxu1 %v6556_v4  ;;  %6805 = vmatpush1.bf16.msra.mxu0 %v9563_v40  ;;  %v6560_v33 = vpack.c.bf16 %v14006_v31, %v14005_v43  ;;  %v14010_v4 = vld [vmem:[#allocation46_spill] sm:$0xff]  ;;  %v14011_v40 = vand.u32 4294901760, %v9549_v48  ;;  %v14012_v31 = vand.u32 4294901760, %v9554_v53  ;;  %v9623_v9 = vld [vmem:[%s13070_s3 + $0x2b0] sm:$0xff] }
 0x1de   : > { %14008 = vst [vmem:[#allocation120_spill] sm:$0xff] %v9605_v41  ;;  %6559 = vmatprep.subr.bf16.mxu1 %v6558_v1  ;;  %6807 = vmatprep.subr.bf16.mxu0 %v9574_v22  ;;  %v6562_v30 = vpack.c.bf16 %v14010_v4, %v14009_v27  ;;  %v9628_v1 = vld [vmem:[%s13070_s3 + $0x2e8] sm:$0xff]  ;;  %v14016_v22 = vand.u32 4294901760, %v9586_v28  ;;  %v13343_v27 = vand.u32 4294901760, %v9623_v9 }
 0x1df   : > { %v9616_v43 = vpack.c.bf16 %v14012_v31, %v14011_v40  ;;  %v9638_v40 = vld [vmem:[%s13070_s3 + $0x360] sm:$0xff] }
 0x1e0   : > { %v14014_v31 = vld [vmem:[#allocation47_spill] sm:$0xff]  ;;  %v9647_v4 = vpack.c.bf16 %v14016_v22, %v13330_v15 }
 0x1e1   : > { %14013 = vst [vmem:[#allocation121_spill] sm:$0xff] %v9616_v43  ;;  %6561 = vmatpush1.bf16.msra.mxu1 %v6560_v33  ;;  %6809 = vmatpush1.bf16.msra.mxu0 %v9605_v41  ;;  %v6564_v62 = vpack.c.bf16 %v14015_v35, %v14014_v31  ;;  %v14019_v33 = vld [vmem:[#allocation52_spill] sm:$0xff]  ;;  %v14020_v41 = vand.u32 4294901760, %v9591_v60  ;;  %v14021_v35 = vand.u32 4294901760, %v9596_v38  ;;  %v9665_v15 = vld [vmem:[%s13070_s3 + $0x320] sm:$0xff] }
 0x1e2   : > { %14017 = vst [vmem:[#allocation122_spill] sm:$0xff] %v9647_v4  ;;  %6563 = vmatprep.subr.bf16.mxu1 %v6562_v30  ;;  %6811 = vmatprep.subr.bf16.mxu0 %v9616_v43  ;;  %v6566_v29 = vpack.c.bf16 %v14019_v33, %v14018_v47  ;;  %v9670_v30 = vld [vmem:[%s13070_s3 + $0x358] sm:$0xff]  ;;  %v14027_v22 = vld [vmem:[#allocation55_spill] sm:$0xff]  ;;  %v14028_v43 = vand.u32 4294901760, %v9628_v1  ;;  %v13355_v47 = vand.u32 4294901760, %v9665_v15 }
 0x1e3   : > { %v9658_v31 = vpack.c.bf16 %v14021_v35, %v14020_v41  ;;  %14023 = vst [vmem:[#allocation124_spill] sm:$0xff] %v9670_v30  ;;  %v9680_v41 = vld [vmem:[%s13070_s3 + $0x3d0] sm:$0xff]  ;;  %v14026_v35 = vld [vmem:[#allocation54_spill] sm:$0xff] }
 0x1e4   : > { %14025 = vst [vmem:[#allocation126_spill] sm:$0xff] %v9680_v41  ;;  %v6568_v19 = vpack.c.bf16 %v14027_v22, %v14026_v35  ;;  %v9689_v33 = vpack.c.bf16 %v14028_v43, %v13343_v27  ;;  %v14033_v22 = vand.u32 4294901760, %v9638_v40  ;;  %v9707_v27 = vld [vmem:[%s13070_s3 + $0x390] sm:$0xff] }
 0x1e5   : > { %14022 = vst [vmem:[#allocation123_spill] sm:$0xff] %v9658_v31  ;;  %6565 = vmatpush1.bf16.msra.mxu1 %v6564_v62  ;;  %6813 = vmatpush1.bf16.msra.mxu0 %v9647_v4  ;;  %v14031_v62 = vld [vmem:[#allocation58_spill] sm:$0xff]  ;;  %v14032_v4 = vand.u32 4294901760, %v9633_v39  ;;  %v14038_v43 = vld [vmem:[#allocation61_spill] sm:$0xff] }
 0x1e6   : > { %14029 = vst [vmem:[#allocation127_spill] sm:$0xff] %v9689_v33  ;;  %6567 = vmatprep.subr.bf16.mxu1 %v6566_v29  ;;  %6815 = vmatprep.subr.bf16.mxu0 %v9658_v31  ;;  %v6570_v37 = vpack.c.bf16 %v14031_v62, %v14030_v10  ;;  %v9712_v29 = vld [vmem:[%s13070_s3 + $0x3c8] sm:$0xff]  ;;  %v14039_v31 = vand.u32 4294901760, %v9670_v30  ;;  %v13367_v10 = vand.u32 4294901760, %v9707_v27 }
 0x1e7   : > { %v9700_v35 = vpack.c.bf16 %v14033_v22, %v14032_v4  ;;  %14035 = vst [vmem:[#allocation129_spill] sm:$0xff] %v9712_v29  ;;  %v9722_v4 = vld [vmem:[%s13070_s3 + $0x440] sm:$0xff]  ;;  %v14037_v22 = vld [vmem:[#allocation60_spill] sm:$0xff] }
 0x1e8   : > { %14036 = vst [vmem:[#allocation130_spill] sm:$0xff] %v9722_v4  ;;  %v6572_v24 = vpack.c.bf16 %v14038_v43, %v14037_v22  ;;  %v9731_v62 = vpack.c.bf16 %v14039_v31, %v13355_v47  ;;  %v14044_v43 = vand.u32 4294901760, %v9680_v41  ;;  %v9749_v47 = vld [vmem:[%s13070_s3 + $0x400] sm:$0xff]  ;;  %v14047_v31 = vld [vmem:[#allocation66_spill] sm:$0xff]  ;;  %v14055_v41 = vand.u32 4294901760, %v9364_v44 }
 0x1e9   : > { %14034 = vst [vmem:[#allocation128_spill] sm:$0xff] %v9700_v35  ;;  %6569 = vmatpush1.bf16.msra.mxu1 %v6568_v19  ;;  %6817 = vmatpush1.bf16.msra.mxu0 %v9689_v33  ;;  %v14042_v19 = vld [vmem:[#allocation64_spill] sm:$0xff]  ;;  %v14043_v33 = vand.u32 4294901760, %v9675_v32  ;;  %v14050_v32 = vld [vmem:[#allocation69_spill] sm:$0xff] }
 0x1ea   : > { %14040 = vst [vmem:[#allocation131_spill] sm:$0xff] %v9731_v62  ;;  %6571 = vmatprep.subr.bf16.mxu1 %v6570_v37  ;;  %6819 = vmatprep.subr.bf16.mxu0 %v9700_v35  ;;  %v6574_v45 = vpack.c.bf16 %v14042_v19, %v14041_v3  ;;  %v9754_v37 = vld [vmem:[%s13070_s3 + $0x438] sm:$0xff]  ;;  %v14048_v35 = vand.u32 4294901760, %v9712_v29  ;;  %v9801_v3 = vsub.f32 %v9364_v44, %v14055_v41  ;;  %v9821_v44 = vld [vmem:[%s13070_s3 + $0x520] sm:$0xff]  ;;  %v14061_v41 = vand.u32 4294901760, %v9387_v57 }
 0x1eb   : > { %v9742_v22 = vpack.c.bf16 %v14044_v43, %v14043_v33  ;;  %v9764_v33 = vld [vmem:[%s13070_s3 + $0x4b0] sm:$0xff] }
 0x1ec   : > { %v14046_v43 = vld [vmem:[#allocation65_spill] sm:$0xff]  ;;  %v9773_v19 = vpack.c.bf16 %v14048_v35, %v13367_v10  ;;  %14056 = vst [vmem:[#allocation135_spill] sm:$0xff] %v9801_v3  ;;  %v14059_v35 = vand.u32 4294901760, %v9382_v63 }
 0x1ed   : > { %14045 = vst [vmem:[#allocation132_spill] sm:$0xff] %v9742_v22  ;;  %6573 = vmatpush1.bf16.msra.mxu1 %v6572_v24  ;;  %6821 = vmatpush1.bf16.msra.mxu0 %v9731_v62  ;;  %v6576_v30 = vpack.c.bf16 %v14047_v31, %v14046_v43  ;;  %v14051_v24 = vld [vmem:[#allocation70_spill] sm:$0xff]  ;;  %v14052_v62 = vand.u32 4294901760, %v9717_v23  ;;  %v14053_v31 = vand.u32 4294901760, %v9722_v4  ;;  %v9791_v10 = vld [vmem:[%s13070_s3 + $0x470] sm:$0xff] }
 0x1ee   : > { %14049 = vst [vmem:[#allocation133_spill] sm:$0xff] %v9773_v19  ;;  %6575 = vmatprep.subr.bf16.mxu1 %v6574_v45  ;;  %6823 = vmatprep.subr.bf16.mxu0 %v9742_v22  ;;  %v6578_v61 = vpack.c.bf16 %v14051_v24, %v14050_v32  ;;  %v9796_v45 = vld [vmem:[%s13070_s3 + $0x4a8] sm:$0xff]  ;;  %v9811_v29 = vsub.f32 %v9382_v63, %v14059_v35  ;;  %v14065_v35 = vand.u32 4294901760, %v9409_v50  ;;  %v14067_v32 = vand.u32 4294901760, %v9418_v2 }
 0x1ef   : > { %v9784_v43 = vpack.c.bf16 %v14053_v31, %v14052_v62  ;;  %v14057_v62 = vand.u32 4294901760, %v9369_v58  ;;  %v9816_v22 = vld [vmem:[%s13070_s3 + $0x4e8] sm:$0xff] }
 0x1f0   : > { %14060 = vst [vmem:[#allocation137_spill] sm:$0xff] %v9811_v29  ;;  %v9836_v24 = vsub.f32 %v9409_v50, %v14065_v35  ;;  %v9841_v4 = vsub.f32 %v9418_v2, %v14067_v32  ;;  %v6582_v32 = vpack.c.bf16 %v9057_v25, %v9052_v21  ;;  %v14072_v2 = vand.u32 4294901760, %v9759_v54 }
 0x1f1   : > { %14054 = vst [vmem:[#allocation134_spill] sm:$0xff] %v9784_v43  ;;  %v9806_v31 = vsub.f32 %v9369_v58, %v14057_v62  ;;  %v9826_v58 = vsub.f32 %v9387_v57, %v14061_v41  ;;  %v14063_v62 = vand.u32 4294901760, %v9404_v56  ;;  %6577 = vmatpush1.bf16.msra.mxu1 %v6576_v30  ;;  %6825 = vmatpush1.bf16.msra.mxu0 %v9773_v19  ;;  %v14068_v57 = vld [vmem:[#allocation71_spill] sm:$0xff]  ;;  %v14073_v30 = vand.u32 4294901760, %v9764_v33 }
 0x1f2   : > { %14066 = vst [vmem:[#allocation140_spill] sm:$0xff] %v9836_v24  ;;  %v6580_v41 = vpack.c.bf16 %v8902_v11, %v14068_v57  ;;  %6579 = vmatprep.subr.bf16.mxu1 %v6578_v61  ;;  %6827 = vmatprep.subr.bf16.mxu0 %v9784_v43  ;;  %v9873_v61 = vld [vmem:[%s13070_s3 + $0x518] sm:$0xff]  ;;  %v14075_v35 = vand.u32 4294901760, %v9423_v20  ;;  %v14081_v43 = vand.u32 4294901760, %v9463_v14  ;;  %v14088_v21 = vand.u32 4294901760, %v9507_v52 }
 0x1f3   : > { %14058 = vst [vmem:[#allocation136_spill] sm:$0xff] %v9806_v31  ;;  %14062 = vst [vmem:[#allocation138_spill] sm:$0xff] %v9826_v58  ;;  %v9831_v63 = vsub.f32 %v9404_v56, %v14063_v62  ;;  %v14069_v58 = vand.u32 4294901760, %v9749_v47  ;;  %v14070_v56 = vand.u32 4294901760, %v9754_v37  ;;  %v9861_v19 = vpack.c.bf16 %v14073_v30, %v14072_v2 }
 0x1f4   : > { %v9878_v50 = vsub.f32 %v9423_v20, %v14075_v35  ;;  %v14077_v2 = vand.u32 4294901760, %v9446_v46  ;;  %v9893_v25 = vsub.f32 %v9463_v14, %v14081_v43  ;;  %v9898_v20 = vld [vmem:[%s13070_s3 + $0x558] sm:$0xff]  ;;  %v14084_v35 = vand.u32 4294901760, %v9468_v0 }
 0x1f5   : > { %14064 = vst [vmem:[#allocation139_spill] sm:$0xff] %v9831_v63  ;;  %v9850_v62 = vpack.c.bf16 %v14070_v56, %v14069_v58  ;;  %14074 = vst [vmem:[#allocation142_spill] sm:$0xff] %v9861_v19  ;;  %v9868_v56 = vld [vmem:[%s13070_s3 + $0x4e0] sm:$0xff]  ;;  %v14079_v58 = vand.u32 4294901760, %v9451_v51  ;;  %v14087_v43 = vand.u32 4294901760, %v9501_v6  ;;  %v9923_v57 = vsub.f32 %v9507_v52, %v14088_v21  ;;  %6581 = vmatpush1.bf16.msra.mxu1 %v6580_v41 }
 0x1f6   : > { %14076 = vst [vmem:[#allocation143_spill] sm:$0xff] %v9878_v50  ;;  %v9883_v30 = vsub.f32 %v9446_v46, %v14077_v2  ;;  %14082 = vst [vmem:[#allocation146_spill] sm:$0xff] %v9893_v25  ;;  %v9903_v46 = vld [vmem:[%s13070_s3 + $0x590] sm:$0xff]  ;;  %6583 = vmatprep.subr.bf16.mxu1 %v6582_v32  ;;  %v6586_v21 = vpack.c.bf16 %v9111_v42, %v9106_v36  ;;  %v14093_v52 = vand.u32 4294901760, %v9816_v22  ;;  %v14094_v41 = vand.u32 4294901760, %v9821_v44  ;;  %v9955_v32 = vld [vmem:[%s13070_s3 + $0x588] sm:$0xff] }
 0x1f7   : > { %14071 = vst [vmem:[#allocation141_spill] sm:$0xff] %v9850_v62  ;;  %v9888_v11 = vsub.f32 %v9451_v51, %v14079_v58  ;;  %14083 = vst [vmem:[#allocation147_spill] sm:$0xff] %v9903_v46  ;;  %v9908_v51 = vsub.f32 %v9468_v0, %v14084_v35  ;;  %v14086_v58 = vand.u32 4294901760, %v9496_v18  ;;  %v9918_v2 = vsub.f32 %v9501_v6, %v14087_v43 }
 0x1f8   : > { %14078 = vst [vmem:[#allocation144_spill] sm:$0xff] %v9883_v30  ;;  %14089 = vst [vmem:[#allocation149_spill] sm:$0xff] %v9923_v57  ;;  %6829 = vmatpush1.bf16.msra.mxu0 %v9850_v62  ;;  %v6584_v0 = vpack.c.bf16 %v9067_v59, %v9062_v13  ;;  %v14090_v35 = vand.u32 4294901760, %v9791_v10  ;;  %v9943_v62 = vpack.c.bf16 %v14094_v41, %v14093_v52  ;;  %v14098_v43 = vand.u32 4294901760, %v9512_v26 }
 0x1f9   : > { %14080 = vst [vmem:[#allocation145_spill] sm:$0xff] %v9888_v11  ;;  %14085 = vst [vmem:[#allocation148_spill] sm:$0xff] %v9908_v51  ;;  %v9913_v14 = vsub.f32 %v9496_v18, %v14086_v58  ;;  %v14091_v18 = vand.u32 4294901760, %v9796_v45  ;;  %6831 = vmatprep.subr.bf16.mxu0 %v9861_v19  ;;  %v14100_v52 = vand.u32 4294901760, %v9539_v12  ;;  %v14103_v19 = vand.u32 4294901760, %v9549_v48 }
 0x1fa   : > { %14095 = vst [vmem:[#allocation151_spill] sm:$0xff] %v9943_v62  ;;  %14097 = vst [vmem:[#allocation153_spill] sm:$0xff] %v9955_v32  ;;  %v9960_v6 = vsub.f32 %v9512_v26, %v14098_v43  ;;  %v9980_v26 = vld [vmem:[%s13070_s3 + $0x5c8] sm:$0xff]  ;;  %v14107_v43 = vand.u32 4294901760, %v9554_v53  ;;  %v14113_v36 = vand.u32 4294901760, %v9591_v60  ;;  %6585 = vmatpush1.bf16.msra.mxu1 %v6584_v0  ;;  %v14119_v0 = vand.u32 4294901760, %v9903_v46 }
 0x1fb   : > { %v9932_v58 = vpack.c.bf16 %v14091_v18, %v14090_v35  ;;  %v9950_v18 = vld [vmem:[%s13070_s3 + $0x550] sm:$0xff]  ;;  %v9965_v41 = vsub.f32 %v9539_v12, %v14100_v52  ;;  %v14101_v35 = vand.u32 4294901760, %v9544_v8  ;;  %v9975_v42 = vsub.f32 %v9549_v48, %v14103_v19  ;;  %14105 = vst [vmem:[#allocation157_spill] sm:$0xff] %v9980_v26  ;;  %v9985_v12 = vld [vmem:[%s13070_s3 + $0x600] sm:$0xff]  ;;  %6587 = vmatprep.subr.bf16.mxu1 %v6586_v21  ;;  %v10037_v21 = vld [vmem:[%s13070_s3 + $0x5f8] sm:$0xff] }
 0x1fc   : > { %14096 = vst [vmem:[#allocation152_spill] sm:$0xff] %v9950_v18  ;;  %14099 = vst [vmem:[#allocation154_spill] sm:$0xff] %v9960_v6  ;;  %v14111_v19 = vand.u32 4294901760, %v9586_v28  ;;  %v10005_v13 = vsub.f32 %v9591_v60, %v14113_v36  ;;  %v6590_v60 = vpack.c.bf16 %v9207_v17, %v9202_v7  ;;  %v14118_v36 = vand.u32 4294901760, %v9898_v20 }
 0x1fd   : > { %14092 = vst [vmem:[#allocation150_spill] sm:$0xff] %v9932_v58  ;;  %v9970_v59 = vsub.f32 %v9544_v8, %v14101_v35  ;;  %14104 = vst [vmem:[#allocation156_spill] sm:$0xff] %v9975_v42  ;;  %v9990_v8 = vsub.f32 %v9554_v53, %v14107_v43  ;;  %v14109_v35 = vand.u32 4294901760, %v9581_v34  ;;  %6833 = vmatpush1.bf16.msra.mxu0 %v9932_v58  ;;  %v14115_v43 = vand.u32 4294901760, %v9868_v56 }
 0x1fe   : > { %14106 = vst [vmem:[#allocation158_spill] sm:$0xff] %v9985_v12  ;;  %v10000_v52 = vsub.f32 %v9586_v28, %v14111_v19  ;;  %14114 = vst [vmem:[#allocation162_spill] sm:$0xff] %v10005_v13  ;;  %v6588_v53 = vpack.c.bf16 %v9127_v5, %v9122_v16  ;;  %6835 = vmatprep.subr.bf16.mxu0 %v9943_v62  ;;  %v10025_v58 = vpack.c.bf16 %v14119_v0, %v14118_v36 }
 0x1ff   : > { %14102 = vst [vmem:[#allocation155_spill] sm:$0xff] %v9970_v59  ;;  %14108 = vst [vmem:[#allocation159_spill] sm:$0xff] %v9990_v8  ;;  %v9995_v48 = vsub.f32 %v9581_v34, %v14109_v35  ;;  %v14116_v34 = vand.u32 4294901760, %v9873_v61  ;;  %v14123_v19 = vand.u32 4294901760, %v9596_v38  ;;  %v14125_v36 = vand.u32 4294901760, %v9623_v9 }
 0x200   : > { %14112 = vst [vmem:[#allocation161_spill] sm:$0xff] %v10000_v52  ;;  %14120 = vst [vmem:[#allocation164_spill] sm:$0xff] %v10025_v58  ;;  %v14129_v62 = vand.u32 4294901760, %v9633_v39  ;;  %6589 = vmatpush1.bf16.msra.mxu1 %v6588_v53  ;;  %v14138_v16 = vand.u32 4294901760, %v9950_v18  ;;  %v14139_v46 = vand.u32 4294901760, %v9955_v32  ;;  %v10099_v53 = vld [vmem:[%s13070_s3 + $0x668] sm:$0xff] }
 0x201   : > { %14110 = vst [vmem:[#allocation160_spill] sm:$0xff] %v9995_v48  ;;  %v10014_v35 = vpack.c.bf16 %v14116_v34, %v14115_v43  ;;  %v10032_v34 = vld [vmem:[%s13070_s3 + $0x5c0] sm:$0xff]  ;;  %14122 = vst [vmem:[#allocation166_spill] sm:$0xff] %v10037_v21  ;;  %v10042_v28 = vsub.f32 %v9596_v38, %v14123_v19  ;;  %v10047_v0 = vsub.f32 %v9623_v9, %v14125_v36  ;;  %v14127_v43 = vand.u32 4294901760, %v9628_v1  ;;  %v10062_v38 = vld [vmem:[%s13070_s3 + $0x638] sm:$0xff] }
 0x202   : > { %14121 = vst [vmem:[#allocation165_spill] sm:$0xff] %v10032_v34  ;;  %v10057_v17 = vsub.f32 %v9633_v39, %v14129_v62  ;;  %14131 = vst [vmem:[#allocation171_spill] sm:$0xff] %v10062_v38  ;;  %v10067_v9 = vld [vmem:[%s13070_s3 + $0x670] sm:$0xff]  ;;  %v14133_v19 = vand.u32 4294901760, %v9638_v40  ;;  %v6592_v62 = vpack.c.bf16 %v9233_v55, %v9228_v49  ;;  %v14137_v36 = vld [vmem:[#allocation102_spill] sm:$0xff]  ;;  %6591 = vmatprep.subr.bf16.mxu1 %v6590_v60 }
 0x203   : > { %14117 = vst [vmem:[#allocation163_spill] sm:$0xff] %v10014_v35  ;;  %14124 = vst [vmem:[#allocation167_spill] sm:$0xff] %v10042_v28  ;;  %v10052_v5 = vsub.f32 %v9628_v1, %v14127_v43  ;;  %v14135_v43 = vand.u32 4294901760, %v9665_v15  ;;  %6837 = vmatpush1.bf16.msra.mxu0 %v10014_v35  ;;  %v14145_v35 = vand.u32 4294901760, %v9985_v12  ;;  %v14147_v18 = vld [vmem:[#allocation124_spill] sm:$0xff]  ;;  %v14150_v60 = vld [vmem:[#allocation125_spill] sm:$0xff] }
 0x204   : > { %14126 = vst [vmem:[#allocation168_spill] sm:$0xff] %v10047_v0  ;;  %14130 = vst [vmem:[#allocation170_spill] sm:$0xff] %v10057_v17  ;;  %v10072_v1 = vsub.f32 %v9638_v40, %v14133_v19  ;;  %v10087_v17 = vpack.c.bf16 %v14139_v46, %v14138_v16  ;;  %6839 = vmatprep.subr.bf16.mxu0 %v10025_v58  ;;  %v14142_v16 = vld [vmem:[#allocation90_spill] sm:$0xff]  ;;  %v14143_v46 = vld [vmem:[#allocation92_spill] sm:$0xff]  ;;  %v14144_v19 = vand.u32 4294901760, %v9980_v26  ;;  %v14151_v58 = vand.u32 4294901760, %v14150_v60 }
 0x205   : > { %14128 = vst [vmem:[#allocation169_spill] sm:$0xff] %v10052_v5  ;;  %14132 = vst [vmem:[#allocation172_spill] sm:$0xff] %v10067_v9  ;;  %v10077_v39 = vsub.f32 %v9665_v15, %v14135_v43  ;;  %v10094_v15 = vld [vmem:[%s13070_s3 + $0x630] sm:$0xff]  ;;  %v14141_v43 = vld [vmem:[#allocation103_spill] sm:$0xff]  ;;  %v6594_v40 = vpack.c.bf16 %v14143_v46, %v14142_v16  ;;  %6593 = vmatpush1.bf16.msra.mxu1 %v6592_v62 }
 0x206   : > { %14134 = vst [vmem:[#allocation173_spill] sm:$0xff] %v10072_v1  ;;  %14140 = vst [vmem:[#allocation175_spill] sm:$0xff] %v10087_v17  ;;  %v10109_v55 = vpack.c.bf16 %v14145_v35, %v14144_v19  ;;  %v10121_v1 = vsub.f32 %v14150_v60, %v14151_v58  ;;  %v14153_v46 = vld [vmem:[#allocation126_spill] sm:$0xff]  ;;  %v14156_v35 = vand.u32 4294901760, %v9707_v27  ;;  %v14158_v32 = vld [vmem:[#allocation129_spill] sm:$0xff]  ;;  %v14165_v58 = vand.u32 4294901760, %v10037_v21 }
 0x207   : > { %14136 = vst [vmem:[#allocation174_spill] sm:$0xff] %v10077_v39  ;;  %v14148_v39 = vand.u32 4294901760, %v14147_v18  ;;  %v14154_v16 = vand.u32 4294901760, %v14153_v46  ;;  %v14159_v49 = vand.u32 4294901760, %v14158_v32  ;;  %v10143_v60 = vld [vmem:[%s13070_s3 + $0x6a8] sm:$0xff]  ;;  %6841 = vmatpush1.bf16.msra.mxu0 %v10087_v17  ;;  %v10168_v26 = vld [vmem:[%s13070_s3 + $0x6a0] sm:$0xff]  ;;  %6595 = vmatprep.subr.bf16.mxu1 %v6594_v40 }
 0x208   : > { %14146 = vst [vmem:[#allocation176_spill] sm:$0xff] %v10109_v55  ;;  %14152 = vst [vmem:[#allocation125_spill] sm:$0xff] %v10121_v1  ;;  %v10131_v19 = vsub.f32 %v9707_v27, %v14156_v35  ;;  %v14161_v27 = vand.u32 4294901760, %v14137_v36  ;;  %v14164_v35 = vand.u32 4294901760, %v10032_v34  ;;  %6843 = vmatprep.subr.bf16.mxu0 %v10109_v55  ;;  %v14171_v34 = vld [vmem:[#allocation138_spill] sm:$0xff]  ;;  %v14175_v40 = vand.u32 4294901760, %v9749_v47 }
 0x209   : > { %v10116_v7 = vsub.f32 %v14147_v18, %v14148_v39  ;;  %v10126_v12 = vsub.f32 %v14153_v46, %v14154_v16  ;;  %v10136_v18 = vsub.f32 %v14158_v32, %v14159_v49  ;;  %v10148_v16 = vld [vmem:[%s13070_s3 + $0x6e0] sm:$0xff]  ;;  %v14162_v49 = vand.u32 4294901760, %v9717_v23 }
 0x20a   : > { %14157 = vst [vmem:[#allocation177_spill] sm:$0xff] %v10131_v19  ;;  %v2733_v46 = vsub.f32 %v14137_v36, %v14161_v27  ;;  %v10163_v39 = vpack.c.bf16 %v14165_v58, %v14164_v35  ;;  %v10173_v27 = vld [vmem:[%s13070_s3 + $0x6d8] sm:$0xff]  ;;  %v14168_v58 = vand.u32 4294901760, %v10062_v38  ;;  %v14169_v35 = vand.u32 4294901760, %v10067_v9  ;;  %v14180_v9 = vld [vmem:[#allocation93_spill] sm:$0xff] }
 0x20b   : > { %14149 = vst [vmem:[#allocation124_spill] sm:$0xff] %v10116_v7  ;;  %14155 = vst [vmem:[#allocation126_spill] sm:$0xff] %v10126_v12  ;;  %v10156_v32 = vsub.f32 %v9717_v23, %v14162_v49  ;;  %v14167_v23 = vand.u32 4294901760, %v14141_v43  ;;  %v10197_v49 = vsub.f32 %v9749_v47, %v14175_v40  ;;  %v14177_v21 = vand.u32 4294901760, %v10099_v53 }
 0x20c   : > { %14160 = vst [vmem:[#allocation129_spill] sm:$0xff] %v10136_v18  ;;  %14166 = vst [vmem:[#allocation179_spill] sm:$0xff] %v10163_v39  ;;  %v10184_v17 = vpack.c.bf16 %v14169_v35, %v14168_v58  ;;  %v14172_v18 = vld [vmem:[#allocation130_spill] sm:$0xff]  ;;  %v14176_v35 = vand.u32 4294901760, %v10094_v15  ;;  %6845 = vmatpush1.bf16.msra.mxu0 %v10163_v39  ;;  %v14182_v40 = vand.u32 4294901760, %v9801_v3  ;;  %v14187_v55 = vand.u32 4294901760, %v9754_v37 }
 0x20d   : > { %14163 = vst [vmem:[#allocation178_spill] sm:$0xff] %v10156_v32  ;;  %v2745_v62 = vsub.f32 %v14141_v43, %v14167_v23  ;;  %v14173_v19 = vand.u32 4294901760, %v14172_v18  ;;  %v14179_v43 = vld [vmem:[#allocation94_spill] sm:$0xff]  ;;  %v14186_v32 = vand.u32 4294901760, %v14171_v34  ;;  %v14189_v39 = vand.u32 4294901760, %v10143_v60 }
 0x20e   : > { %14170 = vst [vmem:[#allocation180_spill] sm:$0xff] %v10184_v17  ;;  %v10205_v36 = vpack.c.bf16 %v14177_v21, %v14176_v35  ;;  %v14181_v38 = vpack.c.bf16 %v14179_v43, %v14180_v9  ;;  %v2739_v58 = vsub.f32 %v9801_v3, %v14182_v40  ;;  %v14183_v35 = vld [vmem:[#allocation13_spill] sm:$0xff]  ;;  %6847 = vmatprep.subr.bf16.mxu0 %v10184_v17  ;;  %v14190_v17 = vand.u32 4294901760, %v10148_v16 }
 0x20f   : > { %v10192_v23 = vsub.f32 %v14172_v18, %v14173_v19  ;;  %v2734_v18 = vand.u32 4294901760, %v2733_v46  ;;  %v2746_v47 = vand.u32 4294901760, %v2745_v62  ;;  %v14184_v46 = vand.u32 4294901760, %v9806_v31  ;;  %v14198_v43 = vld [vmem:[#allocation109_spill] sm:$0xff] }
 0x210   : > { %14178 = vst [vmem:[#allocation181_spill] sm:$0xff] %v10205_v36  ;;  %6597 = vmatpush1.bf16.msra.mxu1 %v14181_v38  ;;  %v14185_v38 = vand.u32 4294901760, %v9811_v29  ;;  %v2769_v40 = vsub.f32 %v14171_v34, %v14186_v32  ;;  %v10232_v21 = vsub.f32 %v9754_v37, %v14187_v55  ;;  %v14193_v32 = vld [vmem:[#allocation106_spill] sm:$0xff]  ;;  %v14194_v55 = vand.u32 4294901760, %v10168_v26  ;;  %6849 = vmatpush1.bf16.msra.mxu0 %v10205_v36 }
 0x211   : > { %14174 = vst [vmem:[#allocation130_spill] sm:$0xff] %v10192_v23  ;;  %6599 = vmatprep.subr.bf16.mxu1 %v14183_v35  ;;  %v2751_v19 = vsub.f32 %v9806_v31, %v14184_v46  ;;  %v10238_v35 = vpack.c.bf16 %v14190_v17, %v14189_v39  ;;  %v14195_v37 = vand.u32 4294901760, %v10173_v27  ;;  %v14197_v46 = vld [vmem:[#allocation14_spill] sm:$0xff] }
 0x212   : > { %v2757_v62 = vsub.f32 %v9811_v29, %v14185_v38  ;;  %14188 = vst [vmem:[#allocation182_spill] sm:$0xff] %v10232_v21  ;;  %v14192_v38 = vand.u32 4294901760, %v9759_v54  ;;  %v6854_v29 = vpack.c.bf16 %v2746_v47, %v2734_v18  ;;  %v2770_v3 = vand.u32 4294901760, %v2769_v40 }
 0x213   : > { %14191 = vst [vmem:[#allocation183_spill] sm:$0xff] %v10238_v35  ;;  %2036 = vmatmul.mubr.f32.vlgmr.msra.gmra.mrb[0].mxu1 %v14193_v32  ;;  %v10252_v34 = vpack.c.bf16 %v14195_v37, %v14194_v55  ;;  %v14200_v32 = vand.u32 4294901760, %v9836_v24  ;;  %v14201_v55 = vld [vmem:[#allocation17_spill] sm:$0xff]  ;;  %v2740_v37 = vand.u32 4294901760, %v2739_v58  ;;  %v2752_v17 = vand.u32 4294901760, %v2751_v19  ;;  %6851 = vmatprep.subr.bf16.mxu0 %v10238_v35 }
 0x214   : > { %v10245_v9 = vsub.f32 %v9759_v54, %v14192_v38  ;;  %6601 = vmatpush1.bf16.msra.mxu1 %v14197_v46  ;;  %2173 = vmatprep.mubr.f32.mxu1 %v14198_v43  ;;  %v14199_v54 = vand.u32 4294901760, %v9831_v63  ;;  %v2758_v39 = vand.u32 4294901760, %v2757_v62  ;;  %v14202_v18 = vand.u32 4294901760, %v9841_v4  ;;  %v14209_v46 = vld [vmem:[#allocation20_spill] sm:$0xff] }
 0x215   : > { %14196 = vst [vmem:[#allocation184_spill] sm:$0xff] %v10252_v34  ;;  %v2775_v31 = vsub.f32 %v9836_v24, %v14200_v32  ;;  %6603 = vmatprep.subr.bf16.mxu1 %v14201_v55  ;;  %v14204_v55 = vand.u32 4294901760, %v9883_v30  ;;  %v14205_v19 = vand.u32 4294901760, %v9888_v11  ;;  %v14206_v35 = vand.u32 4294901760, %v9764_v33  ;;  %6853 = vmatpush1.bf16.msra.mxu0 %v10252_v34 }
 0x216   : > { %v2763_v38 = vsub.f32 %v9831_v63, %v14199_v54  ;;  %v2781_v47 = vsub.f32 %v9841_v4, %v14202_v18  ;;  %v14203_v54 = vand.u32 4294901760, %v9878_v50  ;;  %v14207_v32 = vand.u32 4294901760, %v9791_v10  ;;  %6855 = vmatprep.subr.bf16.mxu0 %v6854_v29 }
 0x217   : > { %v2787_v58 = vsub.f32 %v9883_v30, %v14204_v55  ;;  %v2799_v62 = vsub.f32 %v9888_v11, %v14205_v19  ;;  %v2776_v30 = vand.u32 4294901760, %v2775_v31  ;;  %v14210_v19 = vld [vmem:[#allocation25_spill] sm:$0xff]  ;;  %v6856_v40 = vpack.c.bf16 %v2752_v17, %v2740_v37 }
 0x218   : > { %v2793_v43 = vsub.f32 %v9878_v50, %v14203_v54  ;;  %v10286_v54 = vsub.f32 %v9764_v33, %v14206_v35  ;;  %v10291_v36 = vsub.f32 %v9791_v10, %v14207_v32  ;;  %6605 = vmatpush1.bf16.msra.mxu1 %v14209_v46  ;;  %v2764_v55 = vand.u32 4294901760, %v2763_v38 }
 0x219   : > { %6607 = vmatprep.subr.bf16.mxu1 %v14210_v19  ;;  %v6858_v18 = vpack.c.bf16 %v2770_v3, %v2758_v39  ;;  %v13455_v11 = vand.u32 4294901760, %v9923_v57  ;;  %v13456_v33 = vand.u32 4294901760, %v9960_v6  ;;  %v2782_v35 = vand.u32 4294901760, %v2781_v47  ;;  %v14216_v47 = vld [vmem:[#allocation112_spill] sm:$0xff] }
 0x21a   : > { %14208 = vst [vmem:[#allocation185_spill] sm:$0xff] %v10291_v36  ;;  %v2794_v50 = vand.u32 4294901760, %v2793_v43  ;;  %v14211_v10 = vand.u32 4294901760, %v9893_v25  ;;  %v14212_v38 = vand.u32 4294901760, %v9908_v51  ;;  %v2788_v34 = vand.u32 4294901760, %v2787_v58  ;;  %2724 = vmatmul.mubr.f32.vlgmr.msra.gmra.mrb[4].mxu0 %v14216_v47  ;;  %v14222_v47 = vld [vmem:[#allocation33_spill] sm:$0xff] }
 0x21b   : > { %v2800_v46 = vand.u32 4294901760, %v2799_v62  ;;  %v14213_v17 = vand.u32 4294901760, %v9913_v14  ;;  %v14214_v39 = vand.u32 4294901760, %v9918_v2  ;;  %v14215_v43 = vand.u32 4294901760, %v9796_v45  ;;  %6857 = vmatpush1.bf16.msra.mxu0 %v6856_v40  ;;  %v14220_v40 = vld [vmem:[#allocation29_spill] sm:$0xff] }
 0x21c   : > { %v2805_v32 = vsub.f32 %v9893_v25, %v14211_v10  ;;  %v2817_v31 = vsub.f32 %v9908_v51, %v14212_v38  ;;  %v14217_v10 = vld [vmem:[#allocation26_spill] sm:$0xff]  ;;  %v6860_v38 = vpack.c.bf16 %v2776_v30, %v2764_v55  ;;  %v14219_v30 = vand.u32 4294901760, %v9816_v22  ;;  %6859 = vmatprep.subr.bf16.mxu0 %v6858_v18 }
 0x21d   : > { %v2811_v3 = vsub.f32 %v9913_v14, %v14213_v17  ;;  %v2823_v29 = vsub.f32 %v9918_v2, %v14214_v39  ;;  %v10313_v37 = vsub.f32 %v9796_v45, %v14215_v43  ;;  %6609 = vmatpush1.bf16.msra.mxu1 %v14217_v10  ;;  %v14218_v17 = vld [vmem:[#allocation105_spill] sm:$0xff]  ;;  %v2829_v39 = vsub.f32 %v9923_v57, %v13455_v11 }
 0x21e   : > { %3115 = vmatprep.mubr.f32.mxu0 %v14218_v17  ;;  %v2841_v45 = vsub.f32 %v9960_v6, %v13456_v33  ;;  %v10331_v55 = vsub.f32 %v9816_v22, %v14219_v30  ;;  %6611 = vmatprep.subr.bf16.mxu1 %v14220_v40  ;;  %v6862_v62 = vpack.c.bf16 %v2794_v50, %v2782_v35  ;;  %v2806_v58 = vand.u32 4294901760, %v2805_v32 }
 0x21f   : > { %v2818_v10 = vand.u32 4294901760, %v2817_v31  ;;  %v14221_v11 = vand.u32 4294901760, %v9821_v44  ;;  %v6864_v33 = vpack.c.bf16 %v2800_v46, %v2788_v34  ;;  %v2812_v43 = vand.u32 4294901760, %v2811_v3  ;;  %6861 = vmatpush1.bf16.msra.mxu0 %v6860_v38  ;;  %v14237_v38 = vld [vmem:[#allocation42_spill] sm:$0xff] }
 0x220   : > { %v2824_v6 = vand.u32 4294901760, %v2823_v29  ;;  %v14223_v57 = vand.u32 4294901760, %v9965_v41  ;;  %v14224_v30 = vand.u32 4294901760, %v9970_v59  ;;  %v2842_v34 = vand.u32 4294901760, %v2841_v45  ;;  %6863 = vmatprep.subr.bf16.mxu0 %v6862_v62  ;;  %v14234_v62 = vld [vmem:[#allocation38_spill] sm:$0xff] }
 0x221   : > { %v10337_v19 = vsub.f32 %v9821_v44, %v14221_v11  ;;  %6613 = vmatpush1.bf16.msra.mxu1 %v14222_v47  ;;  %v14225_v11 = vld [vmem:[#allocation37_spill] sm:$0xff]  ;;  %v2830_v44 = vand.u32 4294901760, %v2829_v39  ;;  %v14226_v46 = vand.u32 4294901760, %v9975_v42  ;;  %v14227_v31 = vand.u32 4294901760, %v9990_v8 }
 0x222   : > { %v2835_v22 = vsub.f32 %v9965_v41, %v14223_v57  ;;  %v2847_v50 = vsub.f32 %v9970_v59, %v14224_v30  ;;  %6615 = vmatprep.subr.bf16.mxu1 %v14225_v11  ;;  %v14228_v3 = vand.u32 4294901760, %v9868_v56  ;;  %v6866_v30 = vpack.c.bf16 %v2818_v10, %v2806_v58  ;;  %v14241_v47 = vld [vmem:[#allocation173_spill] sm:$0xff] }
 0x223   : > { %v2853_v32 = vsub.f32 %v9975_v42, %v14226_v46  ;;  %v2865_v57 = vsub.f32 %v9990_v8, %v14227_v31  ;;  %v14230_v45 = vand.u32 4294901760, %v9873_v61  ;;  %v14232_v46 = vand.u32 4294901760, %v9898_v20  ;;  %6865 = vmatpush1.bf16.msra.mxu0 %v6864_v33 }
 0x224   : > { %v10358_v29 = vsub.f32 %v9868_v56, %v14228_v3  ;;  %v6868_v10 = vpack.c.bf16 %v2824_v6, %v2812_v43  ;;  %v2836_v58 = vand.u32 4294901760, %v2835_v22  ;;  %v14235_v3 = vand.u32 4294901760, %v9995_v48  ;;  %6867 = vmatprep.subr.bf16.mxu0 %v6866_v30  ;;  %v14261_v30 = vld [vmem:[#allocation177_spill] sm:$0xff] }
 0x225   : > { %v10365_v35 = vsub.f32 %v9873_v61, %v14230_v45  ;;  %v10370_v31 = vsub.f32 %v9898_v20, %v14232_v46  ;;  %6617 = vmatpush1.bf16.msra.mxu1 %v14234_v62  ;;  %v14236_v61 = vand.u32 4294901760, %v10000_v52  ;;  %v6870_v20 = vpack.c.bf16 %v2842_v34, %v2830_v44  ;;  %v14248_v62 = vld [vmem:[#allocation152_spill] sm:$0xff] }
 0x226   : > { %14229 = vst [vmem:[#allocation186_spill] sm:$0xff] %v10358_v29  ;;  %v2859_v39 = vsub.f32 %v9995_v48, %v14235_v3  ;;  %6619 = vmatprep.subr.bf16.mxu1 %v14237_v38  ;;  %v2848_v46 = vand.u32 4294901760, %v2847_v50  ;;  %v2854_v18 = vand.u32 4294901760, %v2853_v32  ;;  %v2866_v11 = vand.u32 4294901760, %v2865_v57  ;;  %v14240_v3 = vld [vmem:[#allocation170_spill] sm:$0xff] }
 0x227   : > { %14231 = vst [vmem:[#allocation187_spill] sm:$0xff] %v10365_v35  ;;  %14233 = vst [vmem:[#allocation188_spill] sm:$0xff] %v10370_v31  ;;  %v2871_v45 = vsub.f32 %v10000_v52, %v14236_v61  ;;  %v14238_v56 = vand.u32 4294901760, %v10005_v13  ;;  %v14239_v43 = vand.u32 4294901760, %v10042_v28  ;;  %v14242_v33 = vand.u32 4294901760, %v10047_v0  ;;  %v14244_v32 = vld [vmem:[#allocation174_spill] sm:$0xff]  ;;  %6869 = vmatpush1.bf16.msra.mxu0 %v6868_v10 }
 0x228   : > { %v14243_v50 = vand.u32 4294901760, %v10052_v5  ;;  %v14249_v40 = vand.u32 4294901760, %v14248_v62  ;;  %v6872_v57 = vpack.c.bf16 %v2848_v46, %v2836_v58  ;;  %6871 = vmatprep.subr.bf16.mxu0 %v6870_v20  ;;  %v14253_v52 = vand.u32 4294901760, %v14240_v3  ;;  %v14257_v46 = vld [vmem:[#allocation153_spill] sm:$0xff] }
 0x229   : > { %v2877_v6 = vsub.f32 %v10005_v13, %v14238_v56  ;;  %v2889_v22 = vsub.f32 %v10042_v28, %v14239_v43  ;;  %v2883_v44 = vsub.f32 %v10047_v0, %v14242_v33  ;;  %v14245_v56 = vld [vmem:[#allocation147_spill] sm:$0xff]  ;;  %v14251_v28 = vld [vmem:[#allocation44_spill] sm:$0xff]  ;;  %v2860_v33 = vand.u32 4294901760, %v2859_v39 }
 0x22a   : > { %v2895_v34 = vsub.f32 %v10052_v5, %v14243_v50  ;;  %v14246_v38 = vand.u32 4294901760, %v14245_v56  ;;  %v10406_v61 = vsub.f32 %v14248_v62, %v14249_v40  ;;  %6621 = vmatpush1.bf16.msra.mxu1 %v14251_v28  ;;  %v2872_v0 = vand.u32 4294901760, %v2871_v45  ;;  %v14252_v50 = vld [vmem:[#allocation49_spill] sm:$0xff] }
 0x22b   : > { %6623 = vmatprep.subr.bf16.mxu1 %v14252_v50  ;;  %v6874_v5 = vpack.c.bf16 %v2866_v11, %v2854_v18  ;;  %v2901_v40 = vsub.f32 %v14240_v3, %v14253_v52  ;;  %v14254_v62 = vand.u32 4294901760, %v14241_v47  ;;  %v2884_v10 = vand.u32 4294901760, %v2883_v44  ;;  %v14260_v52 = vld [vmem:[#allocation50_spill] sm:$0xff]  ;;  %v14262_v44 = vld [vmem:[#allocation129_spill] sm:$0xff]  ;;  %6873 = vmatpush1.bf16.msra.mxu0 %v6872_v57 }
 0x22c   : > { %v10401_v43 = vsub.f32 %v14245_v56, %v14246_v38  ;;  %14250 = vst [vmem:[#allocation152_spill] sm:$0xff] %v10406_v61  ;;  %v2878_v38 = vand.u32 4294901760, %v2877_v6  ;;  %v2890_v56 = vand.u32 4294901760, %v2889_v22  ;;  %v2896_v45 = vand.u32 4294901760, %v2895_v34  ;;  %v14263_v50 = vld [vmem:[#allocation53_spill] sm:$0xff] }
 0x22d   : > { %v2913_v39 = vsub.f32 %v14241_v47, %v14254_v62  ;;  %v14255_v58 = vand.u32 4294901760, %v14244_v32  ;;  %v14256_v11 = vand.u32 4294901760, %v10116_v7  ;;  %v14258_v6 = vand.u32 4294901760, %v14257_v46  ;;  %6875 = vmatprep.subr.bf16.mxu0 %v6874_v5 }
 0x22e   : > { %14247 = vst [vmem:[#allocation147_spill] sm:$0xff] %v10401_v43  ;;  %6625 = vmatpush1.bf16.msra.mxu1 %v14260_v52  ;;  %v6876_v13 = vpack.c.bf16 %v2872_v0, %v2860_v33  ;;  %v14267_v0 = vld [vmem:[#allocation157_spill] sm:$0xff]  ;;  %v6878_v57 = vpack.c.bf16 %v2890_v56, %v2878_v38  ;;  %v2902_v34 = vand.u32 4294901760, %v2901_v40  ;;  %v14274_v52 = vand.u32 4294901760, %v14261_v30 }
 0x22f   : > { %v2907_v18 = vsub.f32 %v14244_v32, %v14255_v58  ;;  %v2919_v20 = vsub.f32 %v10116_v7, %v14256_v11  ;;  %v10427_v22 = vsub.f32 %v14257_v46, %v14258_v6  ;;  %6627 = vmatprep.subr.bf16.mxu1 %v14263_v50  ;;  %v14264_v58 = vand.u32 4294901760, %v10121_v1  ;;  %v14266_v46 = vld [vmem:[#allocation178_spill] sm:$0xff]  ;;  %v14273_v6 = vld [vmem:[#allocation56_spill] sm:$0xff] }
 0x230   : > { %v14265_v11 = vand.u32 4294901760, %v10126_v12  ;;  %v14268_v33 = vand.u32 4294901760, %v14267_v0  ;;  %v2914_v50 = vand.u32 4294901760, %v2913_v39  ;;  %v14270_v32 = vld [vmem:[#allocation158_spill] sm:$0xff]  ;;  %v2931_v3 = vsub.f32 %v14261_v30, %v14274_v52  ;;  %6877 = vmatpush1.bf16.msra.mxu0 %v6876_v13  ;;  %v14291_v13 = vld [vmem:[#allocation67_spill] sm:$0xff] }
 0x231   : > { %14259 = vst [vmem:[#allocation153_spill] sm:$0xff] %v10427_v22  ;;  %v2925_v28 = vsub.f32 %v10121_v1, %v14264_v58  ;;  %v14271_v47 = vand.u32 4294901760, %v14270_v32  ;;  %v6880_v1 = vpack.c.bf16 %v2896_v45, %v2884_v10  ;;  %v14277_v39 = vand.u32 4294901760, %v14266_v46  ;;  %6879 = vmatprep.subr.bf16.mxu0 %v6878_v57  ;;  %v14288_v57 = vld [vmem:[#allocation63_spill] sm:$0xff] }
 0x232   : > { %v2937_v7 = vsub.f32 %v10126_v12, %v14265_v11  ;;  %v10444_v62 = vsub.f32 %v14267_v0, %v14268_v33  ;;  %v2908_v11 = vand.u32 4294901760, %v2907_v18  ;;  %v2920_v12 = vand.u32 4294901760, %v2919_v20  ;;  %6629 = vmatpush1.bf16.msra.mxu1 %v14273_v6  ;;  %v14279_v20 = vld [vmem:[#allocation165_spill] sm:$0xff] }
 0x233   : > { %v10449_v58 = vsub.f32 %v14270_v32, %v14271_v47  ;;  %v14275_v0 = vand.u32 4294901760, %v14262_v44  ;;  %v14276_v47 = vld [vmem:[#allocation59_spill] sm:$0xff]  ;;  %v2926_v32 = vand.u32 4294901760, %v2925_v28  ;;  %v2949_v10 = vsub.f32 %v14266_v46, %v14277_v39 }
 0x234   : > { %14269 = vst [vmem:[#allocation177_spill] sm:$0xff] %v10444_v62  ;;  %6631 = vmatprep.subr.bf16.mxu1 %v14276_v47  ;;  %v2938_v40 = vand.u32 4294901760, %v2937_v7  ;;  %v14278_v45 = vand.u32 4294901760, %v10192_v23  ;;  %v14280_v52 = vand.u32 4294901760, %v14279_v20  ;;  %v14282_v7 = vld [vmem:[#allocation166_spill] sm:$0xff]  ;;  %v14285_v39 = vld [vmem:[#allocation171_spill] sm:$0xff]  ;;  %6881 = vmatpush1.bf16.msra.mxu0 %v6880_v1 }
 0x235   : > { %14272 = vst [vmem:[#allocation178_spill] sm:$0xff] %v10449_v58  ;;  %v2943_v5 = vsub.f32 %v14262_v44, %v14275_v0  ;;  %v6882_v0 = vpack.c.bf16 %v2914_v50, %v2902_v34  ;;  %v14283_v56 = vand.u32 4294901760, %v14282_v7  ;;  %v14286_v47 = vand.u32 4294901760, %v14285_v39  ;;  %v14294_v1 = vld [vmem:[#allocation172_spill] sm:$0xff] }
 0x236   : > { %v2961_v18 = vsub.f32 %v10192_v23, %v14278_v45  ;;  %v10470_v33 = vsub.f32 %v14279_v20, %v14280_v52  ;;  %6633 = vmatpush1.bf16.msra.mxu1 %v14288_v57  ;;  %v2932_v50 = vand.u32 4294901760, %v2931_v3  ;;  %v14289_v52 = vand.u32 4294901760, %v10197_v49 }
 0x237   : > { %v10477_v38 = vsub.f32 %v14282_v7, %v14283_v56  ;;  %v10482_v45 = vsub.f32 %v14285_v39, %v14286_v47  ;;  %v2944_v34 = vand.u32 4294901760, %v2943_v5  ;;  %v14290_v56 = vand.u32 4294901760, %v10232_v21  ;;  %6635 = vmatprep.subr.bf16.mxu1 %v14291_v13  ;;  %6883 = vmatprep.subr.bf16.mxu0 %v6882_v0  ;;  %v14305_v13 = vld [vmem:[#allocation82_spill] sm:$0xff] }
 0x238   : > { %14281 = vst [vmem:[#allocation157_spill] sm:$0xff] %v10470_v33  ;;  %v2955_v28 = vsub.f32 %v10197_v49, %v14289_v52  ;;  %v6884_v47 = vpack.c.bf16 %v2920_v12, %v2908_v11  ;;  %v6886_v39 = vpack.c.bf16 %v2938_v40, %v2926_v32  ;;  %v2950_v6 = vand.u32 4294901760, %v2949_v10 }
 0x239   : > { %14284 = vst [vmem:[#allocation158_spill] sm:$0xff] %v10477_v38  ;;  %14287 = vst [vmem:[#allocation165_spill] sm:$0xff] %v10482_v45  ;;  %v2967_v7 = vsub.f32 %v10232_v21, %v14290_v56  ;;  %v2962_v23 = vand.u32 4294901760, %v2961_v18  ;;  %v14292_v20 = vand.u32 4294901760, %v10245_v9  ;;  %v14293_v5 = vand.u32 4294901760, %v10286_v54 }
 0x23a   : > { %v14295_v21 = vand.u32 4294901760, %v14294_v1  ;;  %v14297_v11 = vand.u32 4294901760, %v10094_v15  ;;  %v14299_v40 = vand.u32 4294901760, %v10291_v36  ;;  %v14300_v18 = vand.u32 4294901760, %v10313_v37  ;;  %6885 = vmatpush1.bf16.msra.mxu0 %v6884_v47 }
 0x23b   : > { %v2973_v3 = vsub.f32 %v10245_v9, %v14292_v20  ;;  %v2985_v52 = vsub.f32 %v10286_v54, %v14293_v5  ;;  %v14301_v20 = vld [vmem:[#allocation68_spill] sm:$0xff]  ;;  %v6888_v5 = vpack.c.bf16 %v2944_v34, %v2932_v50  ;;  %v2956_v56 = vand.u32 4294901760, %v2955_v28  ;;  %6887 = vmatprep.subr.bf16.mxu0 %v6886_v39 }
 0x23c   : > { %v10505_v12 = vsub.f32 %v14294_v1, %v14295_v21  ;;  %v10510_v32 = vsub.f32 %v10094_v15, %v14297_v11  ;;  %v2979_v10 = vsub.f32 %v10291_v36, %v14299_v40  ;;  %v2991_v0 = vsub.f32 %v10313_v37, %v14300_v18  ;;  %6637 = vmatpush1.bf16.msra.mxu1 %v14301_v20  ;;  %v14302_v1 = vld [vmem:[#allocation81_spill] sm:$0xff] }
 0x23d   : > { %v2968_v57 = vand.u32 4294901760, %v2967_v7  ;;  %v13486_v21 = vand.u32 4294901760, %v10358_v29  ;;  %6639 = vmatprep.subr.bf16.mxu1 %v14302_v1  ;;  %v6890_v15 = vpack.c.bf16 %v2962_v23, %v2950_v6  ;;  %v13487_v11 = vand.u32 4294901760, %v10365_v35 }
 0x23e   : > { %14296 = vst [vmem:[#allocation166_spill] sm:$0xff] %v10505_v12  ;;  %14298 = vst [vmem:[#allocation171_spill] sm:$0xff] %v10510_v32  ;;  %v2974_v36 = vand.u32 4294901760, %v2973_v3  ;;  %v2986_v18 = vand.u32 4294901760, %v2985_v52  ;;  %v14303_v20 = vand.u32 4294901760, %v10331_v55  ;;  %v14304_v50 = vand.u32 4294901760, %v10337_v19  ;;  %6889 = vmatpush1.bf16.msra.mxu0 %v6888_v5 }
 0x23f   : > { %v2980_v7 = vand.u32 4294901760, %v2979_v10  ;;  %v2992_v47 = vand.u32 4294901760, %v2991_v0  ;;  %v6892_v40 = vpack.c.bf16 %v2968_v57, %v2956_v56  ;;  %v3003_v39 = vsub.f32 %v10358_v29, %v13486_v21  ;;  %6891 = vmatprep.subr.bf16.mxu0 %v6890_v15 }
 0x240   : > { %v2997_v28 = vsub.f32 %v10331_v55, %v14303_v20  ;;  %v3009_v34 = vsub.f32 %v10337_v19, %v14304_v50  ;;  %6641 = vmatpush1.bf16.msra.mxu1 %v14305_v13  ;;  %v14306_v20 = vld [vmem:[#allocation83_spill] sm:$0xff]  ;;  %v3015_v10 = vsub.f32 %v10365_v35, %v13487_v11  ;;  %v14307_v0 = vand.u32 4294901760, %v10370_v31 }
 0x241   : > { %6643 = vmatprep.subr.bf16.mxu1 %v14306_v20  ;;  %v14308_v57 = vand.u32 4294901760, %v10401_v43  ;;  %v14309_v21 = vand.u32 4294901760, %v10099_v53  ;;  %v6894_v5 = vpack.c.bf16 %v2986_v18, %v2974_v36  ;;  %v14311_v23 = vand.u32 4294901760, %v10143_v60 }
 0x242   : > { %v3021_v50 = vsub.f32 %v10370_v31, %v14307_v0  ;;  %v2998_v52 = vand.u32 4294901760, %v2997_v28  ;;  %v3010_v6 = vand.u32 4294901760, %v3009_v34  ;;  %v6896_v20 = vpack.c.bf16 %v2992_v47, %v2980_v7  ;;  %6893 = vmatpush1.bf16.msra.mxu0 %v6892_v40  ;;  %v14318_v34 = vld [vmem:[#allocation89_spill] sm:$0xff] }
 0x243   : > { %v3033_v56 = vsub.f32 %v10401_v43, %v14308_v57  ;;  %v10551_v3 = vsub.f32 %v10099_v53, %v14309_v21  ;;  %v10556_v11 = vsub.f32 %v10143_v60, %v14311_v23  ;;  %v14313_v0 = vand.u32 4294901760, %v10406_v61  ;;  %v14315_v53 = vld [vmem:[#allocation86_spill] sm:$0xff]  ;;  %6895 = vmatprep.subr.bf16.mxu0 %v6894_v5 }
 0x244   : > { %v14314_v57 = vand.u32 4294901760, %v10427_v22  ;;  %6645 = vmatpush1.bf16.msra.mxu1 %v14315_v53  ;;  %v14316_v36 = vand.u32 4294901760, %v10444_v62  ;;  %v14317_v15 = vand.u32 4294901760, %v10449_v58  ;;  %v3004_v7 = vand.u32 4294901760, %v3003_v39 }
 0x245   : > { %14310 = vst [vmem:[#allocation172_spill] sm:$0xff] %v10551_v3  ;;  %14312 = vst [vmem:[#allocation189_spill] sm:$0xff] %v10556_v11  ;;  %v3027_v13 = vsub.f32 %v10406_v61, %v14313_v0  ;;  %6647 = vmatprep.subr.bf16.mxu1 %v14318_v34  ;;  %v3016_v47 = vand.u32 4294901760, %v3015_v10  ;;  %v3022_v23 = vand.u32 4294901760, %v3021_v50  ;;  %v3034_v0 = vand.u32 4294901760, %v3033_v56 }
 0x246   : > { %v3039_v1 = vsub.f32 %v10427_v22, %v14314_v57  ;;  %v3045_v21 = vsub.f32 %v10444_v62, %v14316_v36  ;;  %v3057_v60 = vsub.f32 %v10449_v58, %v14317_v15  ;;  %v14319_v57 = vand.u32 4294901760, %v10148_v16  ;;  %6897 = vmatpush1.bf16.msra.mxu0 %v6896_v20 }
 0x247   : > { %v6898_v36 = vpack.c.bf16 %v3010_v6, %v2998_v52  ;;  %v14321_v28 = vand.u32 4294901760, %v10168_v26  ;;  %v14323_v39 = vand.u32 4294901760, %v10173_v27  ;;  %v3028_v50 = vand.u32 4294901760, %v3027_v13 }
 0x248   : > { %v10577_v53 = vsub.f32 %v10148_v16, %v14319_v57  ;;  %v3040_v56 = vand.u32 4294901760, %v3039_v1  ;;  %v14325_v16 = vld [vmem:[#allocation91_spill] sm:$0xff]  ;;  %v3046_v5 = vand.u32 4294901760, %v3045_v21  ;;  %v3058_v6 = vand.u32 4294901760, %v3057_v60 }
 0x249   : > { %v10584_v40 = vsub.f32 %v10168_v26, %v14321_v28  ;;  %v10589_v10 = vsub.f32 %v10173_v27, %v14323_v39  ;;  %6649 = vmatpush1.bf16.msra.mxu1 %v14325_v16  ;;  %v14326_v52 = vand.u32 4294901760, %v10470_v33  ;;  %v14327_v18 = vand.u32 4294901760, %v10477_v38  ;;  %v14328_v28 = vld [vmem:[#allocation95_spill] sm:$0xff]  ;;  %6899 = vmatprep.subr.bf16.mxu0 %v6898_v36  ;;  %v14332_v36 = vld [vmem:[#allocation97_spill] sm:$0xff] }
 0x24a   : > { %14320 = vst [vmem:[#allocation190_spill] sm:$0xff] %v10577_v53  ;;  %6651 = vmatprep.subr.bf16.mxu1 %v14328_v28  ;;  %v6900_v15 = vpack.c.bf16 %v3016_v47, %v3004_v7  ;;  %v6902_v27 = vpack.c.bf16 %v3034_v0, %v3022_v23  ;;  %v13488_v13 = vand.u32 4294901760, %v10510_v32  ;;  %v13489_v1 = vand.u32 4294901760, %v10551_v3  ;;  %v14331_v28 = vld [vmem:[#allocation96_spill] sm:$0xff] }
 0x24b   : > { %14322 = vst [vmem:[#allocation191_spill] sm:$0xff] %v10584_v40  ;;  %14324 = vst [vmem:[#allocation192_spill] sm:$0xff] %v10589_v10  ;;  %v3051_v57 = vsub.f32 %v10470_v33, %v14326_v52  ;;  %v3063_v26 = vsub.f32 %v10477_v38, %v14327_v18  ;;  %v14329_v21 = vand.u32 4294901760, %v10482_v45  ;;  %v14330_v39 = vand.u32 4294901760, %v10505_v12 }
 0x24c   : > { %v6904_v7 = vpack.c.bf16 %v3040_v56, %v3028_v50  ;;  %v6906_v47 = vpack.c.bf16 %v3058_v6, %v3046_v5  ;;  %6901 = vmatpush1.bf16.msra.mxu0 %v6900_v15  ;;  %v14333_v5 = vand.u32 4294901760, %v10556_v11  ;;  %v14334_v6 = vand.u32 4294901760, %v10577_v53 }
 0x24d   : > { %v3069_v60 = vsub.f32 %v10482_v45, %v14329_v21  ;;  %v3081_v52 = vsub.f32 %v10505_v12, %v14330_v39  ;;  %6653 = vmatpush1.bf16.msra.mxu1 %v14331_v28  ;;  %v3052_v23 = vand.u32 4294901760, %v3051_v57  ;;  %v3064_v0 = vand.u32 4294901760, %v3063_v26  ;;  %6903 = vmatprep.subr.bf16.mxu0 %v6902_v27  ;;  %v14335_v26 = vld [vmem:[#allocation98_spill] sm:$0xff]  ;;  %v14340_v27 = vld [vmem:[#allocation99_spill] sm:$0xff] }
 0x24e   : > { %6655 = vmatprep.subr.bf16.mxu1 %v14332_v36  ;;  %v3075_v21 = vsub.f32 %v10510_v32, %v13488_v13  ;;  %v3087_v39 = vsub.f32 %v10551_v3, %v13489_v1  ;;  %v3093_v15 = vsub.f32 %v10556_v11, %v14333_v5  ;;  %v3105_v57 = vsub.f32 %v10577_v53, %v14334_v6  ;;  %v14336_v36 = vld [vmem:[#allocation5_spill] sm:$0xff]  ;;  %v14338_v28 = vld [vmem:[#allocation6_spill] sm:$0xff] }
 0x24f   : > { %v3070_v50 = vand.u32 4294901760, %v3069_v60  ;;  %v3082_v56 = vand.u32 4294901760, %v3081_v52  ;;  %v6908_v13 = vpack.c.bf16 %v3064_v0, %v3052_v23  ;;  %v14337_v1 = vand.u32 4294901760, %v14336_v36 }
 0x250   : > { %v14339_v18 = vand.u32 4294901760, %v14338_v28  ;;  %6905 = vmatpush1.bf16.msra.mxu0 %v6904_v7  ;;  %v3076_v60 = vand.u32 4294901760, %v3075_v21  ;;  %v3088_v52 = vand.u32 4294901760, %v3087_v39  ;;  %v14341_v20 = vand.u32 4294901760, %v10584_v40  ;;  %v14344_v28 = vld [vmem:[#allocation7_spill] sm:$0xff] }
 0x251   : > { %6657 = vmatpush1.bf16.msra.mxu1 %v14335_v26  ;;  %v14342_v34 = vand.u32 4294901760, %v10589_v10  ;;  %6907 = vmatprep.subr.bf16.mxu0 %v6906_v47  ;;  %v6910_v23 = vpack.c.bf16 %v3082_v56, %v3070_v50  ;;  %v3094_v0 = vand.u32 4294901760, %v3093_v15  ;;  %v3106_v36 = vand.u32 4294901760, %v3105_v57  ;;  %v14343_v26 = vld [vmem:[#allocation100_spill] sm:$0xff]  ;;  %v14353_v15 = vld [vmem:[#allocation11_spill] sm:$0xff] }
 0x252   : > { %v6662_v16 = vpack.c.bf16 %v14339_v18, %v14337_v1  ;;  %6659 = vmatprep.subr.bf16.mxu1 %v14340_v27  ;;  %v3099_v5 = vsub.f32 %v10584_v40, %v14341_v20  ;;  %v14345_v1 = vand.u32 4294901760, %v14344_v28  ;;  %v14346_v18 = vld [vmem:[#allocation8_spill] sm:$0xff]  ;;  %v6912_v39 = vpack.c.bf16 %v3088_v52, %v3076_v60  ;;  %v14348_v27 = vld [vmem:[#allocation9_spill] sm:$0xff]  ;;  %v14350_v40 = vld [vmem:[#allocation10_spill] sm:$0xff] }
 0x253   : > { %v3111_v6 = vsub.f32 %v10589_v10, %v14342_v34  ;;  %v14347_v7 = vand.u32 4294901760, %v14346_v18  ;;  %v14349_v20 = vand.u32 4294901760, %v14348_v27  ;;  %v14351_v53 = vand.u32 4294901760, %v14350_v40  ;;  %v14352_v56 = vld [vmem:[#allocation108_spill] sm:$0xff]  ;;  %v14357_v60 = vld [vmem:[#allocation15_spill] sm:$0xff] }
 0x254   : > { %6909 = vmatpush1.bf16.msra.mxu0 %v6908_v13  ;;  %v3100_v34 = vand.u32 4294901760, %v3099_v5  ;;  %v6914_v50 = vpack.c.bf16 %v3106_v36, %v3094_v0  ;;  %v14354_v57 = vand.u32 4294901760, %v14353_v15  ;;  %v14355_v28 = vld [vmem:[#allocation12_spill] sm:$0xff]  ;;  %v14358_v40 = vand.u32 4294901760, %v14357_v60  ;;  %v14363_v36 = vld [vmem:[#allocation18_spill] sm:$0xff]  ;;  %v14365_v18 = vld [vmem:[#allocation19_spill] sm:$0xff] }
 0x255   : > { %6661 = vmatpush1.bf16.msra.mxu1 %v14343_v26  ;;  %v6664_v21 = vpack.c.bf16 %v14347_v7, %v14345_v1  ;;  %v6666_v11 = vpack.c.bf16 %v14351_v53, %v14349_v20  ;;  %v3112_v47 = vand.u32 4294901760, %v3111_v6  ;;  %6911 = vmatprep.subr.bf16.mxu0 %v6910_v23  ;;  %v14356_v13 = vand.u32 4294901760, %v14355_v28  ;;  %v14359_v53 = vld [vmem:[#allocation16_spill] sm:$0xff]  ;;  %v14361_v6 = vld [vmem:[#allocation102_spill] sm:$0xff]  ;;  %v14362_v23 = vld [vmem:[#allocation103_spill] sm:$0xff] }
 0x256   : > { %6663 = vmatprep.subr.bf16.mxu1 %v6662_v16  ;;  %v14360_v52 = vand.u32 4294901760, %v14359_v53  ;;  %v6918_v0 = vpack.c.bf16 %v14362_v23, %v14361_v6  ;;  %v14364_v1 = vand.u32 4294901760, %v14363_v36  ;;  %v14366_v7 = vand.u32 4294901760, %v14365_v18  ;;  %v14371_v15 = vld [vmem:[#allocation22_spill] sm:$0xff]  ;;  %v14373_v28 = vld [vmem:[#allocation137_spill] sm:$0xff]  ;;  %v14380_v36 = vld [vmem:[#allocation107_spill] sm:$0xff] }
 0x257   : > { %v6668_v16 = vpack.c.bf16 %v14356_v13, %v14354_v57  ;;  %v6916_v27 = vpack.c.bf16 %v3112_v47, %v3100_v34  ;;  %v14369_v34 = vld [vmem:[#allocation21_spill] sm:$0xff]  ;;  %v14372_v57 = vand.u32 4294901760, %v14371_v15  ;;  %v14374_v13 = vld [vmem:[#allocation138_spill] sm:$0xff] }
 0x258   : > { %2177 = vmatmul.mubr.f32.vlgmr.msra.gmra.mrb[0].mxu1 %v14352_v56  ;;  %6913 = vmatpush1.bf16.msra.mxu0 %v6912_v39  ;;  %v6670_v5 = vpack.c.bf16 %v14360_v52, %v14358_v40  ;;  %v14367_v39 = vld [vmem:[#allocation135_spill] sm:$0xff]  ;;  %v14370_v47 = vand.u32 4294901760, %v14369_v34  ;;  %v6922_v60 = vpack.c.bf16 %v14374_v13, %v14373_v28  ;;  %v14378_v52 = vld [vmem:[#allocation24_spill] sm:$0xff] }
 0x259   : > { %6665 = vmatpush1.bf16.msra.mxu1 %v6664_v21  ;;  %2440 = vmatprep.mubr.f32.mxu1 %v14218_v17  ;;  %v6672_v21 = vpack.c.bf16 %v14366_v7, %v14364_v1  ;;  %v14376_v40 = vld [vmem:[#allocation23_spill] sm:$0xff]  ;;  %v14383_v7 = vld [vmem:[#allocation28_spill] sm:$0xff] }
 0x25a   : > { %6667 = vmatprep.subr.bf16.mxu1 %v6666_v11  ;;  %6915 = vmatprep.subr.bf16.mxu0 %v6914_v50  ;;  %v14368_v11 = vld [vmem:[#allocation136_spill] sm:$0xff]  ;;  %v6674_v50 = vpack.c.bf16 %v14372_v57, %v14370_v47  ;;  %v14377_v53 = vand.u32 4294901760, %v14376_v40  ;;  %v14381_v1 = vld [vmem:[#allocation27_spill] sm:$0xff]  ;;  %v14384_v34 = vand.u32 4294901760, %v14383_v7  ;;  %v14386_v57 = vld [vmem:[#allocation30_spill] sm:$0xff] }
 0x25b   : > { %v6920_v20 = vpack.c.bf16 %v14368_v11, %v14367_v39  ;;  %v14382_v18 = vand.u32 4294901760, %v14381_v1  ;;  %v14387_v40 = vand.u32 4294901760, %v14386_v57  ;;  %v14392_v1 = vld [vmem:[#allocation32_spill] sm:$0xff]  ;;  %v14394_v7 = vld [vmem:[#allocation34_spill] sm:$0xff] }
 0x25c   : > { %6917 = vmatpush1.bf16.msra.mxu0 %v6916_v27  ;;  %v14379_v27 = vand.u32 4294901760, %v14378_v52  ;;  %v14398_v57 = vld [vmem:[#allocation36_spill] sm:$0xff] }
 0x25d   : > { %6669 = vmatpush1.bf16.msra.mxu1 %v6668_v16  ;;  %6919 = vmatprep.subr.bf16.mxu0 %v6918_v0  ;;  %v14375_v16 = vld [vmem:[#allocation104_spill] sm:$0xff]  ;;  %v6924_v0 = vpack.c.bf16 %v9836_v24, %v9831_v63  ;;  %v6678_v47 = vpack.c.bf16 %v14384_v34, %v14382_v18  ;;  %v14393_v63 = vand.u32 4294901760, %v14392_v1  ;;  %v14395_v18 = vand.u32 4294901760, %v14394_v7 }
 0x25e   : > { %6671 = vmatprep.subr.bf16.mxu1 %v6670_v5  ;;  %v6676_v5 = vpack.c.bf16 %v14379_v27, %v14377_v53  ;;  %v14388_v53 = vld [vmem:[#allocation31_spill] sm:$0xff]  ;;  %v14390_v27 = vld [vmem:[#allocation144_spill] sm:$0xff] }
 0x25f   : > { %3117 = vmatmul.mubr.f32.vlgmr.msra.gmra.mrb[4].mxu0 %v14375_v16  ;;  %v14402_v1 = vld [vmem:[#allocation40_spill] sm:$0xff] }
 0x260   : > { %6921 = vmatpush1.bf16.msra.mxu0 %v6920_v20  ;;  %3317 = vmatprep.mubr.f32.mxu0 %v14380_v36  ;;  %v14389_v20 = vand.u32 4294901760, %v14388_v53  ;;  %v14391_v36 = vld [vmem:[#allocation145_spill] sm:$0xff]  ;;  %v14399_v53 = vand.u32 4294901760, %v14398_v57  ;;  %v14403_v7 = vand.u32 4294901760, %v14402_v1 }
 0x261   : > { %6673 = vmatpush1.bf16.msra.mxu1 %v6672_v21  ;;  %6923 = vmatprep.subr.bf16.mxu0 %v6922_v60  ;;  %v14385_v21 = vld [vmem:[#allocation143_spill] sm:$0xff]  ;;  %v6928_v24 = vpack.c.bf16 %v14391_v36, %v14390_v27  ;;  %v6930_v60 = vpack.c.bf16 %v9908_v51, %v9893_v25 }
 0x262   : > { %6675 = vmatprep.subr.bf16.mxu1 %v6674_v50  ;;  %v6926_v15 = vpack.c.bf16 %v14385_v21, %v9841_v4  ;;  %v6680_v52 = vpack.c.bf16 %v14389_v20, %v14387_v40  ;;  %v6682_v50 = vpack.c.bf16 %v14395_v18, %v14393_v63  ;;  %v14405_v18 = vld [vmem:[#allocation154_spill] sm:$0xff]  ;;  %v14408_v25 = vld [vmem:[#allocation43_spill] sm:$0xff] }
 0x263   : > { %v14409_v57 = vand.u32 4294901760, %v14408_v25 }
 0x264   : > { %6925 = vmatpush1.bf16.msra.mxu0 %v6924_v0  ;;  %v6932_v0 = vpack.c.bf16 %v9918_v2, %v9913_v14 }
 0x265   : > { %6677 = vmatpush1.bf16.msra.mxu1 %v6676_v5  ;;  %6927 = vmatprep.subr.bf16.mxu0 %v6926_v15  ;;  %v14396_v5 = vld [vmem:[#allocation35_spill] sm:$0xff]  ;;  %v14404_v15 = vld [vmem:[#allocation149_spill] sm:$0xff] }
 0x266   : > { %6679 = vmatprep.subr.bf16.mxu1 %v6678_v47  ;;  %v14397_v34 = vand.u32 4294901760, %v14396_v5  ;;  %v14400_v47 = vld [vmem:[#allocation39_spill] sm:$0xff]  ;;  %v6934_v51 = vpack.c.bf16 %v14405_v18, %v14404_v15 }
 0x267   : > { %v14401_v20 = vand.u32 4294901760, %v14400_v47  ;;  %v14412_v47 = vld [vmem:[#allocation46_spill] sm:$0xff] }
 0x268   : > { %v6684_v40 = vpack.c.bf16 %v14399_v53, %v14397_v34  ;;  %6929 = vmatpush1.bf16.msra.mxu0 %v6928_v24  ;;  %v6936_v24 = vpack.c.bf16 %v9970_v59, %v9965_v41  ;;  %v14413_v1 = vand.u32 4294901760, %v14412_v47  ;;  %v14421_v59 = vld [vmem:[#allocation52_spill] sm:$0xff] }
 0x269   : > { %6681 = vmatpush1.bf16.msra.mxu1 %v6680_v52  ;;  %v6686_v63 = vpack.c.bf16 %v14403_v7, %v14401_v20  ;;  %6931 = vmatprep.subr.bf16.mxu0 %v6930_v60  ;;  %v14406_v52 = vld [vmem:[#allocation41_spill] sm:$0xff]  ;;  %v6938_v60 = vpack.c.bf16 %v9990_v8, %v9975_v42  ;;  %v14422_v47 = vand.u32 4294901760, %v14421_v59  ;;  %v14427_v42 = vld [vmem:[#allocation55_spill] sm:$0xff] }
 0x26a   : > { %6683 = vmatprep.subr.bf16.mxu1 %v6682_v50  ;;  %v14407_v5 = vand.u32 4294901760, %v14406_v52  ;;  %v14410_v50 = vld [vmem:[#allocation45_spill] sm:$0xff]  ;;  %v14416_v52 = vld [vmem:[#allocation48_spill] sm:$0xff] }
 0x26b   : > { %v14411_v53 = vand.u32 4294901760, %v14410_v50  ;;  %v14417_v25 = vand.u32 4294901760, %v14416_v52  ;;  %v14428_v52 = vand.u32 4294901760, %v14427_v42 }
 0x26c   : > { %v6688_v34 = vpack.c.bf16 %v14409_v57, %v14407_v5  ;;  %6933 = vmatpush1.bf16.msra.mxu0 %v6932_v0  ;;  %v14418_v0 = vld [vmem:[#allocation161_spill] sm:$0xff]  ;;  %v14419_v57 = vld [vmem:[#allocation51_spill] sm:$0xff] }
 0x26d   : > { %6685 = vmatpush1.bf16.msra.mxu1 %v6684_v40  ;;  %v6690_v20 = vpack.c.bf16 %v14413_v1, %v14411_v53  ;;  %6935 = vmatprep.subr.bf16.mxu0 %v6934_v51  ;;  %v14414_v40 = vld [vmem:[#allocation47_spill] sm:$0xff]  ;;  %v14420_v50 = vand.u32 4294901760, %v14419_v57  ;;  %v14423_v51 = vld [vmem:[#allocation162_spill] sm:$0xff] }
 0x26e   : > { %6687 = vmatprep.subr.bf16.mxu1 %v6686_v63  ;;  %v14415_v7 = vand.u32 4294901760, %v14414_v40  ;;  %v6940_v63 = vpack.c.bf16 %v14418_v0, %v9995_v48  ;;  %v14424_v1 = vld [vmem:[#allocation167_spill] sm:$0xff]  ;;  %v14431_v0 = vld [vmem:[#allocation57_spill] sm:$0xff]  ;;  %v14433_v48 = vld [vmem:[#allocation58_spill] sm:$0xff] }
 0x26f   : > { %v6694_v53 = vpack.c.bf16 %v14422_v47, %v14420_v50  ;;  %v6942_v8 = vpack.c.bf16 %v14424_v1, %v14423_v51  ;;  %v14432_v57 = vand.u32 4294901760, %v14431_v0  ;;  %v14434_v59 = vand.u32 4294901760, %v14433_v48  ;;  %v14436_v47 = vld [vmem:[#allocation173_spill] sm:$0xff] }
 0x270   : > { %v6692_v5 = vpack.c.bf16 %v14417_v25, %v14415_v7  ;;  %6937 = vmatpush1.bf16.msra.mxu0 %v6936_v24  ;;  %v14429_v24 = vld [vmem:[#allocation168_spill] sm:$0xff]  ;;  %v14439_v51 = vld [vmem:[#allocation61_spill] sm:$0xff] }
 0x271   : > { %6689 = vmatpush1.bf16.msra.mxu1 %v6688_v34  ;;  %6939 = vmatprep.subr.bf16.mxu0 %v6938_v60  ;;  %v14425_v34 = vld [vmem:[#allocation54_spill] sm:$0xff]  ;;  %v6698_v50 = vpack.c.bf16 %v14434_v59, %v14432_v57  ;;  %v14440_v42 = vand.u32 4294901760, %v14439_v51 }
 0x272   : > { %6691 = vmatprep.subr.bf16.mxu1 %v6690_v20  ;;  %v14426_v40 = vand.u32 4294901760, %v14425_v34  ;;  %v14430_v20 = vld [vmem:[#allocation169_spill] sm:$0xff]  ;;  %v14435_v60 = vld [vmem:[#allocation170_spill] sm:$0xff] }
 0x273   : > { %v6944_v25 = vpack.c.bf16 %v14430_v20, %v14429_v24  ;;  %v6946_v1 = vpack.c.bf16 %v14436_v47, %v14435_v60  ;;  %v14443_v20 = vld [vmem:[#allocation62_spill] sm:$0xff]  ;;  %v14445_v24 = vld [vmem:[#allocation64_spill] sm:$0xff] }
 0x274   : > { %v6696_v7 = vpack.c.bf16 %v14428_v52, %v14426_v40  ;;  %6941 = vmatpush1.bf16.msra.mxu0 %v6940_v63  ;;  %v14441_v63 = vld [vmem:[#allocation174_spill] sm:$0xff]  ;;  %v14444_v0 = vand.u32 4294901760, %v14443_v20  ;;  %v14446_v48 = vand.u32 4294901760, %v14445_v24 }
 0x275   : > { %6693 = vmatpush1.bf16.msra.mxu1 %v6692_v5  ;;  %6943 = vmatprep.subr.bf16.mxu0 %v6942_v8  ;;  %v14437_v5 = vld [vmem:[#allocation60_spill] sm:$0xff]  ;;  %v14447_v8 = vld [vmem:[#allocation125_spill] sm:$0xff]  ;;  %v14448_v59 = vld [vmem:[#allocation126_spill] sm:$0xff] }
 0x276   : > { %6695 = vmatprep.subr.bf16.mxu1 %v6694_v53  ;;  %v14438_v34 = vand.u32 4294901760, %v14437_v5  ;;  %v14442_v53 = vld [vmem:[#allocation124_spill] sm:$0xff]  ;;  %v6702_v57 = vpack.c.bf16 %v14446_v48, %v14444_v0  ;;  %v6950_v47 = vpack.c.bf16 %v14448_v59, %v14447_v8  ;;  %v14451_v60 = vld [vmem:[#allocation66_spill] sm:$0xff] }
 0x277   : > { %v6948_v52 = vpack.c.bf16 %v14442_v53, %v14441_v63  ;;  %v14452_v51 = vand.u32 4294901760, %v14451_v60  ;;  %v14460_v59 = vld [vmem:[#allocation72_spill] sm:$0xff] }
 0x278   : > { %v6700_v40 = vpack.c.bf16 %v14440_v42, %v14438_v34  ;;  %6945 = vmatpush1.bf16.msra.mxu0 %v6944_v25  ;;  %v6952_v25 = vpack.c.bf16 %v14262_v44, %v14261_v30  ;;  %v14455_v42 = vld [vmem:[#allocation70_spill] sm:$0xff]  ;;  %v14461_v60 = vand.u32 4294901760, %v14460_v59 }
 0x279   : > { %6697 = vmatpush1.bf16.msra.mxu1 %v6696_v7  ;;  %6947 = vmatprep.subr.bf16.mxu0 %v6946_v1  ;;  %v14449_v7 = vld [vmem:[#allocation65_spill] sm:$0xff]  ;;  %v14456_v24 = vand.u32 4294901760, %v14455_v42  ;;  %v14457_v1 = vld [vmem:[#allocation130_spill] sm:$0xff] }
 0x27a   : > { %6699 = vmatprep.subr.bf16.mxu1 %v6698_v50  ;;  %v14450_v5 = vand.u32 4294901760, %v14449_v7  ;;  %v14453_v50 = vld [vmem:[#allocation69_spill] sm:$0xff]  ;;  %v6954_v48 = vpack.c.bf16 %v14457_v1, %v14266_v46  ;;  %v14465_v44 = vld [vmem:[#allocation74_spill] sm:$0xff] }
 0x27b   : > { %v14454_v20 = vand.u32 4294901760, %v14453_v50  ;;  %v14466_v42 = vand.u32 4294901760, %v14465_v44 }
 0x27c   : > { %v6704_v34 = vpack.c.bf16 %v14452_v51, %v14450_v5  ;;  %6949 = vmatpush1.bf16.msra.mxu0 %v6948_v52  ;;  %v14462_v52 = vld [vmem:[#allocation182_spill] sm:$0xff]  ;;  %v14463_v51 = vld [vmem:[#allocation73_spill] sm:$0xff] }
 0x27d   : > { %6701 = vmatpush1.bf16.msra.mxu1 %v6700_v40  ;;  %v6706_v0 = vpack.c.bf16 %v14456_v24, %v14454_v20  ;;  %6951 = vmatprep.subr.bf16.mxu0 %v6950_v47  ;;  %v14458_v40 = vld [vmem:[#allocation71_spill] sm:$0xff]  ;;  %v14464_v50 = vand.u32 4294901760, %v14463_v51  ;;  %v6958_v47 = vpack.c.bf16 %v10286_v54, %v10245_v9 }
 0x27e   : > { %6703 = vmatprep.subr.bf16.mxu1 %v6702_v57  ;;  %v14459_v7 = vand.u32 4294901760, %v14458_v40  ;;  %v6956_v57 = vpack.c.bf16 %v14462_v52, %v10197_v49  ;;  %v14469_v40 = vld [vmem:[#allocation76_spill] sm:$0xff]  ;;  %v14474_v52 = vld [vmem:[#allocation78_spill] sm:$0xff] }
 0x27f   : > { %v6710_v20 = vpack.c.bf16 %v14466_v42, %v14464_v50  ;;  %v14470_v59 = vand.u32 4294901760, %v14469_v40  ;;  %v14475_v44 = vand.u32 4294901760, %v14474_v52 }
 0x280   : > { %v6708_v5 = vpack.c.bf16 %v14461_v60, %v14459_v7  ;;  %6953 = vmatpush1.bf16.msra.mxu0 %v6952_v25  ;;  %v14471_v25 = vld [vmem:[#allocation185_spill] sm:$0xff] }
 0x281   : > { %6705 = vmatpush1.bf16.msra.mxu1 %v6704_v34  ;;  %6955 = vmatprep.subr.bf16.mxu0 %v6954_v48  ;;  %v14467_v34 = vld [vmem:[#allocation75_spill] sm:$0xff]  ;;  %v14472_v60 = vld [vmem:[#allocation77_spill] sm:$0xff]  ;;  %v6962_v48 = vpack.c.bf16 %v10337_v19, %v10331_v55 }
 0x282   : > { %6707 = vmatprep.subr.bf16.mxu1 %v6706_v0  ;;  %v14468_v24 = vand.u32 4294901760, %v14467_v34  ;;  %v6960_v0 = vpack.c.bf16 %v10313_v37, %v14471_v25  ;;  %v14473_v51 = vand.u32 4294901760, %v14472_v60  ;;  %v14478_v34 = vld [vmem:[#allocation80_spill] sm:$0xff]  ;;  %v14482_v60 = vld [vmem:[#allocation85_spill] sm:$0xff] }
 0x283   : > { %v14479_v40 = vand.u32 4294901760, %v14478_v34  ;;  %v14483_v52 = vand.u32 4294901760, %v14482_v60 }
 0x284   : > { %v6712_v7 = vpack.c.bf16 %v14470_v59, %v14468_v24  ;;  %6957 = vmatpush1.bf16.msra.mxu0 %v6956_v57  ;;  %v6714_v50 = vpack.c.bf16 %v14475_v44, %v14473_v51  ;;  %v6964_v57 = vpack.c.bf16 %v10365_v35, %v10358_v29 }
 0x285   : > { %6709 = vmatpush1.bf16.msra.mxu1 %v6708_v5  ;;  %6959 = vmatprep.subr.bf16.mxu0 %v6958_v47  ;;  %v14476_v5 = vld [vmem:[#allocation79_spill] sm:$0xff]  ;;  %v6966_v47 = vpack.c.bf16 %v10401_v43, %v10370_v31 }
 0x286   : > { %6711 = vmatprep.subr.bf16.mxu1 %v6710_v20  ;;  %v14477_v42 = vand.u32 4294901760, %v14476_v5  ;;  %v14480_v20 = vld [vmem:[#allocation84_spill] sm:$0xff] }
 0x287   : > { %v14481_v59 = vand.u32 4294901760, %v14480_v20  ;;  %v14486_v5 = vld [vmem:[#allocation88_spill] sm:$0xff] }
 0x288   : > { %v6716_v24 = vpack.c.bf16 %v14479_v40, %v14477_v42  ;;  %6961 = vmatpush1.bf16.msra.mxu0 %v6960_v0  ;;  %v14487_v34 = vand.u32 4294901760, %v14486_v5  ;;  %v6968_v0 = vpack.c.bf16 %v10427_v22, %v10406_v61  ;;  %v14490_v20 = vld [vmem:[#allocation92_spill] sm:$0xff] }
 0x289   : > { %6713 = vmatpush1.bf16.msra.mxu1 %v6712_v7  ;;  %v6718_v51 = vpack.c.bf16 %v14483_v52, %v14481_v59  ;;  %6963 = vmatprep.subr.bf16.mxu0 %v6962_v48  ;;  %v14484_v7 = vld [vmem:[#allocation87_spill] sm:$0xff]  ;;  %v14491_v60 = vand.u32 4294901760, %v14490_v20  ;;  %v6970_v48 = vpack.c.bf16 %v10449_v58, %v10444_v62  ;;  %v14500_v20 = vld [vmem:[#allocation17_spill] sm:$0xff]  ;;  %v14586_v58 = vand.u32 4294901760, %v14368_v11 }
 0x28a   : > { %6715 = vmatprep.subr.bf16.mxu1 %v6714_v50  ;;  %v14485_v44 = vand.u32 4294901760, %v14484_v7  ;;  %v14488_v50 = vld [vmem:[#allocation90_spill] sm:$0xff]  ;;  %v14588_v11 = vand.u32 4294901760, %v14374_v13 }
 0x28b   : > { %v14489_v40 = vand.u32 4294901760, %v14488_v50  ;;  %v14494_v7 = vld [vmem:[#allocation94_spill] sm:$0xff] }
 0x28c   : > { %v6720_v42 = vpack.c.bf16 %v14487_v34, %v14485_v44  ;;  %6965 = vmatpush1.bf16.msra.mxu0 %v6964_v57  ;;  %v14495_v5 = vand.u32 4294901760, %v14494_v7  ;;  %v6972_v57 = vpack.c.bf16 %v10477_v38, %v10470_v33  ;;  %v6976_v34 = vpack.c.bf16 %v10551_v3, %v10510_v32  ;;  %v14498_v50 = vld [vmem:[#allocation190_spill] sm:$0xff]  ;;  %v11042_v33 = vld [vmem:[%s13070_s3 + $0x220] sm:$0xff] }
 0x28d   : > { %6717 = vmatpush1.bf16.msra.mxu1 %v6716_v24  ;;  %v6722_v59 = vpack.c.bf16 %v14491_v60, %v14489_v40  ;;  %6967 = vmatprep.subr.bf16.mxu0 %v6966_v47  ;;  %v14492_v24 = vld [vmem:[#allocation93_spill] sm:$0xff]  ;;  %v14501_v60 = vld [vmem:[#allocation191_spill] sm:$0xff]  ;;  %v14505_v7 = vld [vmem:[#allocation106_spill] sm:$0xff]  ;;  %v14599_v61 = vand.u32 4294901760, %v11042_v33 }
 0x28e   : > { %6719 = vmatprep.subr.bf16.mxu1 %v6718_v51  ;;  %v14493_v52 = vand.u32 4294901760, %v14492_v24  ;;  %v6974_v51 = vpack.c.bf16 %v10505_v12, %v10482_v45  ;;  %v14496_v47 = vld [vmem:[#allocation13_spill] sm:$0xff]  ;;  %v14571_v12 = vld [vmem:[#allocation110_spill] sm:$0xff] }
 0x28f   : > { %v14503_v24 = vld [vmem:[#allocation25_spill] sm:$0xff] }
 0x290   : > { %v6724_v44 = vpack.c.bf16 %v14495_v5, %v14493_v52  ;;  %6969 = vmatpush1.bf16.msra.mxu0 %v6968_v0  ;;  %v14499_v0 = vld [vmem:[#allocation14_spill] sm:$0xff]  ;;  %v14504_v52 = vld [vmem:[#allocation101_spill] sm:$0xff] }
 0x291   : > { %6721 = vmatpush1.bf16.msra.mxu1 %v6720_v42  ;;  %6971 = vmatprep.subr.bf16.mxu0 %v6970_v48  ;;  %v14497_v42 = vld [vmem:[#allocation189_spill] sm:$0xff]  ;;  %v14502_v48 = vld [vmem:[#allocation20_spill] sm:$0xff]  ;;  %v14506_v5 = vld [vmem:[#allocation26_spill] sm:$0xff] }
 0x292   : > { %6723 = vmatprep.subr.bf16.mxu1 %v6722_v59  ;;  %v6978_v40 = vpack.c.bf16 %v14498_v50, %v14497_v42  ;;  %v6980_v59 = vpack.c.bf16 %v10589_v10, %v14501_v60  ;;  %v14566_v50 = vld [vmem:[#allocation179_spill] sm:$0xff] }
 0x294   : > { %6973 = vmatpush1.bf16.msra.mxu0 %v6972_v57  ;;  %v14508_v57 = vld [vmem:[#allocation109_spill] sm:$0xff] }
 0x295   : > { %6725 = vmatpush1.bf16.msra.mxu1 %v6724_v44  ;;  %6975 = vmatprep.subr.bf16.mxu0 %v6974_v51  ;;  %v14507_v44 = vld [vmem:[#allocation111_spill] sm:$0xff]  ;;  %v14509_v51 = vld [vmem:[#allocation29_spill] sm:$0xff] }
 0x296   : > { %6727 = vmatprep.subr.bf16.mxu1 %v14496_v47  ;;  %v14510_v47 = vld [vmem:[#allocation113_spill] sm:$0xff] }
 0x298   : > { %2442 = vmatmul.mubr.f32.vlgmr.msra.gmra.mrb[0].mxu1 %v14375_v16  ;;  %6977 = vmatpush1.bf16.msra.mxu0 %v6976_v34  ;;  %v14511_v34 = vld [vmem:[#allocation33_spill] sm:$0xff] }
 0x299   : > { %6729 = vmatpush1.bf16.msra.mxu1 %v14499_v0  ;;  %2577 = vmatprep.mubr.f32.mxu1 %v14218_v17  ;;  %v14513_v0 = vld [vmem:[#allocation37_spill] sm:$0xff] }
 0x29a   : > { %6731 = vmatprep.subr.bf16.mxu1 %v14500_v20  ;;  %6979 = vmatprep.subr.bf16.mxu0 %v6978_v40  ;;  %v14512_v40 = vld [vmem:[#allocation114_spill] sm:$0xff]  ;;  %v14514_v20 = vld [vmem:[#allocation115_spill] sm:$0xff] }
 0x29c   : > { %6981 = vmatpush1.bf16.msra.mxu0 %v6980_v59  ;;  %v14515_v59 = vld [vmem:[#allocation38_spill] sm:$0xff] }
 0x29d   : > { %6733 = vmatpush1.bf16.msra.mxu1 %v14502_v48  ;;  %6983 = vmatprep.subr.bf16.mxu0 %v14504_v52  ;;  %v14516_v48 = vld [vmem:[#allocation116_spill] sm:$0xff] }
 0x29e   : > { %6735 = vmatprep.subr.bf16.mxu1 %v14503_v24  ;;  %v14517_v24 = vld [vmem:[#allocation42_spill] sm:$0xff] }
 0x29f   : > { %3320 = vmatmul.mubr.f32.vlgmr.msra.gmra.mrb[4].mxu0 %v14505_v7  ;;  %v14521_v7 = vld [vmem:[#allocation49_spill] sm:$0xff] }
 0x2a0   : > { %6985 = vmatpush1.bf16.msra.mxu0 %v14507_v44  ;;  %3457 = vmatprep.mubr.f32.mxu0 %v14508_v57  ;;  %v14519_v57 = vld [vmem:[#allocation44_spill] sm:$0xff] }
 0x2a1   : > { %6737 = vmatpush1.bf16.msra.mxu1 %v14506_v5  ;;  %6987 = vmatprep.subr.bf16.mxu0 %v14510_v47  ;;  %v14518_v5 = vld [vmem:[#allocation117_spill] sm:$0xff]  ;;  %v14559_v47 = vld [vmem:[#allocation99_spill] sm:$0xff] }
 0x2a2   : > { %6739 = vmatprep.subr.bf16.mxu1 %v14509_v51  ;;  %v14520_v51 = vld [vmem:[#allocation118_spill] sm:$0xff] }
 0x2a4   : > { %6989 = vmatpush1.bf16.msra.mxu0 %v14512_v40  ;;  %v14523_v40 = vld [vmem:[#allocation50_spill] sm:$0xff] }
 0x2a5   : > { %6741 = vmatpush1.bf16.msra.mxu1 %v14511_v34  ;;  %6991 = vmatprep.subr.bf16.mxu0 %v14514_v20  ;;  %v14522_v34 = vld [vmem:[#allocation119_spill] sm:$0xff]  ;;  %v14525_v20 = vld [vmem:[#allocation53_spill] sm:$0xff] }
 0x2a6   : > { %6743 = vmatprep.subr.bf16.mxu1 %v14513_v0  ;;  %v14524_v0 = vld [vmem:[#allocation120_spill] sm:$0xff] }
 0x2a8   : > { %6993 = vmatpush1.bf16.msra.mxu0 %v14516_v48  ;;  %v14527_v48 = vld [vmem:[#allocation121_spill] sm:$0xff] }
 0x2a9   : > { %6745 = vmatpush1.bf16.msra.mxu1 %v14515_v59  ;;  %6995 = vmatprep.subr.bf16.mxu0 %v14518_v5  ;;  %v10859_v59 = vpop.f32.mrb[2].mxu0  ;;  %v14529_v5 = vld [vmem:[#allocation56_spill] sm:$0xff] }
 0x2aa   : > { %6747 = vmatprep.subr.bf16.mxu1 %v14517_v24  ;;  %14526 = vst [vmem:[#allocation5_spill] sm:$0xff] %v10859_v59  ;;  %v10862_v24 = vpop.f32.mrb[3].mxu0  ;;  %v14537_v59 = vld [vmem:[#allocation68_spill] sm:$0xff] }
 0x2ab   : > { %14528 = vst [vmem:[#allocation6_spill] sm:$0xff] %v10862_v24  ;;  %v14539_v24 = vld [vmem:[#allocation81_spill] sm:$0xff] }
 0x2ac   : > { %6997 = vmatpush1.bf16.msra.mxu0 %v14520_v51  ;;  %v14531_v51 = vld [vmem:[#allocation59_spill] sm:$0xff] }
 0x2ad   : > { %6749 = vmatpush1.bf16.msra.mxu1 %v14519_v57  ;;  %6999 = vmatprep.subr.bf16.mxu0 %v14522_v34  ;;  %v14530_v57 = vld [vmem:[#allocation122_spill] sm:$0xff]  ;;  %v14533_v34 = vld [vmem:[#allocation63_spill] sm:$0xff] }
 0x2ae   : > { %6751 = vmatprep.subr.bf16.mxu1 %v14521_v7  ;;  %v14532_v7 = vld [vmem:[#allocation123_spill] sm:$0xff] }
 0x2b0   : > { %7001 = vmatpush1.bf16.msra.mxu0 %v14524_v0  ;;  %v14535_v0 = vld [vmem:[#allocation67_spill] sm:$0xff] }
 0x2b1   : > { %6753 = vmatpush1.bf16.msra.mxu1 %v14523_v40  ;;  %7003 = vmatprep.subr.bf16.mxu0 %v14527_v48  ;;  %v14534_v40 = vld [vmem:[#allocation127_spill] sm:$0xff] }
 0x2b2   : > { %6755 = vmatprep.subr.bf16.mxu1 %v14525_v20  ;;  %v14536_v20 = vld [vmem:[#allocation128_spill] sm:$0xff]  ;;  %v14538_v48 = vld [vmem:[#allocation131_spill] sm:$0xff] }
 0x2b4   : > { %7005 = vmatpush1.bf16.msra.mxu0 %v14530_v57  ;;  %v14541_v57 = vld [vmem:[#allocation82_spill] sm:$0xff] }
 0x2b5   : > { %6757 = vmatpush1.bf16.msra.mxu1 %v14529_v5  ;;  %7007 = vmatprep.subr.bf16.mxu0 %v14532_v7  ;;  %v14540_v5 = vld [vmem:[#allocation132_spill] sm:$0xff]  ;;  %v14543_v7 = vld [vmem:[#allocation83_spill] sm:$0xff] }
 0x2b6   : > { %6759 = vmatprep.subr.bf16.mxu1 %v14531_v51  ;;  %v14542_v51 = vld [vmem:[#allocation133_spill] sm:$0xff] }
 0x2b8   : > { %7009 = vmatpush1.bf16.msra.mxu0 %v14534_v40  ;;  %v14545_v40 = vld [vmem:[#allocation86_spill] sm:$0xff] }
 0x2b9   : > { %6761 = vmatpush1.bf16.msra.mxu1 %v14533_v34  ;;  %7011 = vmatprep.subr.bf16.mxu0 %v14536_v20  ;;  %v14544_v34 = vld [vmem:[#allocation134_spill] sm:$0xff]  ;;  %v14547_v20 = vld [vmem:[#allocation89_spill] sm:$0xff] }
 0x2ba   : > { %6763 = vmatprep.subr.bf16.mxu1 %v14535_v0  ;;  %v14546_v0 = vld [vmem:[#allocation141_spill] sm:$0xff] }
 0x2bc   : > { %7013 = vmatpush1.bf16.msra.mxu0 %v14538_v48  ;;  %v14549_v48 = vld [vmem:[#allocation91_spill] sm:$0xff] }
 0x2bd   : > { %6765 = vmatpush1.bf16.msra.mxu1 %v14537_v59  ;;  %7015 = vmatprep.subr.bf16.mxu0 %v14540_v5  ;;  %v14548_v59 = vld [vmem:[#allocation142_spill] sm:$0xff]  ;;  %v14551_v5 = vld [vmem:[#allocation95_spill] sm:$0xff] }
 0x2be   : > { %6767 = vmatprep.subr.bf16.mxu1 %v14539_v24  ;;  %v14550_v24 = vld [vmem:[#allocation150_spill] sm:$0xff] }
 0x2c0   : > { %7017 = vmatpush1.bf16.msra.mxu0 %v14542_v51  ;;  %v14558_v51 = vld [vmem:[#allocation175_spill] sm:$0xff] }
 0x2c1   : > { %6769 = vmatpush1.bf16.msra.mxu1 %v14541_v57  ;;  %7019 = vmatprep.subr.bf16.mxu0 %v14544_v34  ;;  %v14552_v57 = vld [vmem:[#allocation151_spill] sm:$0xff]  ;;  %v14556_v34 = vld [vmem:[#allocation164_spill] sm:$0xff] }
 0x2c2   : > { %6771 = vmatprep.subr.bf16.mxu1 %v14543_v7  ;;  %v10891_v7 = vld [vmem:[%s13070_s3 + $0x28] sm:$0xff] }
 0x2c4   : > { %7021 = vmatpush1.bf16.msra.mxu0 %v14546_v0  ;;  %v10911_v0 = vld [vmem:[%s13070_s3 + $0x58] sm:$0xff] }
 0x2c5   : > { %6773 = vmatpush1.bf16.msra.mxu1 %v14545_v40  ;;  %7023 = vmatprep.subr.bf16.mxu0 %v14548_v59  ;;  %v10896_v40 = vld [vmem:[%s13070_s3 + $0x60] sm:$0xff]  ;;  %v14564_v60 = vand.u32 4294901760, %v10911_v0 }
 0x2c6   : > { %6775 = vmatprep.subr.bf16.mxu1 %v14547_v20  ;;  %v14553_v20 = vld [vmem:[#allocation96_spill] sm:$0xff]  ;;  %v14554_v59 = vld [vmem:[#allocation163_spill] sm:$0xff]  ;;  %v14561_v44 = vand.u32 4294901760, %v10896_v40 }
 0x2c8   : > { %7025 = vmatpush1.bf16.msra.mxu0 %v14550_v24  ;;  %v10906_v24 = vld [vmem:[%s13070_s3 + $0x20] sm:$0xff] }
 0x2c9   : > { %6777 = vmatpush1.bf16.msra.mxu1 %v14549_v48  ;;  %7027 = vmatprep.subr.bf16.mxu0 %v14552_v57  ;;  %v14555_v48 = vld [vmem:[#allocation97_spill] sm:$0xff]  ;;  %v14557_v57 = vld [vmem:[#allocation98_spill] sm:$0xff] }
 0x2ca   : > { %6779 = vmatprep.subr.bf16.mxu1 %v14551_v5  ;;  %v13509_v5 = vand.u32 4294901760, %v10906_v24 }
 0x2cc   : > { %7029 = vmatpush1.bf16.msra.mxu0 %v14554_v59  ;;  %v10945_v59 = vld [vmem:[%s13070_s3 + $0xc8] sm:$0xff]  ;;  %v10963_v10 = vpack.c.bf16 %v14564_v60, %v13509_v5  ;;  %v10980_v60 = vld [vmem:[%s13070_s3 + $0x100] sm:$0xff]  ;;  %v10985_v5 = vld [vmem:[%s13070_s3 + $0x138] sm:$0xff] }
 0x2cd   : > { %6781 = vmatpush1.bf16.msra.mxu1 %v14553_v20  ;;  %7031 = vmatprep.subr.bf16.mxu0 %v14556_v34  ;;  %v10917_v20 = vld [vmem:[%s13070_s3 + $0x98] sm:$0xff]  ;;  %v14560_v34 = vand.u32 4294901760, %v10891_v7 }
 0x2ce   : > { %6783 = vmatprep.subr.bf16.mxu1 %v14555_v48  ;;  %v10922_v48 = vld [vmem:[%s13070_s3 + $0xd0] sm:$0xff]  ;;  %14565 = vst [vmem:[#allocation7_spill] sm:$0xff] %v10963_v10  ;;  %v14567_v42 = vand.u32 4294901760, %v10917_v20 }
 0x2cf   : > { %v10933_v52 = vpack.c.bf16 %v14561_v44, %v14560_v34  ;;  %v10951_v44 = vld [vmem:[%s13070_s3 + $0x108] sm:$0xff]  ;;  %v10956_v34 = vld [vmem:[%s13070_s3 + $0x140] sm:$0xff]  ;;  %v14568_v3 = vand.u32 4294901760, %v10922_v48  ;;  %v14641_v29 = vand.u32 4294901760, %v10922_v48 }
 0x2d0   : > { %7033 = vmatpush1.bf16.msra.mxu0 %v14558_v51  ;;  %v14570_v51 = vld [vmem:[#allocation180_spill] sm:$0xff]  ;;  %v14575_v45 = vand.u32 4294901760, %v10951_v44 }
 0x2d1   : > { %6785 = vmatpush1.bf16.msra.mxu1 %v14557_v57  ;;  %14562 = vst [vmem:[#allocation100_spill] sm:$0xff] %v10933_v52  ;;  %v10940_v57 = vld [vmem:[%s13070_s3 + $0x90] sm:$0xff]  ;;  %v10973_v32 = vpack.c.bf16 %v14568_v3, %v14567_v42  ;;  %v10992_v3 = vld [vmem:[%s13070_s3 + $0x178] sm:$0xff] }
 0x2d2   : > { %6787 = vmatprep.subr.bf16.mxu1 %v14559_v47  ;;  %v14563_v47 = vld [vmem:[#allocation176_spill] sm:$0xff]  ;;  %v10997_v42 = vld [vmem:[%s13070_s3 + $0x1b0] sm:$0xff] }
 0x2d3   : > { %7035 = vmatprep.subr.bf16.mxu0 %v14563_v47  ;;  %v13517_v47 = vand.u32 4294901760, %v10940_v57  ;;  %14569 = vst [vmem:[#allocation8_spill] sm:$0xff] %v10973_v32  ;;  %v14590_v22 = vand.u32 4294901760, %v10997_v42 }
 0x2d4   : > { %7037 = vmatpush1.bf16.msra.mxu0 %v14566_v50  ;;  %v14579_v50 = vand.u32 4294901760, %v14361_v6  ;;  %v14581_v6 = vand.u32 4294901760, %v10980_v60 }
 0x2d5   : > { %6789 = vmatpush1.bf16.msra.mxu1 %v14343_v26  ;;  %7039 = vmatprep.subr.bf16.mxu0 %v14570_v51  ;;  %v14572_v26 = vand.u32 4294901760, %v10945_v59  ;;  %v14580_v51 = vand.u32 4294901760, %v14362_v23  ;;  %v14582_v23 = vand.u32 4294901760, %v10985_v5 }
 0x2d6   : > { %7175 = vmatprep.subr.bf16.mxu1 %v10933_v52 }
 0x2d7   : > { %v11005_v52 = vpack.c.bf16 %v14572_v26, %v13517_v47  ;;  %v11025_v26 = vld [vmem:[%s13070_s3 + $0x1a8] sm:$0xff]  ;;  %v14578_v47 = vld [vmem:[#allocation183_spill] sm:$0xff] }
 0x2d8   : > { %2579 = vmatmul.mubr.f32.vlgmr.msra.gmra.mrb[0].mxu1 %v14375_v16  ;;  %v14574_v16 = vld [vmem:[#allocation181_spill] sm:$0xff] }
 0x2d9   : > { %7177 = vmatpush1.bf16.msra.mxu1 %v10963_v10  ;;  %4002 = vmatprep.mubr.f32.mxu1 %v14571_v12  ;;  %14573 = vst [vmem:[#allocation9_spill] sm:$0xff] %v11005_v52  ;;  %v14576_v10 = vand.u32 4294901760, %v10956_v34  ;;  %v11020_v12 = vld [vmem:[%s13070_s3 + $0x170] sm:$0xff] }
 0x2da   : > { %7041 = vmatpush1.bf16.msra.mxu0 %v14574_v16  ;;  %7179 = vmatprep.subr.bf16.mxu1 %v10973_v32  ;;  %v7046_v32 = vpack.c.bf16 %v14580_v51, %v14579_v50  ;;  %v11037_v16 = vld [vmem:[%s13070_s3 + $0x1e8] sm:$0xff]  ;;  %v11049_v50 = vpack.c.bf16 %v14582_v23, %v14581_v6  ;;  %v13533_v51 = vand.u32 4294901760, %v11020_v12  ;;  %v11064_v6 = vld [vmem:[%s13070_s3 + $0x1e0] sm:$0xff]  ;;  %v11069_v23 = vld [vmem:[%s13070_s3 + $0x218] sm:$0xff] }
 0x2db   : > { %v11015_v38 = vpack.c.bf16 %v14576_v10, %v14575_v45  ;;  %7043 = vmatprep.subr.bf16.mxu0 %v14578_v47  ;;  %v14584_v45 = vld [vmem:[#allocation184_spill] sm:$0xff]  ;;  %v14585_v47 = vand.u32 4294901760, %v14367_v39  ;;  %v14587_v39 = vand.u32 4294901760, %v14373_v28  ;;  %v11084_v10 = vld [vmem:[%s13070_s3 + $0x258] sm:$0xff]  ;;  %v14592_v28 = vand.u32 4294901760, %v11025_v26 }
 0x2dc   : > { %14583 = vst [vmem:[#allocation11_spill] sm:$0xff] %v11049_v50  ;;  %v13539_v13 = vand.u32 4294901760, %v11064_v6 }
 0x2dd   : > { %14577 = vst [vmem:[#allocation10_spill] sm:$0xff] %v11015_v38  ;;  %7181 = vmatpush1.bf16.msra.mxu1 %v11005_v52  ;;  %v7048_v62 = vpack.c.bf16 %v14586_v58, %v14585_v47  ;;  %v7050_v58 = vpack.c.bf16 %v14588_v11, %v14587_v39  ;;  %v14589_v47 = vand.u32 4294901760, %v10992_v3  ;;  %v13538_v39 = vand.u32 4294901760, %v11069_v23  ;;  %v14594_v11 = vld [vmem:[#allocation139_spill] sm:$0xff] }
 0x2de   : > { %7045 = vmatpush1.bf16.msra.mxu0 %v14584_v45  ;;  %7183 = vmatprep.subr.bf16.mxu1 %v11015_v38  ;;  %v14596_v38 = vld [vmem:[#allocation140_spill] sm:$0xff] }
 0x2df   : > { %7047 = vmatprep.subr.bf16.mxu0 %v7046_v32  ;;  %v11079_v52 = vpack.c.bf16 %v14590_v22, %v14589_v47  ;;  %v11089_v32 = vld [vmem:[%s13070_s3 + $0x290] sm:$0xff]  ;;  %v11097_v22 = vpack.c.bf16 %v14592_v28, %v13533_v51  ;;  %v14595_v47 = vand.u32 4294901760, %v14594_v11  ;;  %v14597_v45 = vand.u32 4294901760, %v14596_v38  ;;  %v11122_v38 = vld [vmem:[%s13070_s3 + $0x288] sm:$0xff] }
 0x2e0   : > { %v13540_v28 = vand.u32 4294901760, %v11084_v10  ;;  %v11132_v11 = vld [vmem:[%s13070_s3 + $0x2c8] sm:$0xff] }
 0x2e1   : > { %14591 = vst [vmem:[#allocation12_spill] sm:$0xff] %v11079_v52  ;;  %3461 = vmatmul.mubr.f32.vlgmr.msra.gmra.mrb[4].mxu0 %v14352_v56  ;;  %7185 = vmatpush1.bf16.msra.mxu1 %v11049_v50  ;;  %14593 = vst [vmem:[#allocation15_spill] sm:$0xff] %v11097_v22  ;;  %v7052_v56 = vpack.c.bf16 %v14597_v45, %v14595_v47  ;;  %v14598_v50 = vand.u32 4294901760, %v11037_v16  ;;  %v14602_v45 = vand.u32 4294901760, %v14385_v21  ;;  %v11137_v47 = vld [vmem:[%s13070_s3 + $0x300] sm:$0xff] }
 0x2e2   : > { %7049 = vmatpush1.bf16.msra.mxu0 %v7048_v62  ;;  %3724 = vmatprep.mubr.f32.mxu0 %v14218_v17  ;;  %v11117_v62 = vld [vmem:[%s13070_s3 + $0x250] sm:$0xff]  ;;  %v14616_v17 = vand.u32 4294901760, %v11137_v47 }
 0x2e3   : > { %v11110_v43 = vpack.c.bf16 %v14599_v61, %v14598_v50  ;;  %7051 = vmatprep.subr.bf16.mxu0 %v7050_v58  ;;  %7187 = vmatprep.subr.bf16.mxu1 %v11079_v52  ;;  %v14601_v61 = vand.u32 4294901760, %v9841_v4  ;;  %v11144_v4 = vpack.c.bf16 %v13538_v39, %v13539_v13  ;;  %v13548_v21 = vand.u32 4294901760, %v11117_v62  ;;  %v11178_v13 = vld [vmem:[%s13070_s3 + $0x338] sm:$0xff]  ;;  %v11183_v39 = vld [vmem:[%s13070_s3 + $0x370] sm:$0xff] }
 0x2e4   : > { %v13547_v58 = vand.u32 4294901760, %v11122_v38 }
 0x2e5   : > { %14600 = vst [vmem:[#allocation16_spill] sm:$0xff] %v11110_v43  ;;  %v7054_v50 = vpack.c.bf16 %v14602_v45, %v14601_v61  ;;  %7189 = vmatpush1.bf16.msra.mxu1 %v11097_v22  ;;  %14603 = vst [vmem:[#allocation102_spill] sm:$0xff] %v11144_v4  ;;  %v14604_v61 = vand.u32 4294901760, %v14390_v27  ;;  %v14605_v45 = vand.u32 4294901760, %v14391_v36  ;;  %v14606_v22 = vand.u32 4294901760, %v11089_v32  ;;  %v11169_v36 = vld [vmem:[%s13070_s3 + $0x2f8] sm:$0xff] }
 0x2e6   : > { %7053 = vmatpush1.bf16.msra.mxu0 %v7052_v56  ;;  %7191 = vmatprep.subr.bf16.mxu1 %v11110_v43  ;;  %v11164_v56 = vld [vmem:[%s13070_s3 + $0x2c0] sm:$0xff]  ;;  %v14608_v27 = vld [vmem:[#allocation146_spill] sm:$0xff] }
 0x2e7   : > { %v7056_v51 = vpack.c.bf16 %v14605_v45, %v14604_v61  ;;  %v11157_v52 = vpack.c.bf16 %v14606_v22, %v13540_v28  ;;  %7055 = vmatprep.subr.bf16.mxu0 %v7054_v50  ;;  %v14609_v61 = vand.u32 4294901760, %v14608_v27  ;;  %v14610_v45 = vld [vmem:[#allocation148_spill] sm:$0xff]  ;;  %v11190_v50 = vpack.c.bf16 %v13547_v58, %v13548_v21 }
 0x2e8   : > { %v14611_v22 = vand.u32 4294901760, %v14610_v45  ;;  %v13555_v27 = vand.u32 4294901760, %v11164_v56  ;;  %v14613_v45 = vand.u32 4294901760, %v9913_v14  ;;  %v11215_v14 = vld [vmem:[%s13070_s3 + $0x368] sm:$0xff] }
 0x2e9   : > { %14607 = vst [vmem:[#allocation103_spill] sm:$0xff] %v11157_v52  ;;  %7193 = vmatpush1.bf16.msra.mxu1 %v11144_v4  ;;  %14612 = vst [vmem:[#allocation18_spill] sm:$0xff] %v11190_v50  ;;  %v14615_v4 = vand.u32 4294901760, %v11132_v11 }
 0x2ea   : > { %v7058_v28 = vpack.c.bf16 %v14611_v22, %v14609_v61  ;;  %v13554_v61 = vand.u32 4294901760, %v11169_v36  ;;  %7057 = vmatpush1.bf16.msra.mxu0 %v7056_v51  ;;  %7195 = vmatprep.subr.bf16.mxu1 %v11157_v52  ;;  %v14614_v22 = vand.u32 4294901760, %v9918_v2  ;;  %v11210_v51 = vld [vmem:[%s13070_s3 + $0x330] sm:$0xff]  ;;  %v14618_v2 = vand.u32 4294901760, %v14404_v15 }
 0x2eb   : > { %v11203_v31 = vpack.c.bf16 %v14616_v17, %v14615_v4  ;;  %v14619_v17 = vand.u32 4294901760, %v14405_v18  ;;  %v14625_v52 = vand.u32 4294901760, %v11183_v39  ;;  %v11280_v18 = vld [vmem:[%s13070_s3 + $0x450] sm:$0xff] }
 0x2ec   : > { %v7060_v43 = vpack.c.bf16 %v14614_v22, %v14613_v45  ;;  %7059 = vmatprep.subr.bf16.mxu0 %v7058_v28  ;;  %v11224_v45 = vld [vmem:[%s13070_s3 + $0x3a8] sm:$0xff]  ;;  %v11229_v22 = vld [vmem:[%s13070_s3 + $0x3e0] sm:$0xff]  ;;  %v11236_v15 = vpack.c.bf16 %v13554_v61, %v13555_v27  ;;  %v11275_v28 = vld [vmem:[%s13070_s3 + $0x418] sm:$0xff] }
 0x2ed   : > { %14617 = vst [vmem:[#allocation19_spill] sm:$0xff] %v11203_v31  ;;  %v7062_v4 = vpack.c.bf16 %v14619_v17, %v14618_v2  ;;  %7197 = vmatpush1.bf16.msra.mxu1 %v11190_v50  ;;  %v14621_v2 = vand.u32 4294901760, %v9965_v41  ;;  %v14622_v17 = vld [vmem:[#allocation155_spill] sm:$0xff]  ;;  %v14624_v50 = vand.u32 4294901760, %v11178_v13  ;;  %v11261_v41 = vld [vmem:[%s13070_s3 + $0x3d8] sm:$0xff] }
 0x2ee   : > { %14620 = vst [vmem:[#allocation135_spill] sm:$0xff] %v11236_v15  ;;  %7061 = vmatpush1.bf16.msra.mxu0 %v7060_v43  ;;  %7199 = vmatprep.subr.bf16.mxu1 %v11203_v31  ;;  %v14623_v21 = vand.u32 4294901760, %v14622_v17  ;;  %v11256_v43 = vld [vmem:[%s13070_s3 + $0x3a0] sm:$0xff]  ;;  %v14633_v31 = vand.u32 4294901760, %v10896_v40 }
 0x2ef   : > { %v11249_v35 = vpack.c.bf16 %v14625_v52, %v14624_v50  ;;  %7063 = vmatprep.subr.bf16.mxu0 %v7062_v4  ;;  %v14629_v52 = vld [vmem:[#allocation156_spill] sm:$0xff]  ;;  %v14631_v17 = vld [vmem:[#allocation159_spill] sm:$0xff]  ;;  %v14635_v4 = vand.u32 4294901760, %v10906_v24 }
 0x2f0   : > { %v7064_v58 = vpack.c.bf16 %v14623_v21, %v14621_v2  ;;  %v14627_v21 = vand.u32 4294901760, %v10891_v7  ;;  %v14630_v50 = vand.u32 4294901760, %v14629_v52  ;;  %v14632_v27 = vand.u32 4294901760, %v14631_v17 }
 0x2f1   : > { %14626 = vst [vmem:[#allocation136_spill] sm:$0xff] %v11249_v35  ;;  %7201 = vmatpush1.bf16.msra.mxu1 %v11236_v15  ;;  %v14650_v15 = vand.u32 4294901760, %v11224_v45 }
 0x2f2   : > { %v11266_v2 = vsub.f32 %v10891_v7, %v14627_v21  ;;  %v7066_v61 = vpack.c.bf16 %v14632_v27, %v14630_v50  ;;  %v11285_v7 = vsub.f32 %v10896_v40, %v14633_v31  ;;  %v11290_v21 = vsub.f32 %v10906_v24, %v14635_v4  ;;  %7065 = vmatpush1.bf16.msra.mxu0 %v7064_v58  ;;  %v11332_v58 = vld [vmem:[%s13070_s3 + $0x410] sm:$0xff] }
 0x2f3   : > { %v14637_v27 = vand.u32 4294901760, %v10911_v0  ;;  %v14639_v50 = vand.u32 4294901760, %v10917_v20  ;;  %v11305_v31 = vsub.f32 %v10922_v48, %v14641_v29  ;;  %v14643_v24 = vand.u32 4294901760, %v11210_v51  ;;  %7203 = vmatprep.subr.bf16.mxu1 %v11249_v35 }
 0x2f4   : > { %14628 = vst [vmem:[#allocation21_spill] sm:$0xff] %v11266_v2  ;;  %14634 = vst [vmem:[#allocation22_spill] sm:$0xff] %v11285_v7  ;;  %v14644_v40 = vand.u32 4294901760, %v11215_v14  ;;  %7067 = vmatprep.subr.bf16.mxu0 %v7066_v61  ;;  %v14665_v61 = vand.u32 4294901760, %v10980_v60 }
 0x2f5   : > { %14636 = vst [vmem:[#allocation137_spill] sm:$0xff] %v11290_v21  ;;  %v11295_v52 = vsub.f32 %v10911_v0, %v14637_v27  ;;  %v11300_v17 = vsub.f32 %v10917_v20, %v14639_v50  ;;  %14642 = vst [vmem:[#allocation24_spill] sm:$0xff] %v11305_v31  ;;  %v14646_v20 = vld [vmem:[#allocation160_spill] sm:$0xff]  ;;  %v14651_v31 = vand.u32 4294901760, %v11229_v22  ;;  %v14661_v0 = vld [vmem:[#allocation167_spill] sm:$0xff] }
 0x2f6   : > { %v11312_v4 = vpack.c.bf16 %v14644_v40, %v14643_v24  ;;  %v14647_v50 = vand.u32 4294901760, %v14646_v20  ;;  %v14653_v20 = vand.u32 4294901760, %v10940_v57  ;;  %v14659_v24 = vld [vmem:[#allocation162_spill] sm:$0xff]  ;;  %v14662_v35 = vand.u32 4294901760, %v14661_v0 }
 0x2f7   : > { %14638 = vst [vmem:[#allocation138_spill] sm:$0xff] %v11295_v52  ;;  %14640 = vst [vmem:[#allocation23_spill] sm:$0xff] %v11300_v17  ;;  %v14648_v17 = vld [vmem:[#allocation161_spill] sm:$0xff]  ;;  %v11325_v52 = vpack.c.bf16 %v14651_v31, %v14650_v15  ;;  %v14655_v15 = vand.u32 4294901760, %v10945_v59  ;;  %v14660_v27 = vand.u32 4294901760, %v14659_v24  ;;  %v11376_v0 = vsub.f32 %v10980_v60, %v14665_v61 }
 0x2f8   : > { %14645 = vst [vmem:[#allocation27_spill] sm:$0xff] %v11312_v4  ;;  %v14649_v29 = vand.u32 4294901760, %v14648_v17  ;;  %v11337_v17 = vld [vmem:[%s13070_s3 + $0x448] sm:$0xff]  ;;  %v14669_v24 = vand.u32 4294901760, %v10992_v3  ;;  %7205 = vmatpush1.bf16.msra.mxu1 %v11312_v4  ;;  %v14673_v60 = vand.u32 4294901760, %v11256_v43  ;;  %v14680_v4 = vand.u32 4294901760, %v11275_v28 }
 0x2f9   : > { %14652 = vst [vmem:[#allocation28_spill] sm:$0xff] %v11325_v52  ;;  %v11347_v31 = vsub.f32 %v10945_v59, %v14655_v15  ;;  %v7070_v21 = vpack.c.bf16 %v14662_v35, %v14660_v27  ;;  %v11366_v59 = vld [vmem:[%s13070_s3 + $0x4c0] sm:$0xff]  ;;  %14666 = vst [vmem:[#allocation145_spill] sm:$0xff] %v11376_v0  ;;  %v14667_v35 = vand.u32 4294901760, %v10985_v5  ;;  %7207 = vmatprep.subr.bf16.mxu1 %v11325_v52 }
 0x2fa   : > { %v7068_v48 = vpack.c.bf16 %v14649_v29, %v14647_v50  ;;  %v11342_v50 = vsub.f32 %v10940_v57, %v14653_v20  ;;  %v14657_v29 = vand.u32 4294901760, %v10951_v44  ;;  %v11361_v57 = vld [vmem:[%s13070_s3 + $0x488] sm:$0xff]  ;;  %v14663_v20 = vand.u32 4294901760, %v10956_v34 }
 0x2fb   : > { %14656 = vst [vmem:[#allocation30_spill] sm:$0xff] %v11347_v31  ;;  %v11381_v27 = vsub.f32 %v10985_v5, %v14667_v35  ;;  %v11386_v15 = vsub.f32 %v10992_v3, %v14669_v24  ;;  %v14676_v3 = vld [vmem:[#allocation168_spill] sm:$0xff]  ;;  %v14691_v5 = vld [vmem:[#allocation173_spill] sm:$0xff] }
 0x2fc   : > { %14654 = vst [vmem:[#allocation143_spill] sm:$0xff] %v11342_v50  ;;  %v11352_v40 = vsub.f32 %v10951_v44, %v14657_v29  ;;  %v11371_v44 = vsub.f32 %v10956_v34, %v14663_v20  ;;  %v14671_v29 = vand.u32 4294901760, %v10997_v42  ;;  %v14674_v20 = vand.u32 4294901760, %v11261_v41  ;;  %7069 = vmatpush1.bf16.msra.mxu0 %v7068_v48  ;;  %v11418_v48 = vld [vmem:[%s13070_s3 + $0x480] sm:$0xff] }
 0x2fd   : > { %14668 = vst [vmem:[#allocation32_spill] sm:$0xff] %v11381_v27  ;;  %14670 = vst [vmem:[#allocation34_spill] sm:$0xff] %v11386_v15  ;;  %v14677_v24 = vand.u32 4294901760, %v14676_v3  ;;  %v14678_v15 = vld [vmem:[#allocation169_spill] sm:$0xff]  ;;  %v14683_v3 = vand.u32 4294901760, %v11020_v12  ;;  %7071 = vmatprep.subr.bf16.mxu0 %v7070_v21  ;;  %v14692_v52 = vand.u32 4294901760, %v14691_v5 }
 0x2fe   : > { %14658 = vst [vmem:[#allocation31_spill] sm:$0xff] %v11352_v40  ;;  %14664 = vst [vmem:[#allocation144_spill] sm:$0xff] %v11371_v44  ;;  %v11391_v34 = vsub.f32 %v10997_v42, %v14671_v29  ;;  %v11398_v61 = vpack.c.bf16 %v14674_v20, %v14673_v60  ;;  %v14679_v42 = vand.u32 4294901760, %v14678_v15  ;;  %v11423_v15 = vld [vmem:[%s13070_s3 + $0x4b8] sm:$0xff]  ;;  %v14695_v21 = vand.u32 4294901760, %v11064_v6 }
 0x2ff   : > { %v14689_v60 = vld [vmem:[#allocation170_spill] sm:$0xff] }
 0x300   : > { %14672 = vst [vmem:[#allocation35_spill] sm:$0xff] %v11391_v34  ;;  %14675 = vst [vmem:[#allocation36_spill] sm:$0xff] %v11398_v61  ;;  %v7072_v29 = vpack.c.bf16 %v14679_v42, %v14677_v24  ;;  %v14681_v34 = vand.u32 4294901760, %v11280_v18  ;;  %v11428_v24 = vsub.f32 %v11020_v12, %v14683_v3  ;;  %v14687_v42 = vand.u32 4294901760, %v11037_v16  ;;  %v11447_v12 = vld [vmem:[%s13070_s3 + $0x4f8] sm:$0xff]  ;;  %7209 = vmatpush1.bf16.msra.mxu1 %v11398_v61 }
 0x301   : > { %v14690_v35 = vand.u32 4294901760, %v14689_v60  ;;  %v14693_v3 = vand.u32 4294901760, %v11042_v33  ;;  %v11462_v5 = vsub.f32 %v11064_v6, %v14695_v21  ;;  %v14699_v60 = vand.u32 4294901760, %v11084_v10 }
 0x302   : > { %v11411_v27 = vpack.c.bf16 %v14681_v34, %v14680_v4  ;;  %14684 = vst [vmem:[#allocation40_spill] sm:$0xff] %v11428_v24  ;;  %v14685_v4 = vand.u32 4294901760, %v11025_v26  ;;  %v11438_v20 = vsub.f32 %v11037_v16, %v14687_v42  ;;  %v14701_v42 = vand.u32 4294901760, %v11089_v32  ;;  %7073 = vmatpush1.bf16.msra.mxu0 %v7072_v29  ;;  %v11504_v29 = vld [vmem:[%s13070_s3 + $0x4f0] sm:$0xff] }
 0x303   : > { %v7074_v0 = vpack.c.bf16 %v14692_v52, %v14690_v35  ;;  %v11457_v16 = vsub.f32 %v11042_v33, %v14693_v3  ;;  %14696 = vst [vmem:[#allocation43_spill] sm:$0xff] %v11462_v5  ;;  %v14697_v52 = vand.u32 4294901760, %v11069_v23  ;;  %v14703_v6 = vand.u32 4294901760, %v11332_v58 }
 0x304   : > { %14682 = vst [vmem:[#allocation39_spill] sm:$0xff] %v11411_v27  ;;  %v11433_v34 = vsub.f32 %v11025_v26, %v14685_v4  ;;  %14688 = vst [vmem:[#allocation154_spill] sm:$0xff] %v11438_v20  ;;  %v11452_v26 = vld [vmem:[%s13070_s3 + $0x530] sm:$0xff]  ;;  %v11472_v4 = vsub.f32 %v11084_v10, %v14699_v60  ;;  %v11477_v33 = vsub.f32 %v11089_v32, %v14701_v42  ;;  %v14704_v3 = vand.u32 4294901760, %v11337_v17 }
 0x305   : > { %14694 = vst [vmem:[#allocation41_spill] sm:$0xff] %v11457_v16  ;;  %v11467_v35 = vsub.f32 %v11069_v23, %v14697_v52  ;;  %7211 = vmatprep.subr.bf16.mxu1 %v11411_v27  ;;  %v14706_v10 = vand.u32 4294901760, %v14441_v63  ;;  %v14707_v32 = vand.u32 4294901760, %v14442_v53  ;;  %v14708_v42 = vand.u32 4294901760, %v11361_v57  ;;  %v11509_v63 = vld [vmem:[%s13070_s3 + $0x528] sm:$0xff]  ;;  %7075 = vmatprep.subr.bf16.mxu0 %v7074_v0  ;;  %v14718_v52 = vld [vmem:[#allocation126_spill] sm:$0xff] }
 0x306   : > { %14686 = vst [vmem:[#allocation149_spill] sm:$0xff] %v11433_v34  ;;  %14700 = vst [vmem:[#allocation46_spill] sm:$0xff] %v11472_v4  ;;  %v11484_v21 = vpack.c.bf16 %v14704_v3, %v14703_v6  ;;  %v14709_v61 = vand.u32 4294901760, %v11366_v59  ;;  %v14711_v53 = vand.u32 4294901760, %v11117_v62  ;;  %v14717_v6 = vand.u32 4294901760, %v14447_v8 }
 0x307   : > { %14698 = vst [vmem:[#allocation45_spill] sm:$0xff] %v11467_v35  ;;  %14702 = vst [vmem:[#allocation47_spill] sm:$0xff] %v11477_v33  ;;  %v7076_v60 = vpack.c.bf16 %v14707_v32, %v14706_v10  ;;  %v14719_v23 = vand.u32 4294901760, %v14718_v52  ;;  %v14722_v8 = vand.u32 4294901760, %v11164_v56 }
 0x308   : > { %14705 = vst [vmem:[#allocation48_spill] sm:$0xff] %v11484_v21  ;;  %v11497_v33 = vpack.c.bf16 %v14709_v61, %v14708_v42  ;;  %v11514_v10 = vsub.f32 %v11117_v62, %v14711_v53  ;;  %v14713_v61 = vand.u32 4294901760, %v11122_v38  ;;  %v14715_v42 = vand.u32 4294901760, %v11132_v11  ;;  %v11533_v62 = vld [vmem:[%s13070_s3 + $0x568] sm:$0xff]  ;;  %7213 = vmatpush1.bf16.msra.mxu1 %v11484_v21 }
 0x309   : > { %v7078_v27 = vpack.c.bf16 %v14719_v23, %v14717_v6  ;;  %v14720_v53 = vand.u32 4294901760, %v11137_v47  ;;  %v11548_v0 = vsub.f32 %v11164_v56, %v14722_v8  ;;  %v14724_v23 = vand.u32 4294901760, %v11169_v36  ;;  %7077 = vmatpush1.bf16.msra.mxu0 %v7076_v60 }
 0x30a   : > { %14710 = vst [vmem:[#allocation51_spill] sm:$0xff] %v11497_v33  ;;  %14712 = vst [vmem:[#allocation52_spill] sm:$0xff] %v11514_v10  ;;  %v11519_v32 = vsub.f32 %v11122_v38, %v14713_v61  ;;  %v11524_v3 = vsub.f32 %v11132_v11, %v14715_v42  ;;  %v11538_v38 = vld [vmem:[%s13070_s3 + $0x5a0] sm:$0xff]  ;;  %v14726_v6 = vand.u32 4294901760, %v11178_v13  ;;  %v14728_v42 = vand.u32 4294901760, %v11183_v39  ;;  %7215 = vmatprep.subr.bf16.mxu1 %v11497_v33 }
 0x30b   : > { %v11543_v11 = vsub.f32 %v11137_v47, %v14720_v53  ;;  %14723 = vst [vmem:[#allocation58_spill] sm:$0xff] %v11548_v0  ;;  %v11553_v52 = vsub.f32 %v11169_v36, %v14724_v23  ;;  %v14730_v56 = vand.u32 4294901760, %v11418_v48  ;;  %v14731_v53 = vand.u32 4294901760, %v11423_v15  ;;  %7079 = vmatprep.subr.bf16.mxu0 %v7078_v27 }
 0x30c   : > { %14714 = vst [vmem:[#allocation54_spill] sm:$0xff] %v11519_v32  ;;  %14716 = vst [vmem:[#allocation55_spill] sm:$0xff] %v11524_v3  ;;  %v11558_v61 = vsub.f32 %v11178_v13, %v14726_v6  ;;  %v11563_v47 = vsub.f32 %v11183_v39, %v14728_v42  ;;  %v11577_v13 = vld [vmem:[%s13070_s3 + $0x560] sm:$0xff]  ;;  %v11582_v39 = vld [vmem:[%s13070_s3 + $0x598] sm:$0xff]  ;;  %v14733_v6 = vand.u32 4294901760, %v14261_v30  ;;  %v14736_v23 = vand.u32 4294901760, %v11447_v12 }
 0x30d   : > { %14721 = vst [vmem:[#allocation57_spill] sm:$0xff] %v11543_v11  ;;  %14725 = vst [vmem:[#allocation60_spill] sm:$0xff] %v11553_v52  ;;  %v11570_v8 = vpack.c.bf16 %v14731_v53, %v14730_v56  ;;  %v14734_v42 = vld [vmem:[#allocation129_spill] sm:$0xff]  ;;  %v14737_v36 = vand.u32 4294901760, %v11452_v26  ;;  %v14739_v52 = vand.u32 4294901760, %v11210_v51  ;;  %v14741_v30 = vand.u32 4294901760, %v11215_v14 }
 0x30e   : > { %14727 = vst [vmem:[#allocation61_spill] sm:$0xff] %v11558_v61  ;;  %14729 = vst [vmem:[#allocation174_spill] sm:$0xff] %v11563_v47  ;;  %v14735_v56 = vand.u32 4294901760, %v14734_v42  ;;  %v14763_v27 = vand.u32 4294901760, %v11533_v62  ;;  %v14774_v33 = vand.u32 4294901760, %v10286_v54 }
 0x30f   : > { %14732 = vst [vmem:[#allocation124_spill] sm:$0xff] %v11570_v8  ;;  %v11593_v21 = vpack.c.bf16 %v14737_v36, %v14736_v23  ;;  %v11600_v60 = vsub.f32 %v11210_v51, %v14739_v52  ;;  %v11605_v42 = vsub.f32 %v11215_v14, %v14741_v30  ;;  %v14745_v36 = vand.u32 4294901760, %v14266_v46  ;;  %v11619_v51 = vld [vmem:[%s13070_s3 + $0x5d8] sm:$0xff]  ;;  %v11624_v14 = vld [vmem:[%s13070_s3 + $0x610] sm:$0xff]  ;;  %7217 = vmatpush1.bf16.msra.mxu1 %v11570_v8 }
 0x310   : > { %v7080_v53 = vpack.c.bf16 %v14735_v56, %v14733_v6  ;;  %v14743_v6 = vand.u32 4294901760, %v11224_v45  ;;  %v14746_v23 = vand.u32 4294901760, %v14457_v1  ;;  %v14747_v52 = vand.u32 4294901760, %v11229_v22 }
 0x311   : > { %14738 = vst [vmem:[#allocation62_spill] sm:$0xff] %v11593_v21  ;;  %14740 = vst [vmem:[#allocation64_spill] sm:$0xff] %v11600_v60  ;;  %v14749_v46 = vand.u32 4294901760, %v11256_v43  ;;  %7219 = vmatprep.subr.bf16.mxu1 %v11593_v21 }
 0x312   : > { %14742 = vst [vmem:[#allocation125_spill] sm:$0xff] %v11605_v42  ;;  %v11610_v56 = vsub.f32 %v11224_v45, %v14743_v6  ;;  %v7082_v61 = vpack.c.bf16 %v14746_v23, %v14745_v36  ;;  %v11629_v45 = vsub.f32 %v11229_v22, %v14747_v52  ;;  %v14751_v6 = vand.u32 4294901760, %v11261_v41  ;;  %7081 = vmatpush1.bf16.msra.mxu0 %v7080_v53  ;;  %v11676_v53 = vld [vmem:[%s13070_s3 + $0x5d0] sm:$0xff] }
 0x313   : > { %v11634_v1 = vsub.f32 %v11256_v43, %v14749_v46  ;;  %v14753_v23 = vand.u32 4294901760, %v11275_v28  ;;  %v14755_v22 = vand.u32 4294901760, %v11280_v18  ;;  %v14757_v43 = vand.u32 4294901760, %v11504_v29 }
 0x314   : > { %14744 = vst [vmem:[#allocation65_spill] sm:$0xff] %v11610_v56  ;;  %14748 = vst [vmem:[#allocation66_spill] sm:$0xff] %v11629_v45  ;;  %v11641_v36 = vsub.f32 %v11261_v41, %v14751_v6  ;;  %v14758_v46 = vand.u32 4294901760, %v11509_v63  ;;  %v14760_v41 = vand.u32 4294901760, %v10197_v49  ;;  %v11681_v49 = vld [vmem:[%s13070_s3 + $0x608] sm:$0xff]  ;;  %7083 = vmatprep.subr.bf16.mxu0 %v7082_v61 }
 0x315   : > { %14750 = vst [vmem:[#allocation69_spill] sm:$0xff] %v11634_v1  ;;  %v11646_v47 = vsub.f32 %v11275_v28, %v14753_v23  ;;  %v11651_v52 = vsub.f32 %v11280_v18, %v14755_v22  ;;  %v14761_v28 = vld [vmem:[#allocation182_spill] sm:$0xff]  ;;  %v14764_v18 = vand.u32 4294901760, %v11538_v38  ;;  %14766 = vst [vmem:[#allocation74_spill] sm:$0xff] %v11681_v49 }
 0x316   : > { %14752 = vst [vmem:[#allocation70_spill] sm:$0xff] %v11641_v36  ;;  %v11658_v30 = vpack.c.bf16 %v14758_v46, %v14757_v43  ;;  %v14762_v6 = vand.u32 4294901760, %v14761_v28  ;;  %v14767_v43 = vand.u32 4294901760, %v11332_v58  ;;  %v14771_v28 = vand.u32 4294901760, %v11361_v57 }
 0x317   : > { %14754 = vst [vmem:[#allocation130_spill] sm:$0xff] %v11646_v47  ;;  %14756 = vst [vmem:[#allocation71_spill] sm:$0xff] %v11651_v52  ;;  %v11669_v22 = vpack.c.bf16 %v14764_v18, %v14763_v27  ;;  %v14769_v27 = vand.u32 4294901760, %v11337_v17  ;;  %v14773_v18 = vand.u32 4294901760, %v10245_v9  ;;  %v14779_v9 = vand.u32 4294901760, %v11418_v48 }
 0x318   : > { %14759 = vst [vmem:[#allocation72_spill] sm:$0xff] %v11658_v30  ;;  %v7084_v23 = vpack.c.bf16 %v14762_v6, %v14760_v41  ;;  %v11686_v46 = vsub.f32 %v11332_v58, %v14767_v43  ;;  %v11696_v6 = vsub.f32 %v11361_v57, %v14771_v28  ;;  %v11705_v58 = vld [vmem:[%s13070_s3 + $0x648] sm:$0xff]  ;;  %v14777_v43 = vand.u32 4294901760, %v11366_v59  ;;  %7221 = vmatpush1.bf16.msra.mxu1 %v11658_v30 }
 0x319   : > { %14765 = vst [vmem:[#allocation73_spill] sm:$0xff] %v11669_v22  ;;  %v11691_v41 = vsub.f32 %v11337_v17, %v14769_v27  ;;  %v7086_v8 = vpack.c.bf16 %v14774_v33, %v14773_v18  ;;  %14775 = vst [vmem:[#allocation77_spill] sm:$0xff] %v11705_v58  ;;  %v11710_v17 = vld [vmem:[%s13070_s3 + $0x680] sm:$0xff]  ;;  %v11720_v54 = vsub.f32 %v11418_v48, %v14779_v9  ;;  %v14781_v33 = vand.u32 4294901760, %v11423_v15 }
 0x31a   : > { %14768 = vst [vmem:[#allocation75_spill] sm:$0xff] %v11686_v46  ;;  %14772 = vst [vmem:[#allocation185_spill] sm:$0xff] %v11696_v6  ;;  %v11715_v57 = vsub.f32 %v11366_v59, %v14777_v43  ;;  %v14783_v27 = vand.u32 4294901760, %v11577_v13  ;;  %v14784_v28 = vand.u32 4294901760, %v11582_v39  ;;  %v11739_v48 = vld [vmem:[%s13070_s3 + $0x640] sm:$0xff]  ;;  %7085 = vmatpush1.bf16.msra.mxu0 %v7084_v23  ;;  %7223 = vmatprep.subr.bf16.mxu1 %v11669_v22  ;;  %v14790_v59 = vand.u32 4294901760, %v11619_v51 }
 0x31b   : > { %14770 = vst [vmem:[#allocation76_spill] sm:$0xff] %v11691_v41  ;;  %14776 = vst [vmem:[#allocation78_spill] sm:$0xff] %v11710_v17  ;;  %v11725_v61 = vsub.f32 %v11423_v15, %v14781_v33  ;;  %v11744_v15 = vld [vmem:[%s13070_s3 + $0x678] sm:$0xff]  ;;  %v14791_v30 = vand.u32 4294901760, %v11624_v14  ;;  %7087 = vmatprep.subr.bf16.mxu0 %v7086_v8  ;;  %v14793_v23 = vand.u32 4294901760, %v10331_v55  ;;  %v14794_v33 = vand.u32 4294901760, %v10337_v19 }
 0x31c   : > { %14778 = vst [vmem:[#allocation79_spill] sm:$0xff] %v11715_v57  ;;  %14780 = vst [vmem:[#allocation80_spill] sm:$0xff] %v11720_v54  ;;  %v11731_v18 = vpack.c.bf16 %v14784_v28, %v14783_v27  ;;  %v14788_v27 = vand.u32 4294901760, %v14471_v25  ;;  %v14789_v28 = vand.u32 4294901760, %v10313_v37  ;;  %v11768_v37 = vld [vmem:[%s13070_s3 + $0x6b8] sm:$0xff]  ;;  %v11773_v25 = vld [vmem:[%s13070_s3 + $0x6f0] sm:$0xff] }
 0x31d   : > { %14782 = vst [vmem:[#allocation84_spill] sm:$0xff] %v11725_v61  ;;  %14786 = vst [vmem:[#allocation87_spill] sm:$0xff] %v11739_v48  ;;  %v11757_v21 = vpack.c.bf16 %v14791_v30, %v14790_v59  ;;  %v7090_v22 = vpack.c.bf16 %v14794_v33, %v14793_v23  ;;  %v14797_v30 = vld [vmem:[#allocation137_spill] sm:$0xff]  ;;  %v14799_v8 = vld [vmem:[#allocation23_spill] sm:$0xff]  ;;  %v14800_v55 = vand.u32 4294901760, %v11447_v12  ;;  %v14803_v57 = vand.u32 4294901760, %v11452_v26 }
 0x31e   : > { %14785 = vst [vmem:[#allocation85_spill] sm:$0xff] %v11731_v18  ;;  %14787 = vst [vmem:[#allocation88_spill] sm:$0xff] %v11744_v15  ;;  %v7088_v43 = vpack.c.bf16 %v14789_v28, %v14788_v27  ;;  %v14798_v27 = vld [vmem:[#allocation138_spill] sm:$0xff]  ;;  %v14802_v61 = vld [vmem:[#allocation24_spill] sm:$0xff]  ;;  %7225 = vmatpush1.bf16.msra.mxu1 %v11731_v18  ;;  %v14805_v9 = vand.u32 4294901760, %v11676_v53  ;;  %v14806_v28 = vand.u32 4294901760, %v11681_v49 }
 0x31f   : > { %14792 = vst [vmem:[#allocation90_spill] sm:$0xff] %v11757_v21  ;;  %14795 = vst [vmem:[#allocation92_spill] sm:$0xff] %v11768_v37  ;;  %v11781_v19 = vsub.f32 %v11447_v12, %v14800_v55  ;;  %v11789_v6 = vsub.f32 %v11452_v26, %v14803_v57  ;;  %v14808_v12 = vand.u32 4294901760, %v11266_v2  ;;  %v14809_v23 = vand.u32 4294901760, %v11285_v7  ;;  %7227 = vmatprep.subr.bf16.mxu1 %v11757_v21  ;;  %v14810_v26 = vld [vmem:[#allocation186_spill] sm:$0xff]  ;;  %v14812_v33 = vld [vmem:[#allocation187_spill] sm:$0xff] }
 0x320   : > { %14796 = vst [vmem:[#allocation93_spill] sm:$0xff] %v11773_v25  ;;  %v11796_v59 = vpack.c.bf16 %v14806_v28, %v14805_v9  ;;  %7089 = vmatpush1.bf16.msra.mxu0 %v7088_v43  ;;  %v14811_v57 = vand.u32 4294901760, %v14810_v26  ;;  %v14813_v18 = vand.u32 4294901760, %v14812_v33  ;;  %v14815_v9 = vand.u32 4294901760, %v11710_v17  ;;  %v11820_v43 = vld [vmem:[%s13070_s3 + $0x6b0] sm:$0xff]  ;;  %v11825_v33 = vld [vmem:[%s13070_s3 + $0x6e8] sm:$0xff] }
 0x321   : > { %14801 = vst [vmem:[#allocation94_spill] sm:$0xff] %v11781_v19  ;;  %14804 = vst [vmem:[#allocation13_spill] sm:$0xff] %v11789_v6  ;;  %v4017_v55 = vsub.f32 %v11266_v2, %v14808_v12  ;;  %v4029_v54 = vsub.f32 %v11285_v7, %v14809_v23  ;;  %v14814_v19 = vand.u32 4294901760, %v11705_v58  ;;  %7091 = vmatprep.subr.bf16.mxu0 %v7090_v22  ;;  %v14821_v26 = vld [vmem:[#allocation147_spill] sm:$0xff]  ;;  %v14824_v12 = vand.u32 4294901760, %v14798_v27 }
 0x322   : > { %14807 = vst [vmem:[#allocation14_spill] sm:$0xff] %v11796_v59  ;;  %v7092_v6 = vpack.c.bf16 %v14813_v18, %v14811_v57  ;;  %14817 = vst [vmem:[#allocation20_spill] sm:$0xff] %v11820_v43  ;;  %v14819_v18 = vld [vmem:[#allocation188_spill] sm:$0xff]  ;;  %v14825_v7 = vand.u32 4294901760, %v14799_v8  ;;  %v14826_v58 = vand.u32 4294901760, %v11739_v48  ;;  %v14827_v22 = vand.u32 4294901760, %v11744_v15  ;;  %7229 = vmatpush1.bf16.msra.mxu1 %v11796_v59 }
 0x323   : > { %v11813_v28 = vpack.c.bf16 %v14815_v9, %v14814_v19  ;;  %14818 = vst [vmem:[#allocation25_spill] sm:$0xff] %v11825_v33  ;;  %v14820_v23 = vand.u32 4294901760, %v14819_v18  ;;  %v14822_v19 = vand.u32 4294901760, %v14821_v26  ;;  %v14823_v9 = vand.u32 4294901760, %v14797_v30 }
 0x324   : > { %v4035_v21 = vsub.f32 %v14798_v27, %v14824_v12  ;;  %v4041_v17 = vsub.f32 %v14799_v8, %v14825_v7  ;;  %v11844_v18 = vpack.c.bf16 %v14827_v22, %v14826_v58  ;;  %v4018_v8 = vand.u32 4294901760, %v4017_v55  ;;  %7093 = vmatpush1.bf16.msra.mxu0 %v7092_v6  ;;  %v14830_v58 = vld [vmem:[#allocation152_spill] sm:$0xff]  ;;  %v14839_v55 = vld [vmem:[#allocation178_spill] sm:$0xff]  ;;  %v14843_v12 = vld [vmem:[#allocation145_spill] sm:$0xff] }
 0x325   : > { %14816 = vst [vmem:[#allocation17_spill] sm:$0xff] %v11813_v28  ;;  %v7094_v57 = vpack.c.bf16 %v14822_v19, %v14820_v23  ;;  %v4023_v2 = vsub.f32 %v14797_v30, %v14823_v9  ;;  %v14829_v23 = vand.u32 4294901760, %v14802_v61  ;;  %v4030_v27 = vand.u32 4294901760, %v4029_v54  ;;  %7231 = vmatprep.subr.bf16.mxu1 %v11813_v28  ;;  %v14832_v30 = vld [vmem:[#allocation153_spill] sm:$0xff] }
 0x326   : > { %14828 = vst [vmem:[#allocation26_spill] sm:$0xff] %v11844_v18  ;;  %v14831_v22 = vand.u32 4294901760, %v14830_v58  ;;  %v14833_v15 = vand.u32 4294901760, %v14832_v30  ;;  %v14834_v19 = vand.u32 4294901760, %v11768_v37  ;;  %v14835_v9 = vand.u32 4294901760, %v11773_v25  ;;  %v14837_v54 = vld [vmem:[#allocation177_spill] sm:$0xff]  ;;  %7233 = vmatpush1.bf16.msra.mxu1 %v11844_v18 }
 0x327   : > { %v4053_v26 = vsub.f32 %v14802_v61, %v14829_v23  ;;  %7095 = vmatprep.subr.bf16.mxu0 %v7094_v57  ;;  %v14838_v6 = vand.u32 4294901760, %v14837_v54  ;;  %v14840_v28 = vand.u32 4294901760, %v14839_v55  ;;  %v4024_v58 = vand.u32 4294901760, %v4023_v2  ;;  %v14844_v57 = vld [vmem:[#allocation157_spill] sm:$0xff]  ;;  %v14846_v55 = vld [vmem:[#allocation158_spill] sm:$0xff]  ;;  %v14855_v18 = vld [vmem:[#allocation35_spill] sm:$0xff] }
 0x328   : > { %v7096_v23 = vpack.c.bf16 %v14833_v15, %v14831_v22  ;;  %v11863_v61 = vpack.c.bf16 %v14835_v9, %v14834_v19  ;;  %v4036_v48 = vand.u32 4294901760, %v4035_v21  ;;  %v4042_v30 = vand.u32 4294901760, %v4041_v17 }
 0x329   : > { %v7098_v59 = vpack.c.bf16 %v14840_v28, %v14838_v6  ;;  %v4054_v15 = vand.u32 4294901760, %v4053_v26  ;;  %v14841_v22 = vand.u32 4294901760, %v11342_v50  ;;  %v14842_v19 = vand.u32 4294901760, %v11347_v31 }
 0x32a   : > { %14836 = vst [vmem:[#allocation29_spill] sm:$0xff] %v11863_v61  ;;  %v14845_v54 = vand.u32 4294901760, %v14844_v57  ;;  %v14847_v28 = vand.u32 4294901760, %v14846_v55  ;;  %v14848_v21 = vand.u32 4294901760, %v11820_v43  ;;  %v14849_v17 = vand.u32 4294901760, %v11825_v33  ;;  %7097 = vmatpush1.bf16.msra.mxu0 %v7096_v23  ;;  %7235 = vmatprep.subr.bf16.mxu1 %v11863_v61  ;;  %v14854_v55 = vld [vmem:[#allocation34_spill] sm:$0xff] }
 0x32b   : > { %v4047_v25 = vsub.f32 %v11342_v50, %v14841_v22  ;;  %v4059_v9 = vsub.f32 %v11347_v31, %v14842_v19  ;;  %v7238_v6 = vpack.c.bf16 %v4030_v27, %v4018_v8  ;;  %v14851_v22 = vld [vmem:[#allocation32_spill] sm:$0xff]  ;;  %v14852_v19 = vand.u32 4294901760, %v11352_v40  ;;  %7099 = vmatprep.subr.bf16.mxu0 %v7098_v59  ;;  %v14858_v8 = vld [vmem:[#allocation166_spill] sm:$0xff]  ;;  %v14860_v50 = vld [vmem:[#allocation171_spill] sm:$0xff] }
 0x32c   : > { %v7100_v2 = vpack.c.bf16 %v14847_v28, %v14845_v54  ;;  %v11887_v26 = vpack.c.bf16 %v14849_v17, %v14848_v21  ;;  %v14853_v57 = vand.u32 4294901760, %v11371_v44  ;;  %v13647_v31 = vand.u32 4294901760, %v14855_v18  ;;  %v14856_v21 = vld [vmem:[#allocation165_spill] sm:$0xff]  ;;  %v14862_v33 = vld [vmem:[#allocation172_spill] sm:$0xff] }
 0x32d   : > { %v4065_v7 = vsub.f32 %v11352_v40, %v14852_v19  ;;  %v14857_v27 = vand.u32 4294901760, %v14856_v21  ;;  %v14859_v17 = vand.u32 4294901760, %v14858_v8  ;;  %v14861_v61 = vand.u32 4294901760, %v14860_v50 }
 0x32e   : > { %14850 = vst [vmem:[#allocation33_spill] sm:$0xff] %v11887_v26  ;;  %v4077_v54 = vsub.f32 %v11371_v44, %v14853_v57  ;;  %v14863_v43 = vand.u32 4294901760, %v14862_v33  ;;  %v7240_v19 = vpack.c.bf16 %v4036_v48, %v4024_v58  ;;  %v13648_v40 = vand.u32 4294901760, %v11428_v24  ;;  %7237 = vmatpush1.bf16.msra.mxu1 %v11887_v26  ;;  %7101 = vmatpush1.bf16.msra.mxu0 %v7100_v2 }
 0x32f   : > { %v7102_v23 = vpack.c.bf16 %v14859_v17, %v14857_v27  ;;  %v7242_v49 = vpack.c.bf16 %v4054_v15, %v4042_v30  ;;  %v4048_v57 = vand.u32 4294901760, %v4047_v25  ;;  %v4060_v44 = vand.u32 4294901760, %v4059_v9  ;;  %7239 = vmatprep.subr.bf16.mxu1 %v7238_v6  ;;  %v14867_v15 = vld [vmem:[#allocation189_spill] sm:$0xff] }
 0x330   : > { %v7104_v37 = vpack.c.bf16 %v14863_v43, %v14861_v61  ;;  %v14864_v28 = vand.u32 4294901760, %v14843_v12  ;;  %v14865_v21 = vand.u32 4294901760, %v14851_v22  ;;  %v13649_v50 = vand.u32 4294901760, %v11433_v34 }
 0x331   : > { %v13652_v61 = vand.u32 4294901760, %v11438_v20  ;;  %v4066_v25 = vand.u32 4294901760, %v4065_v7  ;;  %v4078_v43 = vand.u32 4294901760, %v4077_v54  ;;  %v14866_v33 = vand.u32 4294901760, %v14854_v55  ;;  %7103 = vmatprep.subr.bf16.mxu0 %v7102_v23  ;;  %v14871_v54 = vld [vmem:[#allocation112_spill] sm:$0xff]  ;;  %v14872_v23 = vld [vmem:[#allocation47_spill] sm:$0xff] }
 0x332   : > { %v4071_v59 = vsub.f32 %v14843_v12, %v14864_v28  ;;  %v4083_v27 = vsub.f32 %v14851_v22, %v14865_v21  ;;  %v4101_v30 = vsub.f32 %v14855_v18, %v13647_v31  ;;  %v14868_v9 = vand.u32 4294901760, %v14867_v15  ;;  %v14869_v28 = vld [vmem:[#allocation190_spill] sm:$0xff]  ;;  %4008 = vmatmul.mubr.f32.vlgmr.msra.gmra.mrb[2].mxu1 %v14871_v54  ;;  %v14873_v15 = vld [vmem:[#allocation105_spill] sm:$0xff]  ;;  %7105 = vmatpush1.bf16.msra.mxu0 %v7104_v37 }
 0x333   : > { %v4089_v58 = vsub.f32 %v14854_v55, %v14866_v33  ;;  %v14870_v8 = vand.u32 4294901760, %v14869_v28  ;;  %v4095_v2 = vsub.f32 %v11428_v24, %v13648_v40  ;;  %v7244_v21 = vpack.c.bf16 %v4060_v44, %v4048_v57  ;;  %7241 = vmatpush1.bf16.msra.mxu1 %v7240_v19  ;;  %4399 = vmatprep.mubr.f32.mxu1 %v14873_v15  ;;  %v14875_v57 = vld [vmem:[#allocation191_spill] sm:$0xff]  ;;  %v14877_v19 = vld [vmem:[#allocation192_spill] sm:$0xff] }
 0x334   : > { %v4072_v33 = vand.u32 4294901760, %v4071_v59  ;;  %v4107_v28 = vsub.f32 %v11433_v34, %v13649_v50  ;;  %v14874_v40 = vand.u32 4294901760, %v11457_v16  ;;  %7243 = vmatprep.subr.bf16.mxu1 %v7242_v49  ;;  %v14876_v59 = vand.u32 4294901760, %v14875_v57 }
 0x335   : > { %v7106_v17 = vpack.c.bf16 %v14870_v8, %v14868_v9  ;;  %v4084_v9 = vand.u32 4294901760, %v4083_v27  ;;  %v4113_v8 = vsub.f32 %v11438_v20, %v13652_v61  ;;  %v14878_v48 = vand.u32 4294901760, %v14877_v19 }
 0x336   : > { %v4125_v44 = vsub.f32 %v11457_v16, %v14874_v40  ;;  %v7246_v27 = vpack.c.bf16 %v4078_v43, %v4066_v25  ;;  %v4090_v6 = vand.u32 4294901760, %v4089_v58  ;;  %v4102_v7 = vand.u32 4294901760, %v4101_v30 }
 0x337   : > { %v7108_v31 = vpack.c.bf16 %v14878_v48, %v14876_v59  ;;  %v14879_v50 = vand.u32 4294901760, %v11504_v29  ;;  %7107 = vmatprep.subr.bf16.mxu0 %v7106_v17  ;;  %v4096_v61 = vand.u32 4294901760, %v4095_v2  ;;  %v14881_v54 = vand.u32 4294901760, %v11462_v5  ;;  %7245 = vmatpush1.bf16.msra.mxu1 %v7244_v21 }
 0x338   : > { %v14882_v49 = vand.u32 4294901760, %v11467_v35  ;;  %v14883_v48 = vand.u32 4294901760, %v11472_v4  ;;  %v14884_v43 = vand.u32 4294901760, %v14872_v23  ;;  %v7248_v30 = vpack.c.bf16 %v4084_v9, %v4072_v33  ;;  %7247 = vmatprep.subr.bf16.mxu1 %v7246_v27  ;;  %v14888_v9 = vld [vmem:[#allocation60_spill] sm:$0xff] }
 0x339   : > { %v11953_v26 = vsub.f32 %v11504_v29, %v14879_v50  ;;  %v4119_v40 = vsub.f32 %v11462_v5, %v14881_v54  ;;  %v13653_v29 = vand.u32 4294901760, %v11514_v10  ;;  %v4108_v17 = vand.u32 4294901760, %v4107_v28  ;;  %7109 = vmatpush1.bf16.msra.mxu0 %v7108_v31 }
 0x33a   : > { %v4131_v37 = vsub.f32 %v11467_v35, %v14882_v49  ;;  %v4137_v25 = vsub.f32 %v11472_v4, %v14883_v48  ;;  %v4149_v58 = vsub.f32 %v14872_v23, %v14884_v43  ;;  %v4114_v2 = vand.u32 4294901760, %v4113_v8  ;;  %v14887_v43 = vld [vmem:[#allocation101_spill] sm:$0xff] }
 0x33b   : > { %14880 = vst [vmem:[#allocation37_spill] sm:$0xff] %v11953_v26  ;;  %v4126_v54 = vand.u32 4294901760, %v4125_v44  ;;  %v14885_v57 = vand.u32 4294901760, %v11509_v63  ;;  %v7250_v19 = vpack.c.bf16 %v4102_v7, %v4090_v6  ;;  %v13655_v49 = vand.u32 4294901760, %v11524_v3  ;;  %7111 = vmatprep.subr.bf16.mxu0 %v14887_v43  ;;  %7249 = vmatpush1.bf16.msra.mxu1 %v7248_v30 }
 0x33c   : > { %v13654_v48 = vand.u32 4294901760, %v11543_v11  ;;  %v4120_v50 = vand.u32 4294901760, %v4119_v40  ;;  %v4132_v21 = vand.u32 4294901760, %v4131_v37  ;;  %v13656_v33 = vand.u32 4294901760, %v11548_v0  ;;  %v14892_v40 = vld [vmem:[#allocation104_spill] sm:$0xff] }
 0x33d   : > { %v11972_v59 = vsub.f32 %v11509_v63, %v14885_v57  ;;  %v13658_v28 = vand.u32 4294901760, %v14888_v9  ;;  %v4138_v8 = vand.u32 4294901760, %v4137_v25  ;;  %v4150_v44 = vand.u32 4294901760, %v4149_v58  ;;  %3726 = vmatmul.mubr.f32.vlgmr.msra.gmra.mrb[4].mxu0 %v14892_v40  ;;  %v14893_v25 = vld [vmem:[#allocation111_spill] sm:$0xff]  ;;  %7251 = vmatprep.subr.bf16.mxu1 %v7250_v19 }
 0x33e   : > { %v4143_v31 = vsub.f32 %v11514_v10, %v13653_v29  ;;  %v14889_v63 = vand.u32 4294901760, %v11519_v32  ;;  %v14890_v6 = vand.u32 4294901760, %v11533_v62  ;;  %v7252_v37 = vpack.c.bf16 %v4108_v17, %v4096_v61  ;;  %7113 = vmatpush1.bf16.msra.mxu0 %v14893_v25  ;;  %3861 = vmatprep.mubr.f32.mxu0 %v14873_v15  ;;  %v14898_v17 = vld [vmem:[#allocation113_spill] sm:$0xff] }
 0x33f   : > { %14886 = vst [vmem:[#allocation38_spill] sm:$0xff] %v11972_v59  ;;  %v7254_v57 = vpack.c.bf16 %v4126_v54, %v4114_v2  ;;  %v4161_v58 = vsub.f32 %v11524_v3, %v13655_v49  ;;  %v4173_v43 = vsub.f32 %v11543_v11, %v13654_v48  ;;  %v14896_v30 = vand.u32 4294901760, %v11538_v38  ;;  %7115 = vmatprep.subr.bf16.mxu0 %v14898_v17  ;;  %v14899_v17 = vld [vmem:[#allocation114_spill] sm:$0xff] }
 0x340   : > { %v4155_v7 = vsub.f32 %v11519_v32, %v14889_v63  ;;  %v11988_v27 = vsub.f32 %v11533_v62, %v14890_v6  ;;  %v14894_v63 = vld [vmem:[#allocation61_spill] sm:$0xff]  ;;  %v14895_v6 = vld [vmem:[#allocation174_spill] sm:$0xff]  ;;  %v4167_v2 = vsub.f32 %v11548_v0, %v13656_v33  ;;  %v4179_v54 = vsub.f32 %v14888_v9, %v13658_v28  ;;  %7253 = vmatpush1.bf16.msra.mxu1 %v7252_v37 }
 0x341   : > { %v12004_v61 = vsub.f32 %v11538_v38, %v14896_v30  ;;  %v7256_v25 = vpack.c.bf16 %v4132_v21, %v4120_v50  ;;  %v7258_v48 = vpack.c.bf16 %v4150_v44, %v4138_v8  ;;  %v4144_v49 = vand.u32 4294901760, %v4143_v31  ;;  %7255 = vmatprep.subr.bf16.mxu1 %v7254_v57  ;;  %v14902_v44 = vld [vmem:[#allocation115_spill] sm:$0xff] }
 0x342   : > { %14891 = vst [vmem:[#allocation42_spill] sm:$0xff] %v11988_v27  ;;  %v4156_v29 = vand.u32 4294901760, %v4155_v7  ;;  %v13659_v62 = vand.u32 4294901760, %v11600_v60  ;;  %v13660_v38 = vand.u32 4294901760, %v11605_v42  ;;  %v13661_v30 = vand.u32 4294901760, %v11610_v56  ;;  %7117 = vmatpush1.bf16.msra.mxu0 %v14899_v17 }
 0x343   : > { %14897 = vst [vmem:[#allocation44_spill] sm:$0xff] %v12004_v61  ;;  %v4162_v33 = vand.u32 4294901760, %v4161_v58  ;;  %v4174_v15 = vand.u32 4294901760, %v4173_v43  ;;  %v14900_v28 = vand.u32 4294901760, %v14894_v63  ;;  %v14901_v21 = vand.u32 4294901760, %v14895_v6  ;;  %7119 = vmatprep.subr.bf16.mxu0 %v14902_v44  ;;  %v14907_v44 = vld [vmem:[#allocation116_spill] sm:$0xff] }
 0x344   : > { %v4168_v31 = vand.u32 4294901760, %v4167_v2  ;;  %v4180_v7 = vand.u32 4294901760, %v4179_v54  ;;  %v13662_v37 = vand.u32 4294901760, %v11634_v1  ;;  %v14903_v57 = vand.u32 4294901760, %v11577_v13  ;;  %7257 = vmatpush1.bf16.msra.mxu1 %v7256_v25 }
 0x345   : > { %v4185_v50 = vsub.f32 %v14894_v63, %v14900_v28  ;;  %v4197_v8 = vsub.f32 %v14895_v6, %v14901_v21  ;;  %v7260_v43 = vpack.c.bf16 %v4156_v29, %v4144_v49  ;;  %v4191_v2 = vsub.f32 %v11600_v60, %v13659_v62  ;;  %7259 = vmatprep.subr.bf16.mxu1 %v7258_v48 }
 0x346   : > { %v12030_v58 = vsub.f32 %v11577_v13, %v14903_v57  ;;  %v4203_v54 = vsub.f32 %v11605_v42, %v13660_v38  ;;  %v4209_v21 = vsub.f32 %v11610_v56, %v13661_v30  ;;  %v14904_v13 = vand.u32 4294901760, %v11629_v45  ;;  %7121 = vmatpush1.bf16.msra.mxu0 %v14907_v44  ;;  %v14910_v30 = vld [vmem:[#allocation117_spill] sm:$0xff] }
 0x347   : > { %v14905_v49 = vand.u32 4294901760, %v11582_v39  ;;  %v7262_v57 = vpack.c.bf16 %v4174_v15, %v4162_v33  ;;  %v4186_v62 = vand.u32 4294901760, %v4185_v50  ;;  %v4198_v17 = vand.u32 4294901760, %v4197_v8  ;;  %7123 = vmatprep.subr.bf16.mxu0 %v14910_v30  ;;  %v14928_v30 = vld [vmem:[#allocation120_spill] sm:$0xff] }
 0x348   : > { %v4221_v29 = vsub.f32 %v11629_v45, %v14904_v13  ;;  %v14908_v38 = vand.u32 4294901760, %v11619_v51  ;;  %v7264_v19 = vpack.c.bf16 %v4180_v7, %v4168_v31  ;;  %v4215_v13 = vsub.f32 %v11634_v1, %v13662_v37  ;;  %7261 = vmatpush1.bf16.msra.mxu1 %v7260_v43  ;;  %v14916_v37 = vld [vmem:[#allocation118_spill] sm:$0xff] }
 0x349   : > { %v12049_v25 = vsub.f32 %v11582_v39, %v14905_v49  ;;  %v14911_v39 = vand.u32 4294901760, %v11641_v36  ;;  %v14912_v15 = vand.u32 4294901760, %v11646_v47  ;;  %v14913_v33 = vand.u32 4294901760, %v11651_v52  ;;  %7263 = vmatprep.subr.bf16.mxu1 %v7262_v57 }
 0x34a   : > { %v12055_v28 = vsub.f32 %v11619_v51, %v14908_v38  ;;  %v4192_v50 = vand.u32 4294901760, %v4191_v2  ;;  %v4204_v8 = vand.u32 4294901760, %v4203_v54  ;;  %v4210_v31 = vand.u32 4294901760, %v4209_v21  ;;  %7125 = vmatpush1.bf16.msra.mxu0 %v14916_v37  ;;  %v14920_v54 = vld [vmem:[#allocation80_spill] sm:$0xff]  ;;  %v14930_v21 = vld [vmem:[#allocation13_spill] sm:$0xff] }
 0x34b   : > { %14906 = vst [vmem:[#allocation49_spill] sm:$0xff] %v12049_v25  ;;  %v4227_v49 = vsub.f32 %v11641_v36, %v14911_v39  ;;  %v4233_v48 = vsub.f32 %v11646_v47, %v14912_v15  ;;  %v4245_v51 = vsub.f32 %v11651_v52, %v14913_v33  ;;  %v4222_v7 = vand.u32 4294901760, %v4221_v29  ;;  %v14917_v47 = vld [vmem:[#allocation185_spill] sm:$0xff]  ;;  %v14918_v52 = vld [vmem:[#allocation79_spill] sm:$0xff]  ;;  %v14921_v29 = vld [vmem:[#allocation84_spill] sm:$0xff] }
 0x34c   : > { %14909 = vst [vmem:[#allocation50_spill] sm:$0xff] %v12055_v28  ;;  %v14914_v44 = vand.u32 4294901760, %v11624_v14  ;;  %v7266_v15 = vpack.c.bf16 %v4198_v17, %v4186_v62  ;;  %v13676_v33 = vand.u32 4294901760, %v14917_v47  ;;  %v13675_v38 = vand.u32 4294901760, %v14918_v52  ;;  %v14919_v36 = vld [vmem:[#allocation119_spill] sm:$0xff]  ;;  %7265 = vmatpush1.bf16.msra.mxu1 %v7264_v19 }
 0x34d   : > { %7127 = vmatprep.subr.bf16.mxu0 %v14919_v36  ;;  %v4216_v43 = vand.u32 4294901760, %v4215_v13  ;;  %v4228_v2 = vand.u32 4294901760, %v4227_v49  ;;  %v4234_v1 = vand.u32 4294901760, %v4233_v48  ;;  %v4246_v45 = vand.u32 4294901760, %v4245_v51  ;;  %v14925_v13 = vld [vmem:[#allocation74_spill] sm:$0xff] }
 0x34e   : > { %v12075_v39 = vsub.f32 %v11624_v14, %v14914_v44  ;;  %v14922_v14 = vand.u32 4294901760, %v11686_v46  ;;  %v14923_v62 = vand.u32 4294901760, %v11691_v41  ;;  %v14924_v57 = vand.u32 4294901760, %v11676_v53  ;;  %7129 = vmatpush1.bf16.msra.mxu0 %v14928_v30  ;;  %7267 = vmatprep.subr.bf16.mxu1 %v7266_v15 }
 0x34f   : > { %v14926_v49 = vand.u32 4294901760, %v14925_v13  ;;  %v7268_v48 = vpack.c.bf16 %v4204_v8, %v4192_v50  ;;  %v7270_v51 = vpack.c.bf16 %v4222_v7, %v4210_v31  ;;  %v14934_v50 = vld [vmem:[#allocation78_spill] sm:$0xff]  ;;  %v14937_v31 = vld [vmem:[#allocation121_spill] sm:$0xff]  ;;  %v14938_v7 = vand.u32 4294901760, %v14920_v54 }
 0x350   : > { %14915 = vst [vmem:[#allocation53_spill] sm:$0xff] %v12075_v39  ;;  %v4239_v37 = vsub.f32 %v11686_v46, %v14922_v14  ;;  %v4251_v17 = vsub.f32 %v11691_v41, %v14923_v62  ;;  %v12092_v36 = vsub.f32 %v11676_v53, %v14924_v57  ;;  %v4257_v14 = vsub.f32 %v14917_v47, %v13676_v33  ;;  %v14929_v62 = vld [vmem:[#allocation94_spill] sm:$0xff] }
 0x351   : > { %v12097_v44 = vsub.f32 %v14925_v13, %v14926_v49  ;;  %v4269_v53 = vsub.f32 %v14918_v52, %v13675_v38  ;;  %v14931_v13 = vld [vmem:[#allocation77_spill] sm:$0xff]  ;;  %v14935_v30 = vand.u32 4294901760, %v14934_v50  ;;  %7131 = vmatprep.subr.bf16.mxu0 %v14937_v31  ;;  %v4263_v15 = vsub.f32 %v14920_v54, %v14938_v7  ;;  %7269 = vmatpush1.bf16.msra.mxu1 %v7268_v48  ;;  %v14940_v47 = vld [vmem:[#allocation122_spill] sm:$0xff] }
 0x352   : > { %v14932_v49 = vand.u32 4294901760, %v14931_v13  ;;  %v14939_v38 = vand.u32 4294901760, %v14921_v29  ;;  %v7272_v41 = vpack.c.bf16 %v4228_v2, %v4216_v43  ;;  %v7274_v57 = vpack.c.bf16 %v4246_v45, %v4234_v1  ;;  %7133 = vmatpush1.bf16.msra.mxu0 %v14940_v47  ;;  %7271 = vmatprep.subr.bf16.mxu1 %v7270_v51  ;;  %v14943_v2 = vld [vmem:[#allocation123_spill] sm:$0xff] }
 0x353   : > { %14927 = vst [vmem:[#allocation56_spill] sm:$0xff] %v12097_v44  ;;  %v12116_v8 = vsub.f32 %v14934_v50, %v14935_v30  ;;  %v4240_v52 = vand.u32 4294901760, %v4239_v37  ;;  %v13681_v50 = vand.u32 4294901760, %v11972_v59  ;;  %v4258_v7 = vand.u32 4294901760, %v4257_v14  ;;  %7135 = vmatprep.subr.bf16.mxu0 %v14943_v2  ;;  %v14944_v47 = vld [vmem:[#allocation87_spill] sm:$0xff] }
 0x354   : > { %v12111_v19 = vsub.f32 %v14931_v13, %v14932_v49  ;;  %v4275_v33 = vsub.f32 %v14921_v29, %v14939_v38  ;;  %v4252_v13 = vand.u32 4294901760, %v4251_v17  ;;  %v13680_v49 = vand.u32 4294901760, %v11953_v26  ;;  %v14952_v30 = vld [vmem:[#allocation127_spill] sm:$0xff] }
 0x355   : > { %14936 = vst [vmem:[#allocation63_spill] sm:$0xff] %v12116_v8  ;;  %v4270_v54 = vand.u32 4294901760, %v4269_v53  ;;  %v14941_v38 = vand.u32 4294901760, %v14929_v62  ;;  %v14942_v1 = vand.u32 4294901760, %v14930_v21  ;;  %v4264_v37 = vand.u32 4294901760, %v4263_v15  ;;  %7273 = vmatpush1.bf16.msra.mxu1 %v7272_v41 }
 0x356   : > { %14933 = vst [vmem:[#allocation59_spill] sm:$0xff] %v12111_v19  ;;  %v4276_v17 = vand.u32 4294901760, %v4275_v33  ;;  %v14945_v51 = vand.u32 4294901760, %v14944_v47  ;;  %v7276_v53 = vpack.c.bf16 %v4252_v13, %v4240_v52  ;;  %v4287_v15 = vsub.f32 %v11953_v26, %v13680_v49  ;;  %v14949_v13 = vld [vmem:[#allocation88_spill] sm:$0xff]  ;;  %7137 = vmatpush1.bf16.msra.mxu0 %v14952_v30  ;;  %7275 = vmatprep.subr.bf16.mxu1 %v7274_v57 }
 0x357   : > { %v4281_v45 = vsub.f32 %v14929_v62, %v14941_v38  ;;  %v4293_v43 = vsub.f32 %v14930_v21, %v14942_v1  ;;  %v4299_v33 = vsub.f32 %v11972_v59, %v13681_v50  ;;  %v14947_v1 = vand.u32 4294901760, %v11988_v27  ;;  %v14953_v50 = vld [vmem:[#allocation92_spill] sm:$0xff] }
 0x358   : > { %v12142_v14 = vsub.f32 %v14944_v47, %v14945_v51  ;;  %v14948_v47 = vand.u32 4294901760, %v12004_v61  ;;  %v14950_v51 = vand.u32 4294901760, %v14949_v13  ;;  %v7278_v49 = vpack.c.bf16 %v4270_v54, %v4258_v7 }
 0x359   : > { %v4305_v2 = vsub.f32 %v11988_v27, %v14947_v1  ;;  %v4282_v38 = vand.u32 4294901760, %v4281_v45  ;;  %v4294_v31 = vand.u32 4294901760, %v4293_v43  ;;  %v14954_v48 = vand.u32 4294901760, %v14953_v50  ;;  %v14956_v1 = vld [vmem:[#allocation128_spill] sm:$0xff]  ;;  %7277 = vmatpush1.bf16.msra.mxu1 %v7276_v53 }
 0x35a   : > { %14946 = vst [vmem:[#allocation67_spill] sm:$0xff] %v12142_v14  ;;  %v4317_v52 = vsub.f32 %v12004_v61, %v14948_v47  ;;  %v12161_v41 = vsub.f32 %v14949_v13, %v14950_v51  ;;  %7139 = vmatprep.subr.bf16.mxu0 %v14956_v1  ;;  %v7280_v27 = vpack.c.bf16 %v4276_v17, %v4264_v37  ;;  %v14957_v47 = vand.u32 4294901760, %v12030_v58  ;;  %v14961_v1 = vld [vmem:[#allocation93_spill] sm:$0xff] }
 0x35b   : > { %v12167_v59 = vsub.f32 %v14953_v50, %v14954_v48  ;;  %v14958_v13 = vand.u32 4294901760, %v12049_v25  ;;  %v14959_v54 = vand.u32 4294901760, %v12055_v28  ;;  %v14960_v7 = vand.u32 4294901760, %v12075_v39  ;;  %7279 = vmatprep.subr.bf16.mxu1 %v7278_v49 }
 0x35c   : > { %14951 = vst [vmem:[#allocation68_spill] sm:$0xff] %v12161_v41  ;;  %v4311_v61 = vsub.f32 %v12030_v58, %v14957_v47  ;;  %v4288_v37 = vand.u32 4294901760, %v4287_v15  ;;  %v4300_v17 = vand.u32 4294901760, %v4299_v33  ;;  %v4306_v48 = vand.u32 4294901760, %v4305_v2  ;;  %v14968_v15 = vld [vmem:[#allocation25_spill] sm:$0xff] }
 0x35d   : > { %14955 = vst [vmem:[#allocation81_spill] sm:$0xff] %v12167_v59  ;;  %v4323_v30 = vsub.f32 %v12049_v25, %v14958_v13  ;;  %v4329_v57 = vsub.f32 %v12055_v28, %v14959_v54  ;;  %v4341_v50 = vsub.f32 %v12075_v39, %v14960_v7  ;;  %v4318_v51 = vand.u32 4294901760, %v4317_v52  ;;  %v14964_v25 = vld [vmem:[#allocation131_spill] sm:$0xff]  ;;  %v14965_v39 = vld [vmem:[#allocation20_spill] sm:$0xff]  ;;  %7281 = vmatpush1.bf16.msra.mxu1 %v7280_v27  ;;  %v14978_v27 = vld [vmem:[#allocation141_spill] sm:$0xff] }
 0x35e   : > { %v14962_v47 = vand.u32 4294901760, %v14961_v1  ;;  %7141 = vmatpush1.bf16.msra.mxu0 %v14964_v25  ;;  %v7282_v54 = vpack.c.bf16 %v4294_v31, %v4282_v38  ;;  %v14966_v43 = vand.u32 4294901760, %v14965_v39  ;;  %v14969_v33 = vand.u32 4294901760, %v14968_v15  ;;  %v14971_v52 = vld [vmem:[#allocation132_spill] sm:$0xff] }
 0x35f   : > { %7143 = vmatprep.subr.bf16.mxu0 %v14971_v52  ;;  %v4324_v25 = vand.u32 4294901760, %v4323_v30  ;;  %v4330_v49 = vand.u32 4294901760, %v4329_v57  ;;  %v4342_v31 = vand.u32 4294901760, %v4341_v50  ;;  %v14972_v38 = vand.u32 4294901760, %v12092_v36  ;;  %v14974_v52 = vld [vmem:[#allocation133_spill] sm:$0xff] }
 0x360   : > { %v12187_v13 = vsub.f32 %v14961_v1, %v14962_v47  ;;  %v12195_v53 = vsub.f32 %v14965_v39, %v14966_v43  ;;  %v12200_v2 = vsub.f32 %v14968_v15, %v14969_v33  ;;  %v4312_v1 = vand.u32 4294901760, %v4311_v61  ;;  %7283 = vmatprep.subr.bf16.mxu1 %v7282_v54 }
 0x361   : > { %v4335_v47 = vsub.f32 %v12092_v36, %v14972_v38  ;;  %v14973_v45 = vand.u32 4294901760, %v12097_v44  ;;  %v7284_v43 = vpack.c.bf16 %v4300_v17, %v4288_v37  ;;  %v7286_v7 = vpack.c.bf16 %v4318_v51, %v4306_v48  ;;  %v14977_v37 = vld [vmem:[#allocation134_spill] sm:$0xff] }
 0x362   : > { %14963 = vst [vmem:[#allocation82_spill] sm:$0xff] %v12187_v13  ;;  %14967 = vst [vmem:[#allocation83_spill] sm:$0xff] %v12195_v53  ;;  %v13694_v15 = vand.u32 4294901760, %v12142_v14  ;;  %v13692_v33 = vand.u32 4294901760, %v12161_v41  ;;  %7145 = vmatpush1.bf16.msra.mxu0 %v14974_v52  ;;  %v14975_v61 = vand.u32 4294901760, %v12111_v19  ;;  %v14976_v57 = vand.u32 4294901760, %v12116_v8 }
 0x363   : > { %14970 = vst [vmem:[#allocation86_spill] sm:$0xff] %v12200_v2  ;;  %v4347_v39 = vsub.f32 %v12097_v44, %v14973_v45  ;;  %v13693_v45 = vand.u32 4294901760, %v12167_v59  ;;  %7147 = vmatprep.subr.bf16.mxu0 %v14977_v37  ;;  %v7288_v17 = vpack.c.bf16 %v4324_v25, %v4312_v1  ;;  %v7290_v48 = vpack.c.bf16 %v4342_v31, %v4330_v49  ;;  %v15025_v44 = vld [vmem:[#allocation130_spill] sm:$0xff] }
 0x364   : > { %v4353_v30 = vsub.f32 %v12111_v19, %v14975_v61  ;;  %v4365_v50 = vsub.f32 %v12116_v8, %v14976_v57  ;;  %v4336_v51 = vand.u32 4294901760, %v4335_v47  ;;  %7285 = vmatpush1.bf16.msra.mxu1 %v7284_v43  ;;  %v4359_v54 = vsub.f32 %v12142_v14, %v13694_v15  ;;  %v14982_v15 = vld [vmem:[#allocation151_spill] sm:$0xff] }
 0x365   : > { %v4348_v38 = vand.u32 4294901760, %v4347_v39  ;;  %v4371_v52 = vsub.f32 %v12161_v41, %v13692_v33  ;;  %v13696_v61 = vand.u32 4294901760, %v12195_v53  ;;  %v13695_v57 = vand.u32 4294901760, %v12200_v2  ;;  %7287 = vmatprep.subr.bf16.mxu1 %v7286_v7  ;;  %v14980_v39 = vld [vmem:[#allocation142_spill] sm:$0xff] }
 0x366   : > { %7149 = vmatpush1.bf16.msra.mxu0 %v14978_v27  ;;  %v4354_v1 = vand.u32 4294901760, %v4353_v30  ;;  %v4366_v25 = vand.u32 4294901760, %v4365_v50  ;;  %v4377_v49 = vsub.f32 %v12167_v59, %v13693_v45  ;;  %v14979_v31 = vand.u32 4294901760, %v12187_v13  ;;  %v14981_v50 = vld [vmem:[#allocation150_spill] sm:$0xff] }
 0x367   : > { %7151 = vmatprep.subr.bf16.mxu0 %v14980_v39  ;;  %v7292_v43 = vpack.c.bf16 %v4348_v38, %v4336_v51  ;;  %v4360_v37 = vand.u32 4294901760, %v4359_v54  ;;  %v4372_v33 = vand.u32 4294901760, %v4371_v52  ;;  %v4383_v7 = vsub.f32 %v12195_v53, %v13696_v61  ;;  %v14983_v54 = vld [vmem:[#allocation163_spill] sm:$0xff]  ;;  %v14984_v39 = vld [vmem:[#allocation164_spill] sm:$0xff]  ;;  %v1111_v53 = vld [vmem:[%s13070_s3 + $0x110] sm:$0xff] }
 0x368   : > { %v4389_v47 = vsub.f32 %v12187_v13, %v14979_v31  ;;  %7289 = vmatpush1.bf16.msra.mxu1 %v7288_v17  ;;  %v4395_v30 = vsub.f32 %v12200_v2, %v13695_v57  ;;  %v7294_v27 = vpack.c.bf16 %v4366_v25, %v4354_v1  ;;  %v4378_v45 = vand.u32 4294901760, %v4377_v49  ;;  %v14985_v61 = vld [vmem:[#allocation175_spill] sm:$0xff]  ;;  %v14987_v1 = vld [vmem:[#allocation22_spill] sm:$0xff]  ;;  %v14988_v49 = vld [vmem:[#allocation176_spill] sm:$0xff] }
 0x369   : > { %7291 = vmatprep.subr.bf16.mxu1 %v7290_v48  ;;  %v7296_v17 = vpack.c.bf16 %v4372_v33, %v4360_v37  ;;  %v4384_v51 = vand.u32 4294901760, %v4383_v7  ;;  %v14986_v48 = vld [vmem:[#allocation21_spill] sm:$0xff]  ;;  %v1202_v33 = vld [vmem:[%s13070_s3 + $0x3e8] sm:$0xff]  ;;  %v14991_v37 = vld [vmem:[#allocation179_spill] sm:$0xff] }
 0x36a   : > { %7153 = vmatpush1.bf16.msra.mxu0 %v14981_v50  ;;  %v4390_v31 = vand.u32 4294901760, %v4389_v47  ;;  %v4396_v38 = vand.u32 4294901760, %v4395_v30  ;;  %v7302_v25 = vpack.c.bf16 %v14987_v1, %v14986_v48  ;;  %v14990_v47 = vld [vmem:[#allocation138_spill] sm:$0xff]  ;;  %v14993_v7 = vld [vmem:[#allocation24_spill] sm:$0xff]  ;;  %v1083_v50 = vld [vmem:[%s13070_s3 + $0x30] sm:$0xff] }
 0x36b   : > { %7155 = vmatprep.subr.bf16.mxu0 %v14982_v15  ;;  %v1195_v15 = vld [vmem:[%s13070_s3 + $0x3b0] sm:$0xff]  ;;  %v15001_v1 = vld [vmem:[#allocation183_spill] sm:$0xff] }
 0x36c   : > { %7293 = vmatpush1.bf16.msra.mxu1 %v7292_v43  ;;  %v7298_v52 = vpack.c.bf16 %v4390_v31, %v4378_v45  ;;  %v7300_v57 = vpack.c.bf16 %v4396_v38, %v4384_v51  ;;  %v14989_v45 = vld [vmem:[#allocation137_spill] sm:$0xff]  ;;  %v14994_v31 = vld [vmem:[#allocation180_spill] sm:$0xff]  ;;  %v1209_v51 = vld [vmem:[%s13070_s3 + $0x420] sm:$0xff] }
 0x36d   : > { %7295 = vmatprep.subr.bf16.mxu1 %v7294_v27  ;;  %v7304_v43 = vpack.c.bf16 %v14990_v47, %v14989_v45  ;;  %v1090_v27 = vld [vmem:[%s13070_s3 + $0x68] sm:$0xff]  ;;  %v1216_v38 = vld [vmem:[%s13070_s3 + $0x458] sm:$0xff]  ;;  %v1097_v45 = vld [vmem:[%s13070_s3 + $0xa0] sm:$0xff] }
 0x36e   : > { %7157 = vmatpush1.bf16.msra.mxu0 %v14983_v54  ;;  %v14995_v54 = vld [vmem:[#allocation107_spill] sm:$0xff] }
 0x36f   : > { %7159 = vmatprep.subr.bf16.mxu0 %v14984_v39  ;;  %v14997_v39 = vld [vmem:[#allocation30_spill] sm:$0xff] }
 0x370   : > { %7297 = vmatpush1.bf16.msra.mxu1 %v7296_v17  ;;  %v5205_v17 = vand.u32 4294901760, %v1202_v33 }
 0x371   : > { %7299 = vmatprep.subr.bf16.mxu1 %v7298_v52  ;;  %v14996_v52 = vld [vmem:[#allocation143_spill] sm:$0xff] }
 0x372   : > { %7161 = vmatpush1.bf16.msra.mxu0 %v14985_v61  ;;  %v14992_v61 = vld [vmem:[#allocation23_spill] sm:$0xff]  ;;  %v12310_v13 = vsub.f32 %v1202_v33, %v5205_v17  ;;  %v1244_v33 = vld [vmem:[%s13070_s3 + $0x538] sm:$0xff] }
 0x373   : > { %7163 = vmatprep.subr.bf16.mxu0 %v14988_v49  ;;  %v7306_v30 = vpack.c.bf16 %v14993_v7, %v14992_v61  ;;  %v5154_v49 = vand.u32 4294901760, %v1083_v50  ;;  %v14999_v7 = vld [vmem:[#allocation31_spill] sm:$0xff]  ;;  %v15000_v61 = vld [vmem:[#allocation144_spill] sm:$0xff]  ;;  %v5223_v8 = vand.u32 4294901760, %v1244_v33 }
 0x374   : > { %7301 = vmatpush1.bf16.msra.mxu1 %v7300_v57  ;;  %v5202_v57 = vand.u32 4294901760, %v1195_v15  ;;  %v7310_v47 = vpack.c.bf16 %v15000_v61, %v14999_v7  ;;  %v1230_v61 = vld [vmem:[%s13070_s3 + $0x4c8] sm:$0xff] }
 0x375   : > { %7303 = vmatprep.subr.bf16.mxu1 %v7302_v25  ;;  %v7308_v25 = vpack.c.bf16 %v14997_v39, %v14996_v52  ;;  %v5208_v39 = vand.u32 4294901760, %v1209_v51  ;;  %v5211_v52 = vand.u32 4294901760, %v1216_v38  ;;  %v5217_v14 = vand.u32 4294901760, %v1230_v61 }
 0x376   : > { %7165 = vmatpush1.bf16.msra.mxu0 %v14991_v37  ;;  %v5157_v37 = vand.u32 4294901760, %v1090_v27  ;;  %v12289_v48 = vpack.c.bf16 %v5205_v17, %v5202_v57  ;;  %v12299_v7 = vsub.f32 %v1195_v15, %v5202_v57  ;;  %v7314_v57 = vpack.c.bf16 %v14855_v18, %v14854_v55 }
 0x377   : > { %7167 = vmatprep.subr.bf16.mxu0 %v14994_v31  ;;  %4401 = vmatmul.mubr.f32.vlgmr.msra.gmra.mrb[2].mxu1 %v14892_v40  ;;  %v14998_v31 = vld [vmem:[#allocation181_spill] sm:$0xff]  ;;  %v12319_v59 = vpack.c.bf16 %v5211_v52, %v5208_v39  ;;  %v7316_v18 = vpack.c.bf16 %v11433_v34, %v11428_v24  ;;  %v7318_v55 = vpack.c.bf16 %v11457_v16, %v11438_v20  ;;  %v1146_v20 = vld [vmem:[%s13070_s3 + $0x228] sm:$0xff] }
 0x378   : > { %7305 = vmatpush1.bf16.msra.mxu1 %v7304_v43  ;;  %4601 = vmatprep.mubr.f32.mxu1 %v14995_v54  ;;  %v1104_v43 = vld [vmem:[%s13070_s3 + $0xd8] sm:$0xff]  ;;  %15002 = vst [vmem:[#allocation89_spill] sm:$0xff] %v12289_v48  ;;  %15003 = vst [vmem:[#allocation91_spill] sm:$0xff] %v12299_v7  ;;  %v12301_v54 = vpack.c.bf16 %v5157_v37, %v5154_v49  ;;  %v12314_v15 = vsub.f32 %v1090_v27, %v5157_v37  ;;  %v5166_v27 = vand.u32 4294901760, %v1111_v53  ;;  %v1139_v16 = vld [vmem:[%s13070_s3 + $0x1f0] sm:$0xff] }
 0x379   : > { %7307 = vmatprep.subr.bf16.mxu1 %v7306_v30  ;;  %v7312_v30 = vpack.c.bf16 %v14851_v22, %v14843_v12  ;;  %v5163_v2 = vand.u32 4294901760, %v1104_v43  ;;  %v1118_v22 = vld [vmem:[%s13070_s3 + $0x148] sm:$0xff]  ;;  %15006 = vst [vmem:[#allocation96_spill] sm:$0xff] %v12319_v59  ;;  %v1132_v37 = vld [vmem:[%s13070_s3 + $0x1b8] sm:$0xff]  ;;  %v12367_v34 = vsub.f32 %v1230_v61, %v5217_v14 }
 0x37a   : > { %7169 = vmatpush1.bf16.msra.mxu0 %v14998_v31  ;;  %v1223_v31 = vld [vmem:[%s13070_s3 + $0x490] sm:$0xff]  ;;  %15004 = vst [vmem:[#allocation95_spill] sm:$0xff] %v12301_v54  ;;  %v15005_v12 = vld [vmem:[#allocation184_spill] sm:$0xff]  ;;  %v5169_v17 = vand.u32 4294901760, %v1118_v22  ;;  %v1272_v61 = vld [vmem:[%s13070_s3 + $0x618] sm:$0xff] }
 0x37b   : > { %7171 = vmatprep.subr.bf16.mxu0 %v15001_v1  ;;  %v5160_v1 = vand.u32 4294901760, %v1097_v45  ;;  %v5214_v41 = vand.u32 4294901760, %v1223_v31  ;;  %v5235_v19 = vand.u32 4294901760, %v1272_v61 }
 0x37c   : > { %7309 = vmatpush1.bf16.msra.mxu1 %v7308_v25  ;;  %v12312_v25 = vsub.f32 %v1083_v50, %v5154_v49  ;;  %v12329_v50 = vsub.f32 %v1216_v38, %v5211_v52  ;;  %v1125_v49 = vld [vmem:[%s13070_s3 + $0x180] sm:$0xff]  ;;  %v15009_v52 = vld [vmem:[#allocation110_spill] sm:$0xff]  ;;  %v12371_v24 = vpack.c.bf16 %v5169_v17, %v5166_v27 }
 0x37d   : > { %7311 = vmatprep.subr.bf16.mxu1 %v7310_v47  ;;  %v12327_v47 = vsub.f32 %v1209_v51, %v5208_v39  ;;  %v12340_v51 = vpack.c.bf16 %v5163_v2, %v5160_v1  ;;  %v12342_v38 = vsub.f32 %v1097_v45, %v5160_v1  ;;  %v12346_v39 = vsub.f32 %v1104_v43, %v5163_v2  ;;  %v1258_v45 = vld [vmem:[%s13070_s3 + $0x5a8] sm:$0xff] }
 0x37e   : > { %7173 = vmatpush1.bf16.msra.mxu0 %v15005_v12  ;;  %v1237_v12 = vld [vmem:[%s13070_s3 + $0x500] sm:$0xff]  ;;  %15007 = vst [vmem:[#allocation97_spill] sm:$0xff] %v12329_v50  ;;  %v12357_v1 = vpack.c.bf16 %v5217_v14, %v5214_v41  ;;  %v12359_v2 = vsub.f32 %v1223_v31, %v5214_v41  ;;  %v5172_v43 = vand.u32 4294901760, %v1125_v49  ;;  %15011 = vst [vmem:[#allocation139_spill] sm:$0xff] %v12371_v24 }
 0x37f   : > { %7559 = vmatprep.subr.bf16.mxu0 %v12289_v48  ;;  %15008 = vst [vmem:[#allocation98_spill] sm:$0xff] %v12340_v51  ;;  %v5220_v48 = vand.u32 4294901760, %v1237_v12  ;;  %v12375_v41 = vsub.f32 %v1118_v22, %v5169_v17  ;;  %v7322_v31 = vpack.c.bf16 %v14872_v23, %v11472_v4  ;;  %v1265_v14 = vld [vmem:[%s13070_s3 + $0x5e0] sm:$0xff]  ;;  %v5178_v22 = vand.u32 4294901760, %v1139_v16  ;;  %v1160_v23 = vld [vmem:[%s13070_s3 + $0x298] sm:$0xff] }
 0x380   : > { %7313 = vmatpush1.bf16.msra.mxu1 %v7312_v30  ;;  %v1251_v30 = vld [vmem:[%s13070_s3 + $0x570] sm:$0xff]  ;;  %15010 = vst [vmem:[#allocation99_spill] sm:$0xff] %v12357_v1  ;;  %v1153_v17 = vld [vmem:[%s13070_s3 + $0x260] sm:$0xff]  ;;  %v12397_v4 = vsub.f32 %v1244_v33, %v5223_v8 }
 0x381   : > { %3863 = vmatmul.mubr.f32.vlgmr.msra.gmra.mrb[4].mxu0 %v14892_v40  ;;  %7315 = vmatprep.subr.bf16.mxu1 %v7314_v57  ;;  %v7320_v57 = vpack.c.bf16 %v11467_v35, %v11462_v5  ;;  %v5229_v40 = vand.u32 4294901760, %v1258_v45  ;;  %v7326_v5 = vpack.c.bf16 %v11543_v11, %v11524_v3  ;;  %v7328_v11 = vpack.c.bf16 %v14888_v9, %v11548_v0 }
 0x382   : > { %7561 = vmatpush3.bf16.msra.mxu0 %v12301_v54  ;;  %5254 = vmatprep.mubr.f32.mxu0 %v15009_v52  ;;  %v5175_v52 = vand.u32 4294901760, %v1132_v37  ;;  %v5226_v54 = vand.u32 4294901760, %v1251_v30  ;;  %v7330_v9 = vpack.c.bf16 %v14895_v6, %v14894_v63 }
 0x383   : > { %7563 = vmatprep.subr.bf16.mxu0 %v12319_v59  ;;  %v12373_v59 = vsub.f32 %v1111_v53, %v5166_v27  ;;  %v12386_v53 = vpack.c.bf16 %v5223_v8, %v5220_v48  ;;  %v5181_v27 = vand.u32 4294901760, %v1146_v20  ;;  %v1286_v8 = vld [vmem:[%s13070_s3 + $0x688] sm:$0xff] }
 0x384   : > { %7317 = vmatpush1.bf16.msra.mxu1 %v7316_v18  ;;  %v12388_v18 = vsub.f32 %v1237_v12, %v5220_v48  ;;  %v12401_v35 = vpack.c.bf16 %v5175_v52, %v5172_v43  ;;  %v12403_v48 = vsub.f32 %v1125_v49, %v5172_v43  ;;  %v12405_v12 = vsub.f32 %v1132_v37, %v5175_v52 }
 0x385   : > { %7319 = vmatprep.subr.bf16.mxu1 %v7318_v55  ;;  %15012 = vst [vmem:[#allocation140_spill] sm:$0xff] %v12386_v53  ;;  %v7324_v55 = vpack.c.bf16 %v11519_v32, %v11514_v10  ;;  %v12415_v33 = vpack.c.bf16 %v5229_v40, %v5226_v54  ;;  %v12417_v49 = vsub.f32 %v1251_v30, %v5226_v54  ;;  %v5184_v37 = vand.u32 4294901760, %v1153_v17  ;;  %v1174_v54 = vld [vmem:[%s13070_s3 + $0x308] sm:$0xff] }
 0x386   : > { %7565 = vmatpush3.bf16.msra.mxu0 %v12340_v51  ;;  %15013 = vst [vmem:[#allocation146_spill] sm:$0xff] %v12401_v35  ;;  %v5232_v51 = vand.u32 4294901760, %v1265_v14  ;;  %v5187_v43 = vand.u32 4294901760, %v1160_v23  ;;  %v12420_v52 = vsub.f32 %v1258_v45, %v5229_v40  ;;  %v12424_v3 = vpack.c.bf16 %v5181_v27, %v5178_v22 }
 0x387   : > { %7567 = vmatprep.subr.bf16.mxu0 %v12357_v1  ;;  %v1279_v1 = vld [vmem:[%s13070_s3 + $0x650] sm:$0xff]  ;;  %15014 = vst [vmem:[#allocation148_spill] sm:$0xff] %v12415_v33  ;;  %v12433_v30 = vsub.f32 %v1139_v16, %v5178_v22  ;;  %v5241_v45 = vand.u32 4294901760, %v1286_v8  ;;  %v12443_v10 = vsub.f32 %v1272_v61, %v5235_v19  ;;  %v7332_v16 = vpack.c.bf16 %v11605_v42, %v11600_v60 }
 0x388   : > { %7321 = vmatpush1.bf16.msra.mxu1 %v7320_v57  ;;  %15015 = vst [vmem:[#allocation155_spill] sm:$0xff] %v12424_v3  ;;  %v1167_v57 = vld [vmem:[%s13070_s3 + $0x2d0] sm:$0xff]  ;;  %v5238_v40 = vand.u32 4294901760, %v1279_v1  ;;  %v12439_v0 = vpack.c.bf16 %v5235_v19, %v5232_v51  ;;  %v12441_v32 = vsub.f32 %v1265_v14, %v5232_v51  ;;  %v12453_v22 = vpack.c.bf16 %v5187_v43, %v5184_v37 }
 0x389   : > { %7323 = vmatprep.subr.bf16.mxu1 %v7322_v31  ;;  %v12435_v31 = vsub.f32 %v1146_v20, %v5181_v27  ;;  %v1300_v20 = vld [vmem:[%s13070_s3 + $0x6f8] sm:$0xff]  ;;  %v5190_v27 = vand.u32 4294901760, %v1167_v57  ;;  %v5193_v6 = vand.u32 4294901760, %v1174_v54  ;;  %v12456_v19 = vsub.f32 %v1153_v17, %v5184_v37  ;;  %v15020_v14 = vld [vmem:[#allocation69_spill] sm:$0xff] }
 0x38a   : > { %7569 = vmatpush3.bf16.msra.mxu0 %v12371_v24  ;;  %15016 = vst [vmem:[#allocation156_spill] sm:$0xff] %v12439_v0  ;;  %v1293_v24 = vld [vmem:[%s13070_s3 + $0x6c0] sm:$0xff]  ;;  %15017 = vst [vmem:[#allocation159_spill] sm:$0xff] %v12453_v22  ;;  %v12458_v51 = vsub.f32 %v1160_v23, %v5187_v43  ;;  %v12465_v60 = vpack.c.bf16 %v5241_v45, %v5238_v40  ;;  %v12473_v23 = vld [vmem:[%s13070_s3 + $0x378] sm:$0xff]  ;;  %v12475_v17 = vsub.f32 %v1279_v1, %v5238_v40 }
 0x38b   : > { %7571 = vmatprep.subr.bf16.mxu0 %v12386_v53  ;;  %v5244_v63 = vand.u32 4294901760, %v1293_v24  ;;  %v5247_v53 = vand.u32 4294901760, %v1300_v20  ;;  %v12477_v37 = vsub.f32 %v1286_v8, %v5241_v45  ;;  %v15023_v40 = vand.u32 4294901760, %v12299_v7 }
 0x38c   : > { %7325 = vmatpush1.bf16.msra.mxu1 %v7324_v55  ;;  %v15018_v55 = vld [vmem:[#allocation66_spill] sm:$0xff]  ;;  %15019 = vst [vmem:[#allocation160_spill] sm:$0xff] %v12465_v60  ;;  %v12496_v43 = vsub.f32 %v1167_v57, %v5190_v27 }
 0x38d   : > { %7327 = vmatprep.subr.bf16.mxu1 %v7326_v5  ;;  %v7334_v42 = vpack.c.bf16 %v15018_v55, %v11610_v56  ;;  %v1181_v5 = vld [vmem:[%s13070_s3 + $0x340] sm:$0xff]  ;;  %v15021_v55 = vld [vmem:[#allocation70_spill] sm:$0xff]  ;;  %v5381_v45 = vsub.f32 %v12299_v7, %v15023_v40  ;;  %v12504_v8 = vsub.f32 %v1293_v24, %v5244_v63  ;;  %v15027_v40 = vand.u32 4294901760, %v12312_v25 }
 0x38e   : > { %7573 = vmatpush3.bf16.msra.mxu0 %v12401_v35  ;;  %v7336_v56 = vpack.c.bf16 %v15021_v55, %v15020_v14  ;;  %v5196_v1 = vand.u32 4294901760, %v1181_v5  ;;  %v12498_v35 = vsub.f32 %v1174_v54, %v5193_v6  ;;  %v15026_v55 = vld [vmem:[#allocation71_spill] sm:$0xff]  ;;  %v12502_v14 = vpack.c.bf16 %v5247_v53, %v5244_v63 }
 0x38f   : > { %7575 = vmatprep.subr.bf16.mxu0 %v12415_v33  ;;  %v12483_v33 = vpack.c.bf16 %v5193_v6, %v5190_v27  ;;  %v5269_v7 = vsub.f32 %v12312_v25, %v15027_v40  ;;  %v15029_v6 = vand.u32 4294901760, %v12327_v47  ;;  %v15030_v27 = vand.u32 4294901760, %v12329_v50  ;;  %v15035_v63 = vld [vmem:[#allocation79_spill] sm:$0xff] }
 0x390   : > { %7329 = vmatpush1.bf16.msra.mxu1 %v7328_v11  ;;  %v15024_v11 = vand.u32 4294901760, %v12310_v13 }
 0x391   : > { %15022 = vst [vmem:[#allocation161_spill] sm:$0xff] %v12483_v33  ;;  %7331 = vmatprep.subr.bf16.mxu1 %v7330_v9  ;;  %v7338_v9 = vpack.c.bf16 %v15026_v55, %v15025_v44  ;;  %v5395_v54 = vsub.f32 %v12327_v47, %v15029_v6  ;;  %v5402_v24 = vsub.f32 %v12329_v50, %v15030_v27  ;;  %v5382_v55 = vand.u32 4294901760, %v5381_v45  ;;  %v15034_v27 = vld [vmem:[#allocation185_spill] sm:$0xff] }
 0x392   : > { %7577 = vmatpush3.bf16.msra.mxu0 %v12424_v3  ;;  %v5388_v61 = vsub.f32 %v12310_v13, %v15024_v11  ;;  %v12506_v3 = vsub.f32 %v1300_v20, %v5247_v53  ;;  %v15028_v11 = vand.u32 4294901760, %v12314_v15  ;;  %v15031_v20 = vld [vmem:[#allocation76_spill] sm:$0xff]  ;;  %v12530_v44 = vsub.f32 %v1181_v5, %v5196_v1 }
 0x393   : > { %7579 = vmatprep.subr.bf16.mxu0 %v12439_v0  ;;  %v7340_v40 = vpack.c.bf16 %v15031_v20, %v11686_v46  ;;  %v7342_v0 = vpack.c.bf16 %v15035_v63, %v15034_v27  ;;  %v13770_v53 = vand.u32 4294901760, %v12359_v2  ;;  %v5396_v45 = vand.u32 4294901760, %v5395_v54 }
 0x394   : > { %v5276_v57 = vsub.f32 %v12314_v15, %v15028_v11  ;;  %7333 = vmatpush1.bf16.msra.mxu1 %v7332_v16  ;;  %v15032_v16 = vand.u32 4294901760, %v12473_v23  ;;  %v5389_v6 = vand.u32 4294901760, %v5388_v61  ;;  %v5403_v61 = vand.u32 4294901760, %v5402_v24 }
 0x395   : > { %7335 = vmatprep.subr.bf16.mxu1 %v7334_v42  ;;  %v13772_v42 = vand.u32 4294901760, %v12367_v34  ;;  %v15036_v46 = vand.u32 4294901760, %v12342_v38  ;;  %v15054_v27 = vand.u32 4294901760, %v12433_v30 }
 0x396   : > { %7581 = vmatpush3.bf16.msra.mxu0 %v12453_v22  ;;  %v12527_v11 = vpack.c.bf16 %v15032_v16, %v5196_v1  ;;  %v5270_v22 = vand.u32 4294901760, %v5269_v7  ;;  %v5277_v50 = vand.u32 4294901760, %v5276_v57  ;;  %v15037_v1 = vand.u32 4294901760, %v12346_v39  ;;  %v15038_v57 = vld [vmem:[#allocation80_spill] sm:$0xff] }
 0x397   : > { %7583 = vmatprep.subr.bf16.mxu0 %v12465_v60  ;;  %v5283_v5 = vsub.f32 %v12342_v38, %v15036_v46  ;;  %v7590_v7 = vpack.c.bf16 %v5389_v6, %v5382_v55  ;;  %v7344_v20 = vpack.c.bf16 %v14921_v29, %v15038_v57  ;;  %v5409_v46 = vsub.f32 %v12359_v2, %v13770_v53  ;;  %v15039_v6 = vld [vmem:[#allocation38_spill] sm:$0xff] }
 0x398   : > { %15033 = vst [vmem:[#allocation162_spill] sm:$0xff] %v12527_v11  ;;  %7337 = vmatpush1.bf16.msra.mxu1 %v7336_v56  ;;  %v5290_v63 = vsub.f32 %v12346_v39, %v15037_v1  ;;  %v7346_v56 = vpack.c.bf16 %v14930_v21, %v14929_v62  ;;  %v5416_v54 = vsub.f32 %v12367_v34, %v13772_v42  ;;  %v15040_v16 = vand.u32 4294901760, %v12373_v59 }
 0x399   : > { %7339 = vmatprep.subr.bf16.mxu1 %v7338_v9  ;;  %v7592_v9 = vpack.c.bf16 %v5277_v50, %v5270_v22  ;;  %v7348_v1 = vpack.c.bf16 %v15039_v6, %v11953_v26  ;;  %v15041_v62 = vand.u32 4294901760, %v12375_v41  ;;  %v7594_v29 = vpack.c.bf16 %v5403_v61, %v5396_v45  ;;  %v15042_v50 = vld [vmem:[#allocation42_spill] sm:$0xff]  ;;  %v15043_v22 = vld [vmem:[#allocation44_spill] sm:$0xff] }
 0x39a   : > { %7585 = vmatpush3.bf16.msra.mxu0 %v12483_v33  ;;  %v5297_v21 = vsub.f32 %v12373_v59, %v15040_v16  ;;  %v5284_v57 = vand.u32 4294901760, %v5283_v5  ;;  %v5291_v42 = vand.u32 4294901760, %v5290_v63  ;;  %v7350_v55 = vpack.c.bf16 %v15043_v22, %v15042_v50  ;;  %v15046_v16 = vld [vmem:[#allocation112_spill] sm:$0xff]  ;;  %v15053_v50 = vld [vmem:[#allocation53_spill] sm:$0xff] }
 0x39b   : > { %7587 = vmatprep.subr.bf16.mxu0 %v12502_v14  ;;  %v5304_v53 = vsub.f32 %v12375_v41, %v15041_v62  ;;  %v5410_v62 = vand.u32 4294901760, %v5409_v46  ;;  %v15044_v45 = vand.u32 4294901760, %v12388_v18  ;;  %v15045_v61 = vand.u32 4294901760, %v12397_v4 }
 0x39c   : > { %7341 = vmatpush1.bf16.msra.mxu1 %v7340_v40  ;;  %v5417_v40 = vand.u32 4294901760, %v5416_v54  ;;  %v5298_v5 = vand.u32 4294901760, %v5297_v21  ;;  %v15047_v46 = vand.u32 4294901760, %v12403_v48  ;;  %v15049_v21 = vand.u32 4294901760, %v12405_v12 }
 0x39d   : > { %7343 = vmatprep.subr.bf16.mxu1 %v7342_v0  ;;  %v5423_v63 = vsub.f32 %v12388_v18, %v15044_v45  ;;  %v5430_v0 = vsub.f32 %v12397_v4, %v15045_v61  ;;  %v5305_v24 = vand.u32 4294901760, %v5304_v53  ;;  %v15048_v61 = vld [vmem:[#allocation105_spill] sm:$0xff]  ;;  %v15050_v6 = vand.u32 4294901760, %v12417_v49 }
 0x39e   : > { %7589 = vmatpush3.bf16.msra.mxu0 %v12527_v11  ;;  %v5311_v54 = vsub.f32 %v12403_v48, %v15047_v46  ;;  %v5318_v53 = vsub.f32 %v12405_v12, %v15049_v21  ;;  %v15052_v46 = vld [vmem:[#allocation49_spill] sm:$0xff]  ;;  %v7354_v21 = vpack.c.bf16 %v15053_v50, %v12055_v28  ;;  %v15055_v11 = vand.u32 4294901760, %v12435_v31 }
 0x39f   : > { %7591 = vmatprep.subr.bf16.mxu0 %v7590_v7  ;;  %v7596_v7 = vpack.c.bf16 %v5291_v42, %v5284_v57  ;;  %v15051_v42 = vand.u32 4294901760, %v12420_v52  ;;  %v5424_v26 = vand.u32 4294901760, %v5423_v63  ;;  %v5431_v45 = vand.u32 4294901760, %v5430_v0 }
 0x3a0   : > { %7345 = vmatpush1.bf16.msra.mxu1 %v7344_v20  ;;  %v5437_v20 = vsub.f32 %v12417_v49, %v15050_v6  ;;  %v7600_v22 = vpack.c.bf16 %v5305_v24, %v5298_v5  ;;  %v5325_v6 = vsub.f32 %v12433_v30, %v15054_v27  ;;  %v5312_v27 = vand.u32 4294901760, %v5311_v54 }
 0x3a1   : > { %5260 = vmatmul.mubr.f32.vlgmr.msra.gmra.mrb[6].mxu0 %v15046_v16  ;;  %v5444_v57 = vsub.f32 %v12420_v52, %v15051_v42  ;;  %7347 = vmatprep.subr.bf16.mxu1 %v7346_v56  ;;  %v7598_v16 = vpack.c.bf16 %v5417_v40, %v5410_v62  ;;  %v5332_v42 = vsub.f32 %v12435_v31, %v15055_v11  ;;  %v15057_v62 = vand.u32 4294901760, %v12443_v10  ;;  %v15059_v40 = vld [vmem:[#allocation56_spill] sm:$0xff] }
 0x3a2   : > { %7593 = vmatpush3.bf16.msra.mxu0 %v7592_v9  ;;  %5490 = vmatprep.mubr.f32.mxu0 %v15048_v61  ;;  %v7352_v9 = vpack.c.bf16 %v15052_v46, %v12030_v58  ;;  %v5319_v0 = vand.u32 4294901760, %v5318_v53  ;;  %v5438_v5 = vand.u32 4294901760, %v5437_v20  ;;  %v15058_v11 = vand.u32 4294901760, %v12473_v23 }
 0x3a3   : > { %7595 = vmatprep.subr.bf16.mxu0 %v7594_v29  ;;  %v15056_v29 = vand.u32 4294901760, %v12441_v32  ;;  %v5458_v24 = vsub.f32 %v12443_v10, %v15057_v62  ;;  %v5445_v50 = vand.u32 4294901760, %v5444_v57  ;;  %v7356_v63 = vpack.c.bf16 %v15059_v40, %v12092_v36 }
 0x3a4   : > { %7349 = vmatpush1.bf16.msra.mxu1 %v7348_v1  ;;  %v12618_v1 = vsub.f32 %v12473_v23, %v15058_v11  ;;  %v5326_v53 = vand.u32 4294901760, %v5325_v6  ;;  %v5333_v20 = vand.u32 4294901760, %v5332_v42  ;;  %v15062_v23 = vand.u32 4294901760, %v12456_v19 }
 0x3a5   : > { %v5451_v56 = vsub.f32 %v12441_v32, %v15056_v29  ;;  %7351 = vmatprep.subr.bf16.mxu1 %v7350_v55  ;;  %v7602_v29 = vpack.c.bf16 %v5431_v45, %v5424_v26  ;;  %v15061_v55 = vld [vmem:[#allocation63_spill] sm:$0xff]  ;;  %v5459_v46 = vand.u32 4294901760, %v5458_v24  ;;  %v15063_v26 = vand.u32 4294901760, %v12458_v51 }
 0x3a6   : > { %7597 = vmatpush3.bf16.msra.mxu0 %v7596_v7  ;;  %v15060_v7 = vld [vmem:[#allocation59_spill] sm:$0xff]  ;;  %v7604_v11 = vpack.c.bf16 %v5319_v0, %v5312_v27  ;;  %v7606_v62 = vpack.c.bf16 %v5445_v50, %v5438_v5  ;;  %v15067_v27 = vld [vmem:[#allocation68_spill] sm:$0xff]  ;;  %v15068_v0 = vld [vmem:[#allocation81_spill] sm:$0xff] }
 0x3a7   : > { %7599 = vmatprep.subr.bf16.mxu0 %v7598_v16  ;;  %v7358_v54 = vpack.c.bf16 %v15061_v55, %v15060_v7  ;;  %v5452_v57 = vand.u32 4294901760, %v5451_v56  ;;  %v5339_v16 = vsub.f32 %v12456_v19, %v15062_v23  ;;  %v5346_v45 = vsub.f32 %v12458_v51, %v15063_v26  ;;  %v15069_v5 = vld [vmem:[#allocation82_spill] sm:$0xff] }
 0x3a8   : > { %7353 = vmatpush1.bf16.msra.mxu1 %v7352_v9  ;;  %v15064_v9 = vand.u32 4294901760, %v12475_v17  ;;  %v15065_v56 = vand.u32 4294901760, %v12477_v37  ;;  %v7362_v26 = vpack.c.bf16 %v15069_v5, %v15068_v0  ;;  %v15071_v23 = vand.u32 4294901760, %v12498_v35 }
 0x3a9   : > { %7355 = vmatprep.subr.bf16.mxu1 %v7354_v21  ;;  %v15066_v21 = vld [vmem:[#allocation67_spill] sm:$0xff]  ;;  %v7610_v6 = vpack.c.bf16 %v5459_v46, %v5452_v57  ;;  %v5340_v28 = vand.u32 4294901760, %v5339_v16  ;;  %v5347_v55 = vand.u32 4294901760, %v5346_v45  ;;  %v15072_v46 = vand.u32 4294901760, %v12504_v8  ;;  %v15075_v45 = vld [vmem:[#allocation86_spill] sm:$0xff] }
 0x3aa   : > { %7601 = vmatpush3.bf16.msra.mxu0 %v7600_v22  ;;  %v5465_v42 = vsub.f32 %v12475_v17, %v15064_v9  ;;  %v5472_v24 = vsub.f32 %v12477_v37, %v15065_v56  ;;  %v7360_v50 = vpack.c.bf16 %v15067_v27, %v15066_v21  ;;  %v15070_v9 = vand.u32 4294901760, %v12496_v43  ;;  %v15074_v16 = vld [vmem:[#allocation83_spill] sm:$0xff] }
 0x3ab   : > { %7603 = vmatprep.subr.bf16.mxu0 %v7602_v29  ;;  %v7608_v29 = vpack.c.bf16 %v5333_v20, %v5326_v53  ;;  %v5360_v22 = vsub.f32 %v12498_v35, %v15071_v23  ;;  %v13777_v27 = vand.u32 4294901760, %v12530_v44  ;;  %v5479_v20 = vsub.f32 %v12504_v8, %v15072_v46 }
 0x3ac   : > { %7357 = vmatpush1.bf16.msra.mxu1 %v7356_v63  ;;  %v5353_v56 = vsub.f32 %v12496_v43, %v15070_v9  ;;  %v5466_v63 = vand.u32 4294901760, %v5465_v42  ;;  %v5473_v53 = vand.u32 4294901760, %v5472_v24  ;;  %v7612_v23 = vpack.c.bf16 %v5347_v55, %v5340_v28 }
 0x3ad   : > { %7359 = vmatprep.subr.bf16.mxu1 %v7358_v54  ;;  %v15073_v54 = vand.u32 4294901760, %v12506_v3  ;;  %v5361_v21 = vand.u32 4294901760, %v5360_v22  ;;  %v15076_v42 = vand.u32 4294901760, %v12618_v1 }
 0x3ae   : > { %7605 = vmatpush3.bf16.msra.mxu0 %v7604_v11  ;;  %v7364_v11 = vpack.c.bf16 %v15075_v45, %v15074_v16  ;;  %v5354_v9 = vand.u32 4294901760, %v5353_v56  ;;  %v7614_v46 = vpack.c.bf16 %v5473_v53, %v5466_v63  ;;  %v15077_v45 = vld [vmem:[#allocation100_spill] sm:$0xff]  ;;  %v15079_v56 = vld [vmem:[#allocation7_spill] sm:$0xff]  ;;  %v15132_v16 = vld [vmem:[#allocation137_spill] sm:$0xff] }
 0x3af   : > { %7607 = vmatprep.subr.bf16.mxu0 %v7606_v62  ;;  %v5486_v57 = vsub.f32 %v12506_v3, %v15073_v54  ;;  %v5367_v62 = vsub.f32 %v12530_v44, %v13777_v27  ;;  %v5374_v24 = vsub.f32 %v12618_v1, %v15076_v42  ;;  %v5480_v54 = vand.u32 4294901760, %v5479_v20  ;;  %v15080_v27 = vld [vmem:[#allocation109_spill] sm:$0xff]  ;;  %v15082_v53 = vld [vmem:[#allocation91_spill] sm:$0xff] }
 0x3b0   : > { %7361 = vmatpush1.bf16.msra.mxu1 %v7360_v50  ;;  %v7616_v28 = vpack.c.bf16 %v5361_v21, %v5354_v9  ;;  %v7622_v20 = vpack.c.bf16 %v12310_v13, %v15082_v53  ;;  %v15083_v21 = vld [vmem:[#allocation9_spill] sm:$0xff]  ;;  %v15087_v42 = vld [vmem:[#allocation11_spill] sm:$0xff]  ;;  %v15133_v5 = vand.u32 4294901760, %v15132_v16 }
 0x3b1   : > { %7363 = vmatprep.subr.bf16.mxu1 %v7362_v26  ;;  %v5487_v50 = vand.u32 4294901760, %v5486_v57  ;;  %v5368_v55 = vand.u32 4294901760, %v5367_v62  ;;  %v5375_v26 = vand.u32 4294901760, %v5374_v24  ;;  %v15084_v57 = vld [vmem:[#allocation10_spill] sm:$0xff]  ;;  %v15086_v62 = vld [vmem:[#allocation104_spill] sm:$0xff]  ;;  %v15088_v24 = vld [vmem:[#allocation107_spill] sm:$0xff] }
 0x3b2   : > { %7609 = vmatpush3.bf16.msra.mxu0 %v7608_v29  ;;  %v15078_v29 = vld [vmem:[#allocation106_spill] sm:$0xff] }
 0x3b3   : > { %7611 = vmatprep.subr.bf16.mxu0 %v7610_v6  ;;  %v7618_v22 = vpack.c.bf16 %v5487_v50, %v5480_v54  ;;  %v15081_v6 = vld [vmem:[#allocation8_spill] sm:$0xff]  ;;  %v7620_v63 = vpack.c.bf16 %v5375_v26, %v5368_v55  ;;  %v7630_v50 = vpack.c.bf16 %v12367_v34, %v12359_v2  ;;  %v7632_v26 = vpack.c.bf16 %v12375_v41, %v12373_v59 }
 0x3b4   : > { %7365 = vmatpush1.bf16.msra.mxu1 %v7364_v11  ;;  %v7624_v11 = vpack.c.bf16 %v12314_v15, %v12312_v25  ;;  %v15089_v54 = vld [vmem:[#allocation12_spill] sm:$0xff] }
 0x3b5   : > { %7367 = vmatprep.subr.bf16.mxu1 %v15077_v45  ;;  %v15091_v55 = vld [vmem:[#allocation16_spill] sm:$0xff] }
 0x3b6   : > { %7613 = vmatpush3.bf16.msra.mxu0 %v7612_v23  ;;  %v15085_v23 = vld [vmem:[#allocation97_spill] sm:$0xff]  ;;  %v15130_v45 = vld [vmem:[#allocation156_spill] sm:$0xff] }
 0x3b7   : > { %7615 = vmatprep.subr.bf16.mxu0 %v7614_v46  ;;  %4604 = vmatmul.mubr.f32.vlgmr.msra.gmra.mrb[2].mxu1 %v15078_v29  ;;  %v7626_v9 = vpack.c.bf16 %v15085_v23, %v12327_v47  ;;  %v7628_v46 = vpack.c.bf16 %v12346_v39, %v12342_v38 }
 0x3b8   : > { %7369 = vmatpush1.bf16.msra.mxu1 %v15079_v56  ;;  %4741 = vmatprep.mubr.f32.mxu1 %v15080_v27 }
 0x3b9   : > { %7371 = vmatprep.subr.bf16.mxu1 %v15081_v6  ;;  %v15128_v6 = vld [vmem:[#allocation22_spill] sm:$0xff] }
 0x3ba   : > { %7617 = vmatpush3.bf16.msra.mxu0 %v7616_v28  ;;  %v15090_v28 = vld [vmem:[#allocation15_spill] sm:$0xff] }
 0x3bb   : > { %7619 = vmatprep.subr.bf16.mxu0 %v7618_v22  ;;  %v7634_v22 = vpack.c.bf16 %v12397_v4, %v12388_v18 }
 0x3bc   : > { %7373 = vmatpush1.bf16.msra.mxu1 %v15083_v21 }
 0x3bd   : > { %7375 = vmatprep.subr.bf16.mxu1 %v15084_v57  ;;  %v15125_v57 = vld [vmem:[#allocation29_spill] sm:$0xff] }
 0x3be   : > { %7621 = vmatpush3.bf16.msra.mxu0 %v7620_v63  ;;  %v15092_v63 = vld [vmem:[#allocation102_spill] sm:$0xff] }
 0x3bf   : > { %7623 = vmatprep.subr.bf16.mxu0 %v7622_v20  ;;  %v15093_v20 = vld [vmem:[#allocation103_spill] sm:$0xff] }
 0x3c0   : > { %7377 = vmatpush1.bf16.msra.mxu1 %v15087_v42  ;;  %v15096_v42 = vld [vmem:[#allocation18_spill] sm:$0xff] }
 0x3c1   : > { %5492 = vmatmul.mubr.f32.vlgmr.msra.gmra.mrb[8].mxu0 %v15086_v62  ;;  %7379 = vmatprep.subr.bf16.mxu1 %v15089_v54 }
 0x3c2   : > { %7625 = vmatpush3.bf16.msra.mxu0 %v7624_v11  ;;  %5627 = vmatprep.mubr.f32.mxu0 %v15088_v24  ;;  %v7636_v11 = vpack.c.bf16 %v12405_v12, %v12403_v48  ;;  %v7638_v24 = vpack.c.bf16 %v12420_v52, %v12417_v49 }
 0x3c3   : > { %7627 = vmatprep.subr.bf16.mxu0 %v7626_v9  ;;  %v2580_v9 = vpop.f32.mrb[0].mxu1 }
 0x3c4   : > { %7381 = vmatpush1.bf16.msra.mxu1 %v15090_v28  ;;  %v15095_v28 = vld [vmem:[#allocation6_spill] sm:$0xff] }
 0x3c5   : > { %7383 = vmatprep.subr.bf16.mxu1 %v15091_v55  ;;  %v2582_v55 = vpop.f32.mrb[1].mxu1 }
 0x3c6   : > { %7629 = vmatpush3.bf16.msra.mxu0 %v7628_v46  ;;  %v15094_v46 = vld [vmem:[#allocation5_spill] sm:$0xff]  ;;  %v7751_v54 = vadd.f32 %v2582_v55, %v15095_v28  ;;  %v15099_v28 = vld [vmem:[#allocation136_spill] sm:$0xff]  ;;  %v7644_v55 = vpack.c.bf16 %v12458_v51, %v12456_v19 }
 0x3c7   : > { %7631 = vmatprep.subr.bf16.mxu0 %v7630_v50  ;;  %v7750_v50 = vadd.f32 %v2580_v9, %v15094_v46  ;;  %v7642_v9 = vpack.c.bf16 %v12443_v10, %v12441_v32  ;;  %v15098_v46 = vld [vmem:[#allocation135_spill] sm:$0xff] }
 0x3c8   : > { %7385 = vmatpush1.bf16.msra.mxu1 %v15092_v63  ;;  %6016 = vst [vmem:[%s12707_s8 + $0x8] sm:$0xff] %v7751_v54  ;;  %v15101_v54 = vld [vmem:[#allocation28_spill] sm:$0xff]  ;;  %v15123_v63 = vld [vmem:[#allocation26_spill] sm:$0xff] }
 0x3c9   : > { %7387 = vmatprep.subr.bf16.mxu1 %v15093_v20  ;;  %6015 = vst [vmem:[%s12707_s8] sm:$0xff] %v7750_v50  ;;  %v15100_v50 = vld [vmem:[#allocation27_spill] sm:$0xff]  ;;  %v15121_v20 = vld [vmem:[#allocation17_spill] sm:$0xff] }
 0x3ca   : > { %7633 = vmatpush3.bf16.msra.mxu0 %v7632_v26  ;;  %v15097_v26 = vld [vmem:[#allocation19_spill] sm:$0xff] }
 0x3cb   : > { %7635 = vmatprep.subr.bf16.mxu0 %v7634_v22  ;;  %v7640_v22 = vpack.c.bf16 %v12435_v31, %v12433_v30 }
 0x3cc   : > { %7389 = vmatpush1.bf16.msra.mxu1 %v15096_v42  ;;  %v15118_v42 = vld [vmem:[#allocation140_spill] sm:$0xff] }
 0x3cd   : > { %7391 = vmatprep.subr.bf16.mxu1 %v15097_v26  ;;  %v15108_v26 = vld [vmem:[#allocation95_spill] sm:$0xff] }
 0x3ce   : > { %7637 = vmatpush3.bf16.msra.mxu0 %v7636_v11  ;;  %v7646_v11 = vpack.c.bf16 %v12477_v37, %v12475_v17 }
 0x3cf   : > { %7639 = vmatprep.subr.bf16.mxu0 %v7638_v24  ;;  %v7648_v24 = vpack.c.bf16 %v12498_v35, %v12496_v43 }
 0x3d0   : > { %7393 = vmatpush1.bf16.msra.mxu1 %v15098_v46  ;;  %v15103_v46 = vld [vmem:[#allocation39_spill] sm:$0xff] }
 0x3d1   : > { %7395 = vmatprep.subr.bf16.mxu1 %v15099_v28  ;;  %v15102_v28 = vld [vmem:[#allocation36_spill] sm:$0xff] }
 0x3d2   : > { %7641 = vmatpush3.bf16.msra.mxu0 %v7640_v22  ;;  %v7650_v22 = vpack.c.bf16 %v12506_v3, %v12504_v8 }
 0x3d3   : > { %7643 = vmatprep.subr.bf16.mxu0 %v7642_v9  ;;  %v7652_v9 = vpack.c.bf16 %v12618_v1, %v12530_v44 }
 0x3d4   : > { %7397 = vmatpush1.bf16.msra.mxu1 %v15100_v50  ;;  %v15104_v50 = vld [vmem:[#allocation48_spill] sm:$0xff] }
 0x3d5   : > { %7399 = vmatprep.subr.bf16.mxu1 %v15101_v54  ;;  %v15106_v54 = vld [vmem:[#allocation89_spill] sm:$0xff] }
 0x3d6   : > { %7645 = vmatpush3.bf16.msra.mxu0 %v7644_v55  ;;  %v15105_v55 = vld [vmem:[#allocation51_spill] sm:$0xff] }
 0x3d7   : > { %7647 = vmatprep.subr.bf16.mxu0 %v7646_v11  ;;  %v15107_v11 = vld [vmem:[#allocation124_spill] sm:$0xff] }
 0x3d8   : > { %7401 = vmatpush1.bf16.msra.mxu1 %v15102_v28  ;;  %v15115_v28 = vld [vmem:[#allocation85_spill] sm:$0xff] }
 0x3d9   : > { %7403 = vmatprep.subr.bf16.mxu1 %v15103_v46  ;;  %v15110_v46 = vld [vmem:[#allocation96_spill] sm:$0xff] }
 0x3da   : > { %7649 = vmatpush3.bf16.msra.mxu0 %v7648_v24  ;;  %v15109_v24 = vld [vmem:[#allocation62_spill] sm:$0xff] }
 0x3db   : > { %7651 = vmatprep.subr.bf16.mxu0 %v7650_v22  ;;  %v15111_v22 = vld [vmem:[#allocation72_spill] sm:$0xff] }
 0x3dc   : > { %7405 = vmatpush1.bf16.msra.mxu1 %v15104_v50  ;;  %v15112_v50 = vld [vmem:[#allocation98_spill] sm:$0xff] }
 0x3dd   : > { %7407 = vmatprep.subr.bf16.mxu1 %v15105_v55  ;;  %v15114_v55 = vld [vmem:[#allocation99_spill] sm:$0xff] }
 0x3de   : > { %7653 = vmatpush3.bf16.msra.mxu0 %v7652_v9  ;;  %v15113_v9 = vld [vmem:[#allocation73_spill] sm:$0xff] }
 0x3df   : > { %7655 = vmatprep.subr.bf16.mxu0 %v15106_v54 }
 0x3e0   : > { %7409 = vmatpush1.bf16.msra.mxu1 %v15107_v11  ;;  %v15117_v11 = vld [vmem:[#allocation90_spill] sm:$0xff] }
 0x3e1   : > { %5630 = vmatmul.mubr.f32.vlgmr.msra.gmra.mrb[10].mxu0 %v15078_v29  ;;  %7411 = vmatprep.subr.bf16.mxu1 %v15109_v24  ;;  %v15116_v29 = vld [vmem:[#allocation139_spill] sm:$0xff]  ;;  %v15120_v24 = vld [vmem:[#allocation146_spill] sm:$0xff] }
 0x3e2   : > { %7657 = vmatpush3.bf16.msra.mxu0 %v15108_v26  ;;  %5734 = vmatprep.mubr.f32.mxu0 %v15080_v27  ;;  %v15119_v27 = vld [vmem:[#allocation14_spill] sm:$0xff] }
 0x3e3   : > { %7659 = vmatprep.subr.bf16.mxu0 %v15110_v46 }
 0x3e4   : > { %7413 = vmatpush1.bf16.msra.mxu1 %v15111_v22  ;;  %v15122_v22 = vld [vmem:[#allocation148_spill] sm:$0xff] }
 0x3e5   : > { %7415 = vmatprep.subr.bf16.mxu1 %v15113_v9  ;;  %v15124_v9 = vld [vmem:[#allocation155_spill] sm:$0xff] }
 0x3e6   : > { %7661 = vmatpush3.bf16.msra.mxu0 %v15112_v50 }
 0x3e7   : > { %7663 = vmatprep.subr.bf16.mxu0 %v15114_v55 }
 0x3e8   : > { %7417 = vmatpush1.bf16.msra.mxu1 %v15115_v28  ;;  %v15126_v28 = vld [vmem:[#allocation21_spill] sm:$0xff] }
 0x3e9   : > { %7419 = vmatprep.subr.bf16.mxu1 %v15117_v11  ;;  %v15127_v21 = vand.u32 4294901760, %v15126_v28  ;;  %v15129_v11 = vand.u32 4294901760, %v15128_v6  ;;  %v15141_v6 = vld [vmem:[#allocation108_spill] sm:$0xff] }
 0x3ea   : > { %7665 = vmatpush3.bf16.msra.mxu0 %v15116_v29 }
 0x3eb   : > { %7667 = vmatprep.subr.bf16.mxu0 %v15118_v42  ;;  %v7430_v56 = vpack.c.bf16 %v15129_v11, %v15127_v21  ;;  %v15142_v21 = vld [vmem:[#allocation143_spill] sm:$0xff]  ;;  %v15144_v11 = vld [vmem:[#allocation30_spill] sm:$0xff] }
 0x3ec   : > { %7421 = vmatpush1.bf16.msra.mxu1 %v15119_v27  ;;  %v15131_v27 = vld [vmem:[#allocation33_spill] sm:$0xff]  ;;  %v15143_v16 = vand.u32 4294901760, %v15142_v21 }
 0x3ed   : > { %7423 = vmatprep.subr.bf16.mxu1 %v15121_v20  ;;  %v15134_v20 = vld [vmem:[#allocation138_spill] sm:$0xff]  ;;  %v15152_v21 = vld [vmem:[#allocation145_spill] sm:$0xff] }
 0x3ee   : > { %7669 = vmatpush3.bf16.msra.mxu0 %v15120_v24  ;;  %v15135_v0 = vand.u32 4294901760, %v15134_v20  ;;  %v15136_v24 = vld [vmem:[#allocation159_spill] sm:$0xff]  ;;  %v15145_v20 = vand.u32 4294901760, %v15144_v11  ;;  %v15154_v11 = vld [vmem:[#allocation32_spill] sm:$0xff] }
 0x3ef   : > { %7671 = vmatprep.subr.bf16.mxu0 %v15122_v22 }
 0x3f0   : > { %7425 = vmatpush1.bf16.msra.mxu1 %v15123_v63  ;;  %v7432_v22 = vpack.c.bf16 %v15135_v0, %v15133_v5  ;;  %v15137_v63 = vld [vmem:[#allocation23_spill] sm:$0xff]  ;;  %v7436_v0 = vpack.c.bf16 %v15145_v20, %v15143_v16  ;;  %v15155_v16 = vand.u32 4294901760, %v15154_v11 }
 0x3f1   : > { %7427 = vmatprep.subr.bf16.mxu1 %v15125_v57  ;;  %v15139_v57 = vld [vmem:[#allocation24_spill] sm:$0xff]  ;;  %v15146_v5 = vld [vmem:[#allocation31_spill] sm:$0xff] }
 0x3f2   : > { %7673 = vmatpush3.bf16.msra.mxu0 %v15124_v9  ;;  %v15138_v9 = vand.u32 4294901760, %v15137_v63  ;;  %v15140_v42 = vand.u32 4294901760, %v15139_v57  ;;  %v15148_v63 = vld [vmem:[#allocation144_spill] sm:$0xff] }
 0x3f3   : > { %7675 = vmatprep.subr.bf16.mxu0 %v15130_v45  ;;  %v15149_v57 = vand.u32 4294901760, %v15148_v63  ;;  %v15159_v63 = vld [vmem:[#allocation34_spill] sm:$0xff] }
 0x3f4   : > { %7429 = vmatpush1.bf16.msra.mxu1 %v15131_v27  ;;  %v7434_v28 = vpack.c.bf16 %v15140_v42, %v15138_v9  ;;  %v15150_v9 = vand.u32 4294901760, %v15082_v53  ;;  %v15160_v53 = vand.u32 4294901760, %v15159_v63 }
 0x3f5   : > { %7431 = vmatprep.subr.bf16.mxu1 %v7430_v56  ;;  %v15147_v56 = vand.u32 4294901760, %v15146_v5  ;;  %v15158_v5 = vand.u32 4294901760, %v12314_v15 }
 0x3f6   : > { %7677 = vmatpush3.bf16.msra.mxu0 %v15136_v24 }
 0x3f7   : > { %7679 = vmatprep.subr.bf16.mxu0 %v12465_v60  ;;  %4745 = vmatmul.mubr.f32.vlgmr.msra.gmra.mrb[2].mxu1 %v15141_v6  ;;  %v7438_v42 = vpack.c.bf16 %v15149_v57, %v15147_v56  ;;  %v15153_v60 = vand.u32 4294901760, %v15152_v21  ;;  %v15161_v57 = vld [vmem:[#allocation35_spill] sm:$0xff] }
 0x3f8   : > { %7433 = vmatpush1.bf16.msra.mxu1 %v7432_v22  ;;  %5008 = vmatprep.mubr.f32.mxu1 %v15048_v61  ;;  %v15151_v22 = vand.u32 4294901760, %v12310_v13  ;;  %v15162_v13 = vand.u32 4294901760, %v15161_v57 }
 0x3f9   : > { %7435 = vmatprep.subr.bf16.mxu1 %v7434_v28  ;;  %v7440_v20 = vpack.c.bf16 %v15155_v16, %v15153_v60  ;;  %v15157_v28 = vand.u32 4294901760, %v12312_v25  ;;  %v15165_v60 = vld [vmem:[#allocation40_spill] sm:$0xff]  ;;  %v15167_v25 = vld [vmem:[#allocation149_spill] sm:$0xff]  ;;  %v15170_v16 = vand.u32 4294901760, %v12346_v39  ;;  %v15181_v39 = vand.u32 4294901760, %v12373_v59 }
 0x3fa   : > { %7681 = vmatpush3.bf16.msra.mxu0 %v12483_v33  ;;  %v7686_v27 = vpack.c.bf16 %v15151_v22, %v15150_v9  ;;  %v15156_v33 = vld [vmem:[#allocation162_spill] sm:$0xff]  ;;  %v7442_v9 = vpack.c.bf16 %v15162_v13, %v15160_v53  ;;  %v15164_v22 = vand.u32 4294901760, %v15085_v23  ;;  %v15168_v11 = vand.u32 4294901760, %v15167_v25  ;;  %v15173_v23 = vld [vmem:[#allocation41_spill] sm:$0xff]  ;;  %v15185_v25 = vld [vmem:[#allocation47_spill] sm:$0xff] }
 0x3fb   : > { %7683 = vmatprep.subr.bf16.mxu0 %v12502_v14  ;;  %v7688_v56 = vpack.c.bf16 %v15158_v5, %v15157_v28  ;;  %v15174_v63 = vand.u32 4294901760, %v15173_v23  ;;  %v15194_v23 = vand.u32 4294901760, %v12405_v12  ;;  %v15205_v12 = vand.u32 4294901760, %v12433_v30 }
 0x3fc   : > { %7437 = vmatpush1.bf16.msra.mxu1 %v7436_v0  ;;  %v15163_v0 = vand.u32 4294901760, %v12327_v47  ;;  %v15171_v47 = vld [vmem:[#allocation154_spill] sm:$0xff] }
 0x3fd   : > { %7439 = vmatprep.subr.bf16.mxu1 %v7438_v42  ;;  %v15166_v42 = vand.u32 4294901760, %v15165_v60  ;;  %v15172_v5 = vand.u32 4294901760, %v15171_v47  ;;  %v15182_v60 = vand.u32 4294901760, %v12375_v41  ;;  %v15191_v47 = vld [vmem:[#allocation54_spill] sm:$0xff]  ;;  %v15193_v41 = vand.u32 4294901760, %v12403_v48 }
 0x3fe   : > { %7685 = vmatpush3.bf16.msra.mxu0 %v15156_v33  ;;  %v7690_v21 = vpack.c.bf16 %v15164_v22, %v15163_v0  ;;  %v15179_v0 = vld [vmem:[#allocation45_spill] sm:$0xff] }
 0x3ff   : > { %7687 = vmatprep.subr.bf16.mxu0 %v7686_v27  ;;  %v7444_v15 = vpack.c.bf16 %v15168_v11, %v15166_v42  ;;  %v15169_v27 = vand.u32 4294901760, %v12342_v38  ;;  %v7446_v53 = vpack.c.bf16 %v15174_v63, %v15172_v5  ;;  %v15180_v38 = vand.u32 4294901760, %v15179_v0  ;;  %v15201_v0 = vld [vmem:[#allocation58_spill] sm:$0xff] }
 0x400   : > { %7441 = vmatpush1.bf16.msra.mxu1 %v7440_v20  ;;  %v15176_v20 = vand.u32 4294901760, %v12367_v34  ;;  %v7696_v42 = vpack.c.bf16 %v15182_v60, %v15181_v39  ;;  %v15187_v34 = vand.u32 4294901760, %v12388_v18  ;;  %v15192_v5 = vand.u32 4294901760, %v15191_v47 }
 0x401   : > { %5738 = vmatmul.mubr.f32.vlgmr.msra.gmra.mrb[12].mxu0 %v15141_v6  ;;  %v7692_v28 = vpack.c.bf16 %v15170_v16, %v15169_v27  ;;  %7443 = vmatprep.subr.bf16.mxu1 %v7442_v9  ;;  %v15175_v6 = vand.u32 4294901760, %v12359_v2  ;;  %v15183_v9 = vld [vmem:[#allocation46_spill] sm:$0xff]  ;;  %v15186_v2 = vand.u32 4294901760, %v15185_v25  ;;  %v15189_v16 = vld [vmem:[#allocation52_spill] sm:$0xff]  ;;  %v7700_v63 = vpack.c.bf16 %v15194_v23, %v15193_v41 }
 0x402   : > { %7689 = vmatpush3.bf16.msra.mxu0 %v7688_v56  ;;  %5904 = vmatprep.mubr.f32.mxu0 %v15048_v61  ;;  %v15177_v56 = vld [vmem:[#allocation43_spill] sm:$0xff]  ;;  %v15206_v60 = vand.u32 4294901760, %v12435_v31  ;;  %v15209_v25 = vld [vmem:[#allocation174_spill] sm:$0xff]  ;;  %v15217_v31 = vand.u32 4294901760, %v12456_v19  ;;  %v15218_v47 = vand.u32 4294901760, %v12458_v51  ;;  %v15229_v51 = vand.u32 4294901760, %v12496_v43 }
 0x403   : > { %7691 = vmatprep.subr.bf16.mxu0 %v7690_v21  ;;  %v7694_v57 = vpack.c.bf16 %v15176_v20, %v15175_v6  ;;  %v15178_v13 = vand.u32 4294901760, %v15177_v56  ;;  %v15184_v21 = vand.u32 4294901760, %v15183_v9  ;;  %v15197_v20 = vld [vmem:[#allocation57_spill] sm:$0xff]  ;;  %v15200_v56 = vand.u32 4294901760, %v12420_v52  ;;  %v15221_v23 = vld [vmem:[#allocation66_spill] sm:$0xff] }
 0x404   : > { %7445 = vmatpush1.bf16.msra.mxu1 %v7444_v15  ;;  %v15188_v15 = vand.u32 4294901760, %v12397_v4  ;;  %v15198_v18 = vand.u32 4294901760, %v15197_v20  ;;  %v15199_v4 = vand.u32 4294901760, %v12417_v49  ;;  %v15207_v9 = vld [vmem:[#allocation61_spill] sm:$0xff]  ;;  %v15210_v49 = vand.u32 4294901760, %v15209_v25 }
 0x405   : > { %v7448_v22 = vpack.c.bf16 %v15180_v38, %v15178_v13  ;;  %7447 = vmatprep.subr.bf16.mxu1 %v7446_v53  ;;  %v7450_v11 = vpack.c.bf16 %v15186_v2, %v15184_v21  ;;  %v15195_v53 = vld [vmem:[#allocation55_spill] sm:$0xff]  ;;  %v15202_v38 = vand.u32 4294901760, %v15201_v0  ;;  %v15208_v21 = vand.u32 4294901760, %v15207_v9  ;;  %v15225_v20 = vld [vmem:[#allocation69_spill] sm:$0xff]  ;;  %v15231_v0 = vld [vmem:[#allocation130_spill] sm:$0xff] }
 0x406   : > { %7693 = vmatpush3.bf16.msra.mxu0 %v7692_v28  ;;  %v7698_v27 = vpack.c.bf16 %v15188_v15, %v15187_v34  ;;  %v15190_v28 = vand.u32 4294901760, %v15189_v16  ;;  %v15196_v6 = vand.u32 4294901760, %v15195_v53  ;;  %v7702_v13 = vpack.c.bf16 %v15200_v56, %v15199_v4  ;;  %v15213_v15 = vld [vmem:[#allocation64_spill] sm:$0xff]  ;;  %v15215_v16 = vld [vmem:[#allocation125_spill] sm:$0xff] }
 0x407   : > { %7695 = vmatprep.subr.bf16.mxu0 %v7694_v57  ;;  %v7458_v2 = vpack.c.bf16 %v15210_v49, %v15208_v21  ;;  %v15211_v52 = vand.u32 4294901760, %v12441_v32  ;;  %v15222_v32 = vand.u32 4294901760, %v15221_v23  ;;  %v15224_v53 = vand.u32 4294901760, %v12477_v37  ;;  %v15239_v9 = vld [vmem:[#allocation76_spill] sm:$0xff] }
 0x408   : > { %7449 = vmatpush1.bf16.msra.mxu1 %v7448_v22  ;;  %v7452_v59 = vpack.c.bf16 %v15192_v5, %v15190_v28  ;;  %v7454_v57 = vpack.c.bf16 %v15198_v18, %v15196_v6  ;;  %v15203_v22 = vld [vmem:[#allocation60_spill] sm:$0xff]  ;;  %v15216_v28 = vand.u32 4294901760, %v15215_v16  ;;  %v7708_v5 = vpack.c.bf16 %v15218_v47, %v15217_v31 }
 0x409   : > { %7451 = vmatprep.subr.bf16.mxu1 %v7450_v11  ;;  %v15204_v39 = vand.u32 4294901760, %v15203_v22  ;;  %v15212_v11 = vand.u32 4294901760, %v12443_v10  ;;  %v15223_v10 = vand.u32 4294901760, %v12475_v17  ;;  %v15226_v18 = vand.u32 4294901760, %v15225_v20  ;;  %v15233_v22 = vld [vmem:[#allocation71_spill] sm:$0xff] }
 0x40a   : > { %7697 = vmatpush3.bf16.msra.mxu0 %v7696_v42  ;;  %v7704_v42 = vpack.c.bf16 %v15206_v60, %v15205_v12  ;;  %v15230_v56 = vand.u32 4294901760, %v12498_v35  ;;  %v15234_v17 = vand.u32 4294901760, %v15233_v22  ;;  %v15235_v37 = vand.u32 4294901760, %v12504_v8  ;;  %v15237_v60 = vld [vmem:[#allocation75_spill] sm:$0xff] }
 0x40b   : > { %7699 = vmatprep.subr.bf16.mxu0 %v7698_v27  ;;  %v7456_v48 = vpack.c.bf16 %v15204_v39, %v15202_v38  ;;  %v7706_v34 = vpack.c.bf16 %v15212_v11, %v15211_v52  ;;  %v15214_v27 = vand.u32 4294901760, %v15213_v15  ;;  %v7710_v6 = vpack.c.bf16 %v15224_v53, %v15223_v10  ;;  %v15245_v11 = vld [vmem:[#allocation79_spill] sm:$0xff] }
 0x40c   : > { %7453 = vmatpush1.bf16.msra.mxu1 %v7452_v59  ;;  %v15219_v59 = vld [vmem:[#allocation65_spill] sm:$0xff]  ;;  %v15232_v38 = vand.u32 4294901760, %v15231_v0  ;;  %v15240_v21 = vand.u32 4294901760, %v15239_v9  ;;  %v15241_v35 = vand.u32 4294901760, %v12530_v44  ;;  %v15242_v25 = vand.u32 4294901760, %v12618_v1  ;;  %v15251_v44 = vld [vmem:[#allocation94_spill] sm:$0xff] }
 0x40d   : > { %7455 = vmatprep.subr.bf16.mxu1 %v7454_v57  ;;  %v7460_v30 = vpack.c.bf16 %v15216_v28, %v15214_v27  ;;  %v15220_v41 = vand.u32 4294901760, %v15219_v59  ;;  %v15227_v57 = vld [vmem:[#allocation70_spill] sm:$0xff]  ;;  %v15246_v8 = vand.u32 4294901760, %v15245_v11  ;;  %v15249_v27 = vld [vmem:[#allocation84_spill] sm:$0xff]  ;;  %v15253_v1 = vld [vmem:[#allocation13_spill] sm:$0xff]  ;;  %v15263_v20 = vand.u32 4294901760, %v12030_v58 }
 0x40e   : > { %7701 = vmatpush3.bf16.msra.mxu0 %v7700_v63  ;;  %v15228_v4 = vand.u32 4294901760, %v15227_v57  ;;  %v7466_v39 = vpack.c.bf16 %v15234_v17, %v15232_v38  ;;  %v7716_v49 = vpack.c.bf16 %v15242_v25, %v15241_v35  ;;  %v15250_v16 = vand.u32 4294901760, %v15249_v27  ;;  %v15288_v25 = vld [vmem:[#allocation86_spill] sm:$0xff]  ;;  %v15291_v11 = vld [vmem:[#allocation100_spill] sm:$0xff]  ;;  %v15298_v27 = vld [vmem:[#allocation11_spill] sm:$0xff] }
 0x40f   : > { %7703 = vmatprep.subr.bf16.mxu0 %v7702_v13  ;;  %v7462_v63 = vpack.c.bf16 %v15222_v32, %v15220_v41  ;;  %v7712_v13 = vpack.c.bf16 %v15230_v56, %v15229_v51  ;;  %v15254_v31 = vand.u32 4294901760, %v15253_v1  ;;  %v15257_v41 = vld [vmem:[#allocation38_spill] sm:$0xff]  ;;  %v15268_v51 = vld [vmem:[#allocation53_spill] sm:$0xff]  ;;  %v15270_v0 = vand.u32 4294901760, %v12092_v36  ;;  %v15306_v1 = vld [vmem:[#allocation135_spill] sm:$0xff] }
 0x410   : > { %7457 = vmatpush1.bf16.msra.mxu1 %v7456_v48  ;;  %v7464_v19 = vpack.c.bf16 %v15228_v4, %v15226_v18  ;;  %v15236_v48 = vand.u32 4294901760, %v12506_v3  ;;  %v15247_v3 = vld [vmem:[#allocation80_spill] sm:$0xff]  ;;  %v15258_v23 = vand.u32 4294901760, %v15257_v41  ;;  %v15264_v18 = vld [vmem:[#allocation49_spill] sm:$0xff]  ;;  %v15269_v56 = vand.u32 4294901760, %v15268_v51  ;;  %v15280_v36 = vld [vmem:[#allocation146_spill] sm:$0xff] }
 0x411   : > { %7459 = vmatprep.subr.bf16.mxu1 %v7458_v2  ;;  %v15243_v2 = vld [vmem:[#allocation185_spill] sm:$0xff]  ;;  %v15248_v15 = vand.u32 4294901760, %v15247_v3  ;;  %v15265_v57 = vand.u32 4294901760, %v15264_v18  ;;  %v15272_v58 = vand.u32 4294901760, %v15060_v7  ;;  %v15285_v7 = vld [vmem:[#allocation148_spill] sm:$0xff] }
 0x412   : > { %7705 = vmatpush3.bf16.msra.mxu0 %v7704_v42  ;;  %v7714_v12 = vpack.c.bf16 %v15236_v48, %v15235_v37  ;;  %v15238_v42 = vand.u32 4294901760, %v15237_v60  ;;  %v15244_v52 = vand.u32 4294901760, %v15243_v2  ;;  %v15276_v37 = vld [vmem:[#allocation67_spill] sm:$0xff]  ;;  %v15294_v3 = vld [vmem:[#allocation161_spill] sm:$0xff]  ;;  %v15309_v41 = vld [vmem:[#allocation28_spill] sm:$0xff] }
 0x413   : > { %7707 = vmatprep.subr.bf16.mxu0 %v7706_v34  ;;  %v7472_v28 = vpack.c.bf16 %v15250_v16, %v15248_v15  ;;  %v7480_v4 = vpack.c.bf16 %v15265_v57, %v15263_v20  ;;  %v15277_v48 = vand.u32 4294901760, %v15276_v37  ;;  %v15295_v15 = vld [vmem:[#allocation8_spill] sm:$0xff]  ;;  %v15317_v20 = vld [vmem:[#allocation73_spill] sm:$0xff]  ;;  %v15319_v57 = vld [vmem:[#allocation90_spill] sm:$0xff] }
 0x414   : > { %7461 = vmatpush1.bf16.msra.mxu1 %v7460_v30  ;;  %v7468_v43 = vpack.c.bf16 %v15240_v21, %v15238_v42  ;;  %v7470_v34 = vpack.c.bf16 %v15246_v8, %v15244_v52  ;;  %v15252_v30 = vand.u32 4294901760, %v15251_v44  ;;  %v15290_v52 = vld [vmem:[#allocation155_spill] sm:$0xff]  ;;  %v15292_v8 = vld [vmem:[#allocation160_spill] sm:$0xff]  ;;  %v15302_v44 = vld [vmem:[#allocation102_spill] sm:$0xff] }
 0x415   : > { %7463 = vmatprep.subr.bf16.mxu1 %v7462_v63  ;;  %v15259_v63 = vld [vmem:[#allocation42_spill] sm:$0xff]  ;;  %v15299_v16 = vld [vmem:[#allocation12_spill] sm:$0xff]  ;;  %v15318_v18 = vld [vmem:[#allocation85_spill] sm:$0xff] }
 0x416   : > { %7709 = vmatpush3.bf16.msra.mxu0 %v7708_v5  ;;  %v7474_v47 = vpack.c.bf16 %v15254_v31, %v15252_v30  ;;  %v15255_v5 = vld [vmem:[#allocation37_spill] sm:$0xff]  ;;  %v15260_v10 = vand.u32 4294901760, %v15259_v63  ;;  %v15304_v30 = vld [vmem:[#allocation18_spill] sm:$0xff]  ;;  %v15307_v31 = vld [vmem:[#allocation136_spill] sm:$0xff] }
 0x417   : > { %7711 = vmatprep.subr.bf16.mxu0 %v7710_v6  ;;  %v15256_v59 = vand.u32 4294901760, %v15255_v5  ;;  %v15312_v63 = vld [vmem:[#allocation48_spill] sm:$0xff]  ;;  %v15323_v51 = vld [vmem:[#allocation29_spill] sm:$0xff] }
 0x418   : > { %7465 = vmatpush1.bf16.msra.mxu1 %v7464_v19 }
 0x419   : > { %7467 = vmatprep.subr.bf16.mxu1 %v7466_v39  ;;  %v7476_v32 = vpack.c.bf16 %v15258_v23, %v15256_v59  ;;  %v15275_v39 = vld [vmem:[#allocation140_spill] sm:$0xff]  ;;  %v15308_v59 = vld [vmem:[#allocation27_spill] sm:$0xff] }
 0x41a   : > { %7713 = vmatpush3.bf16.msra.mxu0 %v7712_v13  ;;  %v15310_v23 = vld [vmem:[#allocation36_spill] sm:$0xff] }
 0x41b   : > { %7715 = vmatprep.subr.bf16.mxu0 %v7714_v12 }
 0x41c   : > { %7469 = vmatpush1.bf16.msra.mxu1 %v7468_v43  ;;  %v15286_v43 = vld [vmem:[#allocation83_spill] sm:$0xff] }
 0x41d   : > { %7471 = vmatprep.subr.bf16.mxu1 %v7470_v34  ;;  %v15287_v35 = vand.u32 4294901760, %v15286_v43  ;;  %v15293_v34 = vld [vmem:[#allocation7_spill] sm:$0xff] }
 0x41e   : > { %7717 = vmatpush3.bf16.msra.mxu0 %v7716_v49  ;;  %v15289_v49 = vand.u32 4294901760, %v15288_v25 }
 0x41f   : > { %7719 = vmatprep.subr.bf16.mxu0 %v15106_v54  ;;  %v15261_v54 = vld [vmem:[#allocation44_spill] sm:$0xff] }
 0x420   : > { %7473 = vmatpush1.bf16.msra.mxu1 %v7472_v28  ;;  %v15262_v53 = vand.u32 4294901760, %v15261_v54  ;;  %v7492_v2 = vpack.c.bf16 %v15289_v49, %v15287_v35  ;;  %v15301_v28 = vld [vmem:[#allocation16_spill] sm:$0xff] }
 0x421   : > { %5906 = vmatmul.mubr.f32.vlgmr.msra.gmra.mrb[14].mxu0 %v15086_v62  ;;  %7475 = vmatprep.subr.bf16.mxu1 %v7474_v47  ;;  %v15314_v54 = vld [vmem:[#allocation124_spill] sm:$0xff] }
 0x422   : > { %7721 = vmatpush3.bf16.msra.mxu0 %v15108_v26  ;;  %6008 = vmatprep.mubr.f32.mxu0 %v15048_v61  ;;  %v7478_v6 = vpack.c.bf16 %v15262_v53, %v15260_v10  ;;  %v15266_v26 = vld [vmem:[#allocation50_spill] sm:$0xff]  ;;  %v15313_v10 = vld [vmem:[#allocation51_spill] sm:$0xff] }
 0x423   : > { %7723 = vmatprep.subr.bf16.mxu0 %v15110_v46  ;;  %v15267_v19 = vand.u32 4294901760, %v15266_v26  ;;  %v15271_v46 = vand.u32 4294901760, %v15059_v40  ;;  %v15281_v40 = vld [vmem:[#allocation81_spill] sm:$0xff]  ;;  %v15315_v53 = vld [vmem:[#allocation62_spill] sm:$0xff] }
 0x424   : > { %7477 = vmatpush1.bf16.msra.mxu1 %v7476_v32  ;;  %v15282_v42 = vand.u32 4294901760, %v15281_v40  ;;  %v15311_v32 = vld [vmem:[#allocation39_spill] sm:$0xff]  ;;  %v15321_v26 = vld [vmem:[#allocation17_spill] sm:$0xff] }
 0x425   : > { %7479 = vmatprep.subr.bf16.mxu1 %v7478_v6  ;;  %v7482_v13 = vpack.c.bf16 %v15269_v56, %v15267_v19  ;;  %v7484_v38 = vpack.c.bf16 %v15271_v46, %v15270_v0  ;;  %v15316_v6 = vld [vmem:[#allocation72_spill] sm:$0xff]  ;;  %v15322_v19 = vld [vmem:[#allocation26_spill] sm:$0xff]  ;;  %v15324_v0 = vld [vmem:[#allocation33_spill] sm:$0xff] }
 0x426   : > { %7725 = vmatpush3.bf16.msra.mxu0 %v15112_v50  ;;  %v15273_v50 = vld [vmem:[#allocation63_spill] sm:$0xff] }
 0x427   : > { %7727 = vmatprep.subr.bf16.mxu0 %v15114_v55  ;;  %v15274_v22 = vand.u32 4294901760, %v15273_v50  ;;  %v15278_v55 = vld [vmem:[#allocation68_spill] sm:$0xff] }
 0x428   : > { %7481 = vmatpush1.bf16.msra.mxu1 %v7480_v4  ;;  %v15279_v12 = vand.u32 4294901760, %v15278_v55  ;;  %v15320_v4 = vld [vmem:[#allocation14_spill] sm:$0xff] }
 0x429   : > { %7483 = vmatprep.subr.bf16.mxu1 %v7482_v13  ;;  %v7486_v17 = vpack.c.bf16 %v15274_v22, %v15272_v58 }
 0x42a   : > { %7729 = vmatpush3.bf16.msra.mxu0 %v15116_v29  ;;  %v7488_v60 = vpack.c.bf16 %v15279_v12, %v15277_v48  ;;  %v15283_v29 = vld [vmem:[#allocation82_spill] sm:$0xff] }
 0x42b   : > { %7731 = vmatprep.subr.bf16.mxu0 %v15275_v39  ;;  %v15284_v9 = vand.u32 4294901760, %v15283_v29 }
 0x42c   : > { %7485 = vmatpush1.bf16.msra.mxu1 %v7484_v38 }
 0x42d   : > { %7487 = vmatprep.subr.bf16.mxu1 %v7486_v17  ;;  %v7490_v21 = vpack.c.bf16 %v15284_v9, %v15282_v42 }
 0x42e   : > { %7733 = vmatpush3.bf16.msra.mxu0 %v15280_v36 }
 0x42f   : > { %7735 = vmatprep.subr.bf16.mxu0 %v15285_v7 }
 0x430   : > { %7489 = vmatpush1.bf16.msra.mxu1 %v7488_v60 }
 0x431   : > { %7491 = vmatprep.subr.bf16.mxu1 %v7490_v21 }
 0x432   : > { %7737 = vmatpush3.bf16.msra.mxu0 %v15290_v52 }
 0x433   : > { %7739 = vmatprep.subr.bf16.mxu0 %v15130_v45  ;;  %v15296_v45 = vld [vmem:[#allocation9_spill] sm:$0xff] }
 0x434   : > { %7493 = vmatpush1.bf16.msra.mxu1 %v7492_v2 }
 0x435   : > { %7495 = vmatprep.subr.bf16.mxu1 %v15291_v11 }
 0x436   : > { %7741 = vmatpush3.bf16.msra.mxu0 %v15136_v24  ;;  %v15297_v24 = vld [vmem:[#allocation10_spill] sm:$0xff] }
 0x437   : > { %7743 = vmatprep.subr.bf16.mxu0 %v15292_v8  ;;  %5010 = vmatmul.mubr.f32.vlgmr.msra.gmra.mrb[2].mxu1 %v15086_v62 }
 0x438   : > { %7497 = vmatpush1.bf16.msra.mxu1 %v15293_v34  ;;  %5145 = vmatprep.mubr.f32.mxu1 %v15048_v61  ;;  %v15300_v61 = vld [vmem:[#allocation15_spill] sm:$0xff] }
 0x439   : > { %7499 = vmatprep.subr.bf16.mxu1 %v15295_v15 }
 0x43a   : > { %7745 = vmatpush3.bf16.msra.mxu0 %v15294_v3 }
 0x43b   : > { %7747 = vmatprep.subr.bf16.mxu0 %v12502_v14  ;;  %v15303_v14 = vld [vmem:[#allocation103_spill] sm:$0xff] }
 0x43c   : > { %7501 = vmatpush1.bf16.msra.mxu1 %v15296_v45 }
 0x43d   : > { %7503 = vmatprep.subr.bf16.mxu1 %v15297_v24 }
 0x43e   : > { %7749 = vmatpush3.bf16.msra.mxu0 %v15156_v33  ;;  %v15305_v33 = vld [vmem:[#allocation19_spill] sm:$0xff] }
 0x440   : > { %7505 = vmatpush1.bf16.msra.mxu1 %v15298_v27 }
 0x441   : > { %6010 = vmatmul.mubr.f32.vlgmr.msra.gmra.mrb[16].mxu0 %v15086_v62  ;;  %7507 = vmatprep.subr.bf16.mxu1 %v15299_v16 }
 0x444   : > { %7509 = vmatpush1.bf16.msra.mxu1 %v15300_v61 }
 0x445   : > { %7511 = vmatprep.subr.bf16.mxu1 %v15301_v28 }
 0x448   : > { %7513 = vmatpush1.bf16.msra.mxu1 %v15302_v44 }
 0x449   : > { %7515 = vmatprep.subr.bf16.mxu1 %v15303_v14 }
 0x44c   : > { %7517 = vmatpush1.bf16.msra.mxu1 %v15304_v30 }
 0x44d   : > { %7519 = vmatprep.subr.bf16.mxu1 %v15305_v33 }
 0x450   : > { %7521 = vmatpush1.bf16.msra.mxu1 %v15306_v1 }
 0x451   : > { %7523 = vmatprep.subr.bf16.mxu1 %v15307_v31 }
 0x454   : > { %v3864_v47 = vpop.f32.mrb[4].mxu0  ;;  %7525 = vmatpush1.bf16.msra.mxu1 %v15308_v59 }
 0x455   : > { %6017 = vst [vmem:[%s12707_s8 + $0x10] sm:$0xff] %v3864_v47  ;;  %v3866_v5 = vpop.f32.mrb[5].mxu0  ;;  %7527 = vmatprep.subr.bf16.mxu1 %v15309_v41 }
 0x456   : > { %6018 = vst [vmem:[%s12707_s8 + $0x18] sm:$0xff] %v3866_v5 }
 0x458   : > { %7529 = vmatpush1.bf16.msra.mxu1 %v15310_v23 }
 0x459   : > { %7531 = vmatprep.subr.bf16.mxu1 %v15311_v32 }
 0x45c   : > { %7533 = vmatpush1.bf16.msra.mxu1 %v15312_v63 }
 0x45d   : > { %7535 = vmatprep.subr.bf16.mxu1 %v15313_v10 }
 0x460   : > { %7537 = vmatpush1.bf16.msra.mxu1 %v15314_v54 }
 0x461   : > { %7539 = vmatprep.subr.bf16.mxu1 %v15315_v53 }
 0x464   : > { %7541 = vmatpush1.bf16.msra.mxu1 %v15316_v6 }
 0x465   : > { %7543 = vmatprep.subr.bf16.mxu1 %v15317_v20 }
 0x468   : > { %7545 = vmatpush1.bf16.msra.mxu1 %v15318_v18 }
 0x469   : > { %7547 = vmatprep.subr.bf16.mxu1 %v15319_v57 }
 0x46c   : > { %7549 = vmatpush1.bf16.msra.mxu1 %v15320_v4 }
 0x46d   : > { %7551 = vmatprep.subr.bf16.mxu1 %v15321_v26 }
 0x470   : > { %7553 = vmatpush1.bf16.msra.mxu1 %v15322_v19 }
 0x471   : > { %7555 = vmatprep.subr.bf16.mxu1 %v15323_v51 }
 0x474   : > { %v6174_v56 = vpop.f32.mrb[6].mxu0  ;;  %7557 = vmatpush1.bf16.msra.mxu1 %v15324_v0 }
 0x475   : > { %v6175_v13 = vpop.f32.mrb[7].mxu0 }
 0x476   : > { %v6176_v46 = vadd.f32 %v6175_v13, %v6174_v56 }
 0x477   : > { %5147 = vmatmul.mubr.f32.vlgmr.msra.gmra.mrb[2].mxu1 %v15086_v62 }
 0x494   : > { %v6209_v38 = vpop.f32.mrb[8].mxu0 }
 0x495   : > { %v6210_v58 = vpop.f32.mrb[9].mxu0 }
 0x496   : > { %v6211_v50 = vadd.f32 %v6210_v58, %v6209_v38 }
 0x498   : > { %v5494_v22 = vadd.f32 %v6211_v50, %v6176_v46 }
 0x4b4   : > { %v6244_v17 = vpop.f32.mrb[10].mxu0 }
 0x4b5   : > { %v6245_v39 = vpop.f32.mrb[11].mxu0 }
 0x4b6   : > { %v6246_v37 = vadd.f32 %v6245_v39, %v6244_v17 }
 0x4b8   : > { %v5632_v48 = vadd.f32 %v6246_v37, %v5494_v22 }
 0x4d4   : > { %v6279_v55 = vpop.f32.mrb[12].mxu0 }
 0x4d5   : > { %v6280_v12 = vpop.f32.mrb[13].mxu0 }
 0x4d6   : > { %v6281_v60 = vadd.f32 %v6280_v12, %v6279_v55 }
 0x4d8   : > { %v5740_v36 = vadd.f32 %v6281_v60, %v5632_v48 }
 0x4f4   : > { %v6314_v40 = vpop.f32.mrb[14].mxu0 }
 0x4f5   : > { %v6315_v42 = vpop.f32.mrb[15].mxu0 }
 0x4f6   : > { %v6316_v62 = vadd.f32 %v6315_v42, %v6314_v40 }
 0x4f8   : > { %v5908_v29 = vadd.f32 %v6316_v62, %v5740_v36 }
 0x514   : > { %v6349_v9 = vpop.f32.mrb[16].mxu0 }
 0x515   : > { %v6350_v21 = vpop.f32.mrb[17].mxu0 }
 0x516   : > { %v6351_v7 = vadd.f32 %v6350_v21, %v6349_v9 }
 0x518   : > { %v6012_v43 = vadd.f32 %v6351_v7, %v5908_v29 }
 0x51a   : > { %6022 = vst.msk [vmem:[%s12707_s8 + $0x30] sm:$0xff] %vm6021_vm12, %v6012_v43 }
 0x54a   : > { %v5148_v35 = vpop.f32.mrb[2].mxu1 }
 0x54b   : > { %6019 = vst [vmem:[%s12707_s8 + $0x20] sm:$0xff] %v5148_v35  ;;  %v5150_v25 = vpop.f32.mrb[3].mxu1 }
 0x54c   : > { %6020 = vst [vmem:[%s12707_s8 + $0x28] sm:$0xff] %v5150_v25 }
 0x54d   : > { %7947 = shalt.err (!%p7944_p3)
}
 0x54e   : > { %s7948_s27 = scalar_lea.hbm %s13021_s13, 896  ;;  %s7952_s30 = scalar_lea.hbm %s13071_s4, 1792 }
 0x54f   : > { %p7949_p4 = scmp.ne.s32.totalorder %s13021_s13, %s7948_s27  ;;  %p7953_p9 = scmp.lt.u32.totalorder %s13021_s13, %s13071_s4 }
 0x550   : > { %p7954_p10 = scmp.lt.u32.totalorder %s7952_s30, %s7948_s27  ;;  %p7956_p12 = scmp.lt.u32.totalorder %s7948_s27, %s13021_s13 }
 0x551   : > { %p7950_p7 = pnand %p7949_p4, %p8073_p5 }
 0x552   : > { %p7955_p11 = por %p7954_p10, %p7953_p9 }
 0x553   : > { %p7951_p8 = pneg %p7950_p7 }
 0x554   : > { %p7957_p13 = por %p7956_p12, %p7955_p11 }
 0x556   : > { %p7958_p0 = pnand %p7957_p13, %p7951_p8 }
 0x558   : > { %7961 = shalt.err (!%p7958_p0)
}
 0x559   : > { %7798 = dma.vmem_to_hbm [thread:$0]  (%p8073_p5), %s13023_s10, 896, %s13021_s13, %s6024_s14  }
 0x55a PF: > { %p7804_p1 = scmp.ge.s32.totalorder %s7996_s18, 2  ;;  %s6050_s7 = sand.u32 1, %s7984_s15  }
 0x55b   : > { %s6051_s8 = scalar_lea.sflag [#allocation3], %s6050_s7 }
 0x55c   : > { %p7801_p2 = pnand %p7804_p1, %p8077_p6 }
 0x55e   : > { %7979 = dma.done.wait (!%p7801_p2), %s6051_s8, 896  }
 0x55f   : > { %7981 = vsyncadd (!%p7801_p2), %s6051_s8, 4294966400  ;;  %p14_p3 = scmp.ge.s32.totalorder %s8060_s21, 4   ;;  %s15325_s15 = smov %s7988_s16 }
 0x560   : > { %s15326_s16 = smov %s7992_s17  ;;  %s15327_s17 = smov %s8071_s24 }
 0x561   : > { %s15328_s18 = smov %s8060_s21  ;;  %16 = sbr.rel (!%p14_p3) target bundleno = 3 (0x3), region = 79 }
 0x568   :  { %6056 = vsyncpa [#allocation3], 1 }
 0x569   :  { %6058 = vsyncpa [#allocation3 + $0x1], 1 }

</bundles_post_ra>
